<compile_context>
chip_gen: v7x
topology: tpu7x:2x2x1
jax: 0.10.0
libtpu: 0.0.40
codegen_flags: <defaults>
</compile_context>

<pallas_src>
import functools

import jax
import jax.numpy as jnp
from jax.experimental import pallas as pl
from jax.experimental.pallas import tpu as pltpu

_PAD_ROWS = 8  # sublane-aligned left-pad region for the k=3 "ones" padding


# ----------------------------------------------------------------------------
# Pallas kernel: full Decoder forward for a block of Bblk batch elements.
# ----------------------------------------------------------------------------
def _decoder_kernel(target_ref, enc_hT_ref, enc_r_ref,
                    w_lin_ref, pos_blin_ref,
                    w_toh_ref, b_toh_ref,
                    conv_wv_ref, conv_bv_ref,
                    conv_wg_ref, conv_bg_ref,
                    w_att_from_ref, b_att_from_ref,
                    w_att_to_ref, b_att_to_ref,
                    w_fromh_ref, b_fromh_ref,
                    w_out_ref, b_out_ref,
                    out_ref, pad_ref, *, h_dim, seq_len, b_blk):
    h2 = 2 * h_dim
    L = seq_len
    Bb = b_blk
    M = Bb * L                                              # flattened token rows
    P = _PAD_ROWS
    bf16 = jnp.bfloat16

    # ---- embedding ---------------------------------------------------------
    # embedded = dropout(linear(target) + position_embedded)
    # TODO(synk): dropout is eval-mode identity (no RNG masking).
    target = target_ref[...].reshape(M, -1).astype(bf16)    # (M, x_dim)
    embedded = (jnp.dot(target, w_lin_ref[...], preferred_element_type=jnp.float32)
                + pos_blin_ref[...])                        # (M, hh) f32

    # convolution_input = to_hidden(embedded)   (channels-last)
    conv_in = (jnp.dot(embedded.astype(bf16), w_toh_ref[...],
                       preferred_element_type=jnp.float32)
               + b_toh_ref[...])                            # (M, 2h) f32

    # ---- loop-invariant hoists ---------------------------------------------
    emb_plus_batt = embedded + b_att_from_ref[...]          # (M, hh)
    enc_hT = enc_hT_ref[...]                                # (Bb, hh, Le) bf16
    enc_r = enc_r_ref[...]                                  # (Bb, Le, hh) bf16

    # k=3 conv left-padding: rows [P-2, P) of the window scratch are the
    # torch.zeros(...).fill_(1) ones rows; write the whole aligned prefix once.
    pad_ref[:, 0:P, :] = jnp.ones((Bb, P, h2), dtype=bf16)

    # TODO(synk): at much larger h_dim/Bblk switch this unrolled loop to
    # lax.fori_loop with a VMEM carry if bundle dumps show vreg spills, and
    # stage conv weights from HBM (pl.ANY + make_async_copy) on v7x.
    for i in range(5):
        # --- Conv1d(k=3) as 3 accumulating per-tap matmuls -------------------
        x_b16 = conv_in.astype(bf16)
        pad_ref[:, P:P + L, :] = x_b16.reshape(Bb, L, h2)   # current activations
        win = pad_ref[...]                                  # (Bb, P+L, 2h) bf16
        t0 = win[:, P - 2:P - 2 + L, :].reshape(M, h2)      # padded[t]
        t1 = win[:, P - 1:P - 1 + L, :].reshape(M, h2)      # padded[t+1]
        wv = conv_wv_ref[i]                                 # (3, 2h, 2h) bf16
        wg = conv_wg_ref[i]
        val = (jnp.dot(t0, wv[0], preferred_element_type=jnp.float32)
               + jnp.dot(t1, wv[1], preferred_element_type=jnp.float32)
               + jnp.dot(x_b16, wv[2], preferred_element_type=jnp.float32)
               + conv_bv_ref[i])                            # (M, 2h) f32
        gate = (jnp.dot(t0, wg[0], preferred_element_type=jnp.float32)
                + jnp.dot(t1, wg[1], preferred_element_type=jnp.float32)
                + jnp.dot(x_b16, wg[2], preferred_element_type=jnp.float32)
                + conv_bg_ref[i])
        conv_hidden = val * jax.nn.sigmoid(gate)            # GLU over channels, f32

        # --- calculate_attention ---------------------------------------------
        resid = (jnp.dot(conv_hidden.astype(bf16), w_att_from_ref[...],
                         preferred_element_type=jnp.float32)
                 + emb_plus_batt)                           # (M, hh)
        resid_b = resid.reshape(Bb, L, -1).astype(bf16)
        scores = jnp.einsum('bqd,bde->bqe', resid_b, enc_hT,
                            preferred_element_type=jnp.float32)   # (Bb, L, Le)
        mx = jnp.max(scores, axis=-1, keepdims=True)
        e = jnp.exp(scores - mx)
        s = jnp.sum(e, axis=-1, keepdims=True)
        attn = (e * pl.reciprocal(s, approx=True)).astype(bf16)
        ctx = jnp.einsum('bqe,bed->bqd', attn, enc_r,
                         preferred_element_type=jnp.float32)      # (Bb, L, hh)
        att_enc = (jnp.dot(ctx.reshape(M, -1).astype(bf16), w_att_to_ref[...],
                           preferred_element_type=jnp.float32)
                   + b_att_to_ref[...])                     # (M, 2h)
        # attention connection + block residual
        conv_in = conv_hidden + att_enc + conv_in

    hid = (jnp.dot(conv_in.astype(bf16), w_fromh_ref[...],
                   preferred_element_type=jnp.float32) + b_fromh_ref[...])
    out = (jnp.dot(hid.astype(bf16), w_out_ref[...],
                   preferred_element_type=jnp.float32) + b_out_ref[...])
    out_ref[...] = out.reshape(Bb, L, -1)                   # lane-dense (…, xpad)


# ----------------------------------------------------------------------------
# Generation-aware defaults (M target, VMEM budget, dual-TensorCore flag).
# ----------------------------------------------------------------------------
def _tpu_defaults():
    vmem_cap = None
    try:
        vmem_cap = int(pltpu.get_tpu_info().vmem_capacity_bytes)
    except Exception:
        vmem_cap = None
    kind = ""
    try:
        kind = jax.devices()[0].device_kind.lower()
    except Exception:
        pass
    dual_tc = "v7" in kind                       # 2 TensorCores / chip
    if vmem_cap is None:
        vmem_cap = (64 if dual_tc else 128) * 1024 * 1024
    vmem_limit = max(32 * 1024 * 1024, (vmem_cap * 3) // 4)   # ~75% of capacity
    m_target = 512 if "v6" in kind else 256      # MXU M-dim fill target
    return m_target, int(vmem_limit), dual_tc


# ----------------------------------------------------------------------------
# Wrapper: parameter re-layout + pallas_call plumbing.
# ----------------------------------------------------------------------------
def decoder_forward(params, target, hidden_encoder, residual_encoder,
                    *, h_dim, sequence_length, batch_block=None):
    B, L, x_dim = target.shape
    Le = hidden_encoder.shape[1]
    hh = h_dim // 2
    h2 = 2 * h_dim
    h4 = 4 * h_dim
    bf16 = jnp.bfloat16

    m_target, vmem_limit, dual_tc = _tpu_defaults()

    # ---- batch blocking: fill the MXU M dim and amortize per-step overhead --
    if batch_block is None:
        batch_block = max(1, m_target // max(L, 1))
    Bblk = max(1, min(batch_block, B))
    if dual_tc and B >= 2:
        Bblk = min(Bblk, max(1, B // 2))         # ≥2 grid steps → both v7x TCs busy
    Bpad = ((B + Bblk - 1) // Bblk) * Bblk       # pad batch instead of shrinking Bblk

    # ---- parameter re-layout (wrapper-side layout plumbing) -----------------
    pos_series = jnp.arange(sequence_length, dtype=jnp.float32)
    pos_emb = (pos_series @ params["w_pos"].T + params["b_pos"]).reshape(1, hh)

    w_lin = params["w_lin"].T.astype(bf16)                  # (x_dim, hh)
    pos_blin = pos_emb + params["b_lin"].reshape(1, hh)     # fold linear bias in (f32)
    w_toh = params["w_toh"].T.astype(bf16)                  # (hh, 2h)
    b_toh = params["b_toh"].reshape(1, h2)

    # Conv1d weight (5, out=4h, in=2h, k=3) -> per-tap slabs (5, 3, 2h_in, 4h_out),
    # GLU value/gate halves split wrapper-side.
    conv_w_t = jnp.transpose(params["conv_w"], (0, 3, 2, 1))    # (5, 3, 2h, 4h)
    conv_wv = conv_w_t[..., :h2].astype(bf16)                   # (5, 3, 2h, 2h)
    conv_wg = conv_w_t[..., h2:].astype(bf16)                   # (5, 3, 2h, 2h)
    conv_bv = params["conv_b"][:, :h2].reshape(5, 1, h2)
    conv_bg = params["conv_b"][:, h2:].reshape(5, 1, h2)

    w_att_from = params["w_att_from"].T.astype(bf16)        # (2h, hh)
    b_att_from = params["b_att_from"].reshape(1, hh)
    w_att_to = params["w_att_to"].T.astype(bf16)            # (hh, 2h)
    b_att_to = params["b_att_to"].reshape(1, h2)
    w_fromh = params["w_fromh"].T.astype(bf16)              # (2h, hh)
    b_fromh = params["b_fromh"].reshape(1, hh)

    # lane-dense output: pad x_dim up to a multiple of 128 (unmasked stores).
    # TODO(synk): for real model sizes also lane/K-pad hh, 2h to 128 multiples.
    xpad = ((x_dim + 127) // 128) * 128
    w_out = (jnp.zeros((hh, xpad), jnp.float32)
             .at[:, :x_dim].set(params["w_out"].T)).astype(bf16)
    b_out = jnp.zeros((1, xpad), jnp.float32).at[:, :x_dim].set(params["b_out"])

    # pre-transpose encoder hidden so in-kernel scores are a plain batched matmul
    enc_hT = jnp.transpose(hidden_encoder, (0, 2, 1)).astype(bf16)   # (B, hh, Le)
    enc_r = residual_encoder.astype(bf16)                            # (B, Le, hh)
    tgt = target.astype(jnp.float32)
    if Bpad != B:
        padb = ((0, Bpad - B), (0, 0), (0, 0))
        tgt = jnp.pad(tgt, padb)
        enc_hT = jnp.pad(enc_hT, padb)
        enc_r = jnp.pad(enc_r, padb)

    def wspec(shape):
        # loop-invariant (weight) block: constant index map, single-buffered.
        idx = lambda b, n=len(shape): (0,) * n
        try:
            return pl.BlockSpec(shape, idx, pipeline_mode=pl.Buffered(1))
        except TypeError:            # older jax without pipeline_mode kwarg
            return pl.BlockSpec(shape, idx)

    in_specs = [
        pl.BlockSpec((Bblk, L, x_dim), lambda b: (b, 0, 0)),    # target
        pl.BlockSpec((Bblk, hh, Le), lambda b: (b, 0, 0)),      # hidden_encoder^T
        pl.BlockSpec((Bblk, Le, hh), lambda b: (b, 0, 0)),      # residual_encoder
        wspec((x_dim, hh)), wspec((1, hh)),                     # linear + (pos+bias)
        wspec((hh, h2)), wspec((1, h2)),                        # to_hidden
        wspec((5, 3, h2, h2)), wspec((5, 1, h2)),               # conv value taps
        wspec((5, 3, h2, h2)), wspec((5, 1, h2)),               # conv gate taps
        wspec((h2, hh)), wspec((1, hh)),                        # attention_from_hidden
        wspec((hh, h2)), wspec((1, h2)),                        # attention_to_hidden
        wspec((h2, hh)), wspec((1, hh)),                        # from_hidden
        wspec((hh, xpad)), wspec((1, xpad)),                    # output (lane-padded)
    ]
    out_spec = pl.BlockSpec((Bblk, L, xpad), lambda b: (b, 0, 0))

    # ---- advisory cost estimate ---------------------------------------------
    Mtot = Bpad * L
    flops = (2 * Mtot * x_dim * hh + 2 * Mtot * hh * h2
             + 5 * (2 * Mtot * 3 * h2 * h4          # conv (value + gate, 3 taps)
                    + 2 * Mtot * h2 * hh            # attention_from_hidden
                    + 2 * Bpad * L * hh * Le        # scores
                    + 2 * Bpad * L * Le * hh        # context
                    + 2 * Mtot * hh * h2)           # attention_to_hidden
             + 2 * Mtot * h2 * hh + 2 * Mtot * hh * xpad)
    transc = 5 * (Bpad * L * Le + Mtot * h2)        # exp + sigmoid
    args = (tgt, enc_hT, enc_r, w_lin, pos_blin, w_toh, b_toh,
            conv_wv, conv_bv, conv_wg, conv_bg,
            w_att_from, b_att_from, w_att_to, b_att_to,
            w_fromh, b_fromh, w_out, b_out)
    bytes_accessed = sum(int(a.size) * a.dtype.itemsize for a in args) \
        + Bpad * L * xpad * 4
    cost = pl.CostEstimate(flops=int(flops), transcendentals=int(transc),
                           bytes_accessed=int(bytes_accessed))

    kernel = functools.partial(_decoder_kernel, h_dim=h_dim, seq_len=L, b_blk=Bblk)
    out = pl.pallas_call(
        kernel,
        out_shape=jax.ShapeDtypeStruct((Bpad, L, xpad), jnp.float32),
        grid=(Bpad // Bblk,),
        in_specs=in_specs,
        out_specs=out_spec,
        scratch_shapes=[pltpu.VMEM((Bblk, _PAD_ROWS + L, h2), bf16)],
        compiler_params=pltpu.CompilerParams(
            dimension_semantics=("parallel",),       # per-batch-block independent
            vmem_limit_bytes=vmem_limit),
        cost_estimate=cost,
    )(*args)
    return out[:B, :, :x_dim]


# ----------------------------------------------------------------------------
# Pure-JAX f32 reference mirroring the PyTorch forward (NCL layout, eval mode).
# ----------------------------------------------------------------------------
def decoder_reference(p, target, enc_h, enc_r, *, h_dim, sequence_length):
    B = target.shape[0]
    lin_out = target @ p["w_lin"].T + p["b_lin"]
    pos_series = jnp.tile(jnp.arange(sequence_length, dtype=jnp.float32), (B, 1))
    pos_emb = (pos_series @ p["w_pos"].T + p["b_pos"])[:, None, :]
    embedded = lin_out + pos_emb
    conv_in = jnp.transpose(embedded @ p["w_toh"].T + p["b_toh"], (0, 2, 1))  # (B,2h,L)
    for i in range(5):
        pad = jnp.ones((B, 2 * h_dim, 2), jnp.float32)
        padded = jnp.concatenate([pad, conv_in], axis=2)
        y = jax.lax.conv_general_dilated(
            padded, p["conv_w"][i], window_strides=(1,), padding="VALID",
            dimension_numbers=("NCH", "OIH", "NCH"))
        y = y + p["conv_b"][i][None, :, None]
        a, g = jnp.split(y, 2, axis=1)
        conv_h = a * jax.nn.sigmoid(g)
        resid = jnp.transpose(conv_h, (0, 2, 1)) @ p["w_att_from"].T + p["b_att_from"] + embedded
        attn = jax.nn.softmax(resid @ jnp.transpose(enc_h, (0, 2, 1)), axis=2)
        att_enc = (attn @ enc_r) @ p["w_att_to"].T + p["b_att_to"]
        conv_h = conv_h + jnp.transpose(att_enc, (0, 2, 1))
        conv_h = conv_h + conv_in
        conv_in = conv_h
    hid = jnp.transpose(conv_in, (0, 2, 1)) @ p["w_fromh"].T + p["b_fromh"]
    return hid @ p["w_out"].T + p["b_out"]


# ----------------------------------------------------------------------------
# Deterministic parameter construction (PyTorch __init__ shapes).
# ----------------------------------------------------------------------------
def make_params(key, x_dim, h_dim, sequence_length):
    hh = h_dim // 2
    h2 = 2 * h_dim
    h4 = 4 * h_dim
    ks = jax.random.split(key, 16)
    n = lambda k, s, scale=0.1: scale * jax.random.normal(k, s, dtype=jnp.float32)
    return {
        "w_lin": n(ks[0], (hh, x_dim)),       "b_lin": n(ks[1], (hh,), 0.02),
        "w_pos": n(ks[2], (hh, sequence_length)), "b_pos": n(ks[3], (hh,), 0.02),
        "conv_w": n(ks[4], (5, h4, h2, 3), 0.05), "conv_b": n(ks[5], (5, h4), 0.02),
        "w_toh": n(ks[6], (h2, hh)),          "b_toh": n(ks[7], (h2,), 0.02),
        "w_fromh": n(ks[8], (hh, h2)),        "b_fromh": n(ks[9], (hh,), 0.02),
        "w_att_to": n(ks[10], (h2, hh)),      "b_att_to": n(ks[11], (h2,), 0.02),
        "w_att_from": n(ks[12], (hh, h2)),    "b_att_from": n(ks[13], (hh,), 0.02),
        "w_out": n(ks[14], (x_dim, hh)),      "b_out": n(ks[15], (x_dim,), 0.02),
    }


if __name__ == "__main__":
    B, x_dim, h_dim, seq_len = 2, 4, 16, 8
    hh = h_dim // 2

    key = jax.random.PRNGKey(0)
    k_t, k_h, k_r, k_p = jax.random.split(key, 4)
    target = jax.random.normal(k_t, (B, seq_len, x_dim), dtype=jnp.float32)
    hidden_encoder = jax.random.normal(k_h, (B, seq_len, hh), dtype=jnp.float32)
    residual_encoder = jax.random.normal(k_r, (B, seq_len, hh), dtype=jnp.float32)
    params = make_params(k_p, x_dim, h_dim, seq_len)

    out = decoder_forward(params, target, hidden_encoder, residual_encoder,
                          h_dim=h_dim, sequence_length=seq_len)
    out = jax.block_until_ready(out)

    ref = decoder_reference(params, target, hidden_encoder, residual_encoder,
                            h_dim=h_dim, sequence_length=seq_len)
    assert out.shape == (B, seq_len, x_dim)
    # tolerance loosened for bf16 MXU inputs (f32 accumulation, f32 elementwise)
    assert jnp.allclose(out, ref, atol=3e-2, rtol=3e-2), "mismatch vs reference"

    print("KERNEL_OK")
</pallas_src>

<mosaic_0001>
module attributes {stable_mosaic.version = 11 : i64} {
  func.func @_decoder_kernel(%arg0: i32, %arg1: memref<2x8x4xf32, #tpu.memory_space<vmem>>, %arg2: memref<2x8x8xbf16, #tpu.memory_space<vmem>>, %arg3: memref<2x8x8xbf16, #tpu.memory_space<vmem>>, %arg4: memref<4x8xbf16, #tpu.memory_space<vmem>>, %arg5: memref<1x8xf32, #tpu.memory_space<vmem>>, %arg6: memref<8x32xbf16, #tpu.memory_space<vmem>>, %arg7: memref<1x32xf32, #tpu.memory_space<vmem>>, %arg8: memref<5x3x32x32xbf16, #tpu.memory_space<vmem>>, %arg9: memref<5x1x32xf32, #tpu.memory_space<vmem>>, %arg10: memref<5x3x32x32xbf16, #tpu.memory_space<vmem>>, %arg11: memref<5x1x32xf32, #tpu.memory_space<vmem>>, %arg12: memref<32x8xbf16, #tpu.memory_space<vmem>>, %arg13: memref<1x8xf32, #tpu.memory_space<vmem>>, %arg14: memref<8x32xbf16, #tpu.memory_space<vmem>>, %arg15: memref<1x32xf32, #tpu.memory_space<vmem>>, %arg16: memref<32x8xbf16, #tpu.memory_space<vmem>>, %arg17: memref<1x8xf32, #tpu.memory_space<vmem>>, %arg18: memref<8x128xbf16, #tpu.memory_space<vmem>>, %arg19: memref<1x128xf32, #tpu.memory_space<vmem>>, %arg20: memref<2x8x128xf32, #tpu.memory_space<vmem>>, %arg21: memref<2x16x32xbf16, #tpu.memory_space<vmem>>) attributes {dimension_semantics = [#tpu.dimension_semantics<parallel>], iteration_bounds = array<i64: 1>, scalar_prefetch = 0 : i64, scratch_operands = 1 : i64, tpu.core_type = #tpu.core_type<tc>, window_params = [{transform_indices = @transform_0, window_bounds = array<i64: 2, 8, 4>}, {transform_indices = @transform_1, window_bounds = array<i64: 2, 8, 8>}, {transform_indices = @transform_2, window_bounds = array<i64: 2, 8, 8>}, {pipeline_mode = #tpu.pipeline_mode<synchronous>, transform_indices = @transform_3, window_bounds = array<i64: 4, 8>}, {pipeline_mode = #tpu.pipeline_mode<synchronous>, transform_indices = @transform_4, window_bounds = array<i64: 1, 8>}, {pipeline_mode = #tpu.pipeline_mode<synchronous>, transform_indices = @transform_5, window_bounds = array<i64: 8, 32>}, {pipeline_mode = #tpu.pipeline_mode<synchronous>, transform_indices = @transform_6, window_bounds = array<i64: 1, 32>}, {pipeline_mode = #tpu.pipeline_mode<synchronous>, transform_indices = @transform_7, window_bounds = array<i64: 5, 3, 32, 32>}, {pipeline_mode = #tpu.pipeline_mode<synchronous>, transform_indices = @transform_8, window_bounds = array<i64: 5, 1, 32>}, {pipeline_mode = #tpu.pipeline_mode<synchronous>, transform_indices = @transform_9, window_bounds = array<i64: 5, 3, 32, 32>}, {pipeline_mode = #tpu.pipeline_mode<synchronous>, transform_indices = @transform_10, window_bounds = array<i64: 5, 1, 32>}, {pipeline_mode = #tpu.pipeline_mode<synchronous>, transform_indices = @transform_11, window_bounds = array<i64: 32, 8>}, {pipeline_mode = #tpu.pipeline_mode<synchronous>, transform_indices = @transform_12, window_bounds = array<i64: 1, 8>}, {pipeline_mode = #tpu.pipeline_mode<synchronous>, transform_indices = @transform_13, window_bounds = array<i64: 8, 32>}, {pipeline_mode = #tpu.pipeline_mode<synchronous>, transform_indices = @transform_14, window_bounds = array<i64: 1, 32>}, {pipeline_mode = #tpu.pipeline_mode<synchronous>, transform_indices = @transform_15, window_bounds = array<i64: 32, 8>}, {pipeline_mode = #tpu.pipeline_mode<synchronous>, transform_indices = @transform_16, window_bounds = array<i64: 1, 8>}, {pipeline_mode = #tpu.pipeline_mode<synchronous>, transform_indices = @transform_17, window_bounds = array<i64: 8, 128>}, {pipeline_mode = #tpu.pipeline_mode<synchronous>, transform_indices = @transform_18, window_bounds = array<i64: 1, 128>}, {transform_indices = @transform_19, window_bounds = array<i64: 2, 8, 128>}]} {
    %c0 = arith.constant 0 : index
    %c0_0 = arith.constant 0 : index
    %c0_1 = arith.constant 0 : index
    %0 = vector.load %arg1[%c0, %c0_0, %c0_1] : memref<2x8x4xf32, #tpu.memory_space<vmem>>, vector<2x8x4xf32>
    %1 = vector.shape_cast %0 : vector<2x8x4xf32> to vector<16x4xf32>
    %2 = arith.truncf %1 : vector<16x4xf32> to vector<16x4xbf16>
    %c0_2 = arith.constant 0 : index
    %c0_3 = arith.constant 0 : index
    %3 = vector.load %arg4[%c0_2, %c0_3] : memref<4x8xbf16, #tpu.memory_space<vmem>>, vector<4x8xbf16>
    %cst = arith.constant dense<0.000000e+00> : vector<16x8xf32>
    %4 = tpu.matmul %2, %3, %cst {dimension_numbers = #tpu.dot_dimension_numbers<[1], [0], [0], [1], [0, 0, 1, 1], [], []>} : vector<16x4xbf16>, vector<4x8xbf16>, vector<16x8xf32> -> vector<16x8xf32>
    %c0_4 = arith.constant 0 : index
    %c0_5 = arith.constant 0 : index
    %5 = vector.load %arg5[%c0_4, %c0_5] : memref<1x8xf32, #tpu.memory_space<vmem>>, vector<1x8xf32>
    %6 = vector.broadcast %5 : vector<1x8xf32> to vector<16x8xf32>
    %7 = arith.addf %4, %6 : vector<16x8xf32>
    %8 = arith.truncf %7 : vector<16x8xf32> to vector<16x8xbf16>
    %c0_6 = arith.constant 0 : index
    %c0_7 = arith.constant 0 : index
    %9 = vector.load %arg6[%c0_6, %c0_7] : memref<8x32xbf16, #tpu.memory_space<vmem>>, vector<8x32xbf16>
    %cst_8 = arith.constant dense<0.000000e+00> : vector<16x32xf32>
    %10 = tpu.matmul %8, %9, %cst_8 {dimension_numbers = #tpu.dot_dimension_numbers<[1], [0], [0], [1], [0, 0, 1, 1], [], []>} : vector<16x8xbf16>, vector<8x32xbf16>, vector<16x32xf32> -> vector<16x32xf32>
    %c0_9 = arith.constant 0 : index
    %c0_10 = arith.constant 0 : index
    %11 = vector.load %arg7[%c0_9, %c0_10] : memref<1x32xf32, #tpu.memory_space<vmem>>, vector<1x32xf32>
    %12 = vector.broadcast %11 : vector<1x32xf32> to vector<16x32xf32>
    %13 = arith.addf %10, %12 : vector<16x32xf32>
    %c0_11 = arith.constant 0 : index
    %c0_12 = arith.constant 0 : index
    %14 = vector.load %arg13[%c0_11, %c0_12] : memref<1x8xf32, #tpu.memory_space<vmem>>, vector<1x8xf32>
    %15 = vector.broadcast %14 : vector<1x8xf32> to vector<16x8xf32>
    %16 = arith.addf %7, %15 : vector<16x8xf32>
    %c0_13 = arith.constant 0 : index
    %c0_14 = arith.constant 0 : index
    %c0_15 = arith.constant 0 : index
    %17 = vector.load %arg2[%c0_13, %c0_14, %c0_15] : memref<2x8x8xbf16, #tpu.memory_space<vmem>>, vector<2x8x8xbf16>
    %c0_16 = arith.constant 0 : index
    %c0_17 = arith.constant 0 : index
    %c0_18 = arith.constant 0 : index
    %18 = vector.load %arg3[%c0_16, %c0_17, %c0_18] : memref<2x8x8xbf16, #tpu.memory_space<vmem>>, vector<2x8x8xbf16>
    %cst_19 = arith.constant 1.000000e+00 : bf16
    %19 = vector.broadcast %cst_19 : bf16 to vector<2x8x32xbf16>
    %c0_20 = arith.constant 0 : index
    %c0_21 = arith.constant 0 : index
    %c0_22 = arith.constant 0 : index
    %20 = vector.load %arg21[%c0_20, %c0_21, %c0_22] : memref<2x16x32xbf16, #tpu.memory_space<vmem>>, vector<2x8x32xbf16>
    tpu.vector_store %arg21[%c0_20, %c0_21, %c0_22], %19 {strides = array<i32>} : memref<2x16x32xbf16, #tpu.memory_space<vmem>>, vector<2x8x32xbf16>,
    %21 = arith.truncf %13 : vector<16x32xf32> to vector<16x32xbf16>
    %22 = vector.shape_cast %21 : vector<16x32xbf16> to vector<2x8x32xbf16>
    %c0_23 = arith.constant 0 : index
    %c8 = arith.constant 8 : index
    %c0_24 = arith.constant 0 : index
    %23 = vector.load %arg21[%c0_23, %c8, %c0_24] : memref<2x16x32xbf16, #tpu.memory_space<vmem>>, vector<2x8x32xbf16>
    tpu.vector_store %arg21[%c0_23, %c8, %c0_24], %22 {strides = array<i32>} : memref<2x16x32xbf16, #tpu.memory_space<vmem>>, vector<2x8x32xbf16>,
    %c0_25 = arith.constant 0 : index
    %c0_26 = arith.constant 0 : index
    %c0_27 = arith.constant 0 : index
    %24 = vector.load %arg21[%c0_25, %c0_26, %c0_27] : memref<2x16x32xbf16, #tpu.memory_space<vmem>>, vector<2x16x32xbf16>
    %25 = vector.extract_strided_slice %24 {offsets = [0, 6, 0], sizes = [2, 8, 32], strides = [1, 1, 1]} : vector<2x16x32xbf16> to vector<2x8x32xbf16>
    %26 = vector.shape_cast %25 : vector<2x8x32xbf16> to vector<16x32xbf16>
    %27 = vector.extract_strided_slice %24 {offsets = [0, 7, 0], sizes = [2, 8, 32], strides = [1, 1, 1]} : vector<2x16x32xbf16> to vector<2x8x32xbf16>
    %28 = vector.shape_cast %27 : vector<2x8x32xbf16> to vector<16x32xbf16>
    %c0_28 = arith.constant 0 : index
    %c0_29 = arith.constant 0 : index
    %c0_30 = arith.constant 0 : index
    %c0_31 = arith.constant 0 : index
    %29 = vector.load %arg8[%c0_28, %c0_29, %c0_30, %c0_31] : memref<5x3x32x32xbf16, #tpu.memory_space<vmem>>, vector<1x3x32x32xbf16>
    %30 = vector.shape_cast %29 : vector<1x3x32x32xbf16> to vector<3x32x32xbf16>
    %c0_32 = arith.constant 0 : index
    %c0_33 = arith.constant 0 : index
    %c0_34 = arith.constant 0 : index
    %c0_35 = arith.constant 0 : index
    %31 = vector.load %arg10[%c0_32, %c0_33, %c0_34, %c0_35] : memref<5x3x32x32xbf16, #tpu.memory_space<vmem>>, vector<1x3x32x32xbf16>
    %32 = vector.shape_cast %31 : vector<1x3x32x32xbf16> to vector<3x32x32xbf16>
    %33 = vector.extract_strided_slice %30 {offsets = [0, 0, 0], sizes = [1, 32, 32], strides = [1, 1, 1]} : vector<3x32x32xbf16> to vector<1x32x32xbf16>
    %34 = vector.shape_cast %33 : vector<1x32x32xbf16> to vector<32x32xbf16>
    %cst_36 = arith.constant dense<0.000000e+00> : vector<16x32xf32>
    %35 = tpu.matmul %26, %34, %cst_36 {dimension_numbers = #tpu.dot_dimension_numbers<[1], [0], [0], [1], [0, 0, 1, 1], [], []>} : vector<16x32xbf16>, vector<32x32xbf16>, vector<16x32xf32> -> vector<16x32xf32>
    %36 = vector.extract_strided_slice %30 {offsets = [1, 0, 0], sizes = [1, 32, 32], strides = [1, 1, 1]} : vector<3x32x32xbf16> to vector<1x32x32xbf16>
    %37 = vector.shape_cast %36 : vector<1x32x32xbf16> to vector<32x32xbf16>
    %cst_37 = arith.constant dense<0.000000e+00> : vector<16x32xf32>
    %38 = tpu.matmul %28, %37, %cst_37 {dimension_numbers = #tpu.dot_dimension_numbers<[1], [0], [0], [1], [0, 0, 1, 1], [], []>} : vector<16x32xbf16>, vector<32x32xbf16>, vector<16x32xf32> -> vector<16x32xf32>
    %39 = arith.addf %35, %38 : vector<16x32xf32>
    %40 = vector.extract_strided_slice %30 {offsets = [2, 0, 0], sizes = [1, 32, 32], strides = [1, 1, 1]} : vector<3x32x32xbf16> to vector<1x32x32xbf16>
    %41 = vector.shape_cast %40 : vector<1x32x32xbf16> to vector<32x32xbf16>
    %cst_38 = arith.constant dense<0.000000e+00> : vector<16x32xf32>
    %42 = tpu.matmul %21, %41, %cst_38 {dimension_numbers = #tpu.dot_dimension_numbers<[1], [0], [0], [1], [0, 0, 1, 1], [], []>} : vector<16x32xbf16>, vector<32x32xbf16>, vector<16x32xf32> -> vector<16x32xf32>
    %43 = arith.addf %39, %42 : vector<16x32xf32>
    %c0_39 = arith.constant 0 : index
    %c0_40 = arith.constant 0 : index
    %c0_41 = arith.constant 0 : index
    %44 = vector.load %arg9[%c0_39, %c0_40, %c0_41] : memref<5x1x32xf32, #tpu.memory_space<vmem>>, vector<1x1x32xf32>
    %45 = vector.shape_cast %44 : vector<1x1x32xf32> to vector<1x32xf32>
    %46 = vector.broadcast %45 : vector<1x32xf32> to vector<16x32xf32>
    %47 = arith.addf %43, %46 : vector<16x32xf32>
    %48 = vector.extract_strided_slice %32 {offsets = [0, 0, 0], sizes = [1, 32, 32], strides = [1, 1, 1]} : vector<3x32x32xbf16> to vector<1x32x32xbf16>
    %49 = vector.shape_cast %48 : vector<1x32x32xbf16> to vector<32x32xbf16>
    %cst_42 = arith.constant dense<0.000000e+00> : vector<16x32xf32>
    %50 = tpu.matmul %26, %49, %cst_42 {dimension_numbers = #tpu.dot_dimension_numbers<[1], [0], [0], [1], [0, 0, 1, 1], [], []>} : vector<16x32xbf16>, vector<32x32xbf16>, vector<16x32xf32> -> vector<16x32xf32>
    %51 = vector.extract_strided_slice %32 {offsets = [1, 0, 0], sizes = [1, 32, 32], strides = [1, 1, 1]} : vector<3x32x32xbf16> to vector<1x32x32xbf16>
    %52 = vector.shape_cast %51 : vector<1x32x32xbf16> to vector<32x32xbf16>
    %cst_43 = arith.constant dense<0.000000e+00> : vector<16x32xf32>
    %53 = tpu.matmul %28, %52, %cst_43 {dimension_numbers = #tpu.dot_dimension_numbers<[1], [0], [0], [1], [0, 0, 1, 1], [], []>} : vector<16x32xbf16>, vector<32x32xbf16>, vector<16x32xf32> -> vector<16x32xf32>
    %54 = arith.addf %50, %53 : vector<16x32xf32>
    %55 = vector.extract_strided_slice %32 {offsets = [2, 0, 0], sizes = [1, 32, 32], strides = [1, 1, 1]} : vector<3x32x32xbf16> to vector<1x32x32xbf16>
    %56 = vector.shape_cast %55 : vector<1x32x32xbf16> to vector<32x32xbf16>
    %cst_44 = arith.constant dense<0.000000e+00> : vector<16x32xf32>
    %57 = tpu.matmul %21, %56, %cst_44 {dimension_numbers = #tpu.dot_dimension_numbers<[1], [0], [0], [1], [0, 0, 1, 1], [], []>} : vector<16x32xbf16>, vector<32x32xbf16>, vector<16x32xf32> -> vector<16x32xf32>
    %58 = arith.addf %54, %57 : vector<16x32xf32>
    %c0_45 = arith.constant 0 : index
    %c0_46 = arith.constant 0 : index
    %c0_47 = arith.constant 0 : index
    %59 = vector.load %arg11[%c0_45, %c0_46, %c0_47] : memref<5x1x32xf32, #tpu.memory_space<vmem>>, vector<1x1x32xf32>
    %60 = vector.shape_cast %59 : vector<1x1x32xf32> to vector<1x32xf32>
    %61 = vector.broadcast %60 : vector<1x32xf32> to vector<16x32xf32>
    %62 = arith.addf %58, %61 : vector<16x32xf32>
    %63 = arith.negf %62 : vector<16x32xf32>
    %64 = math.exp %63 : vector<16x32xf32>
    %cst_48 = arith.constant 1.000000e+00 : f32
    %65 = vector.broadcast %cst_48 : f32 to vector<16x32xf32>
    %66 = arith.addf %65, %64 : vector<16x32xf32>
    %67 = arith.divf %65, %66 : vector<16x32xf32>
    %68 = arith.mulf %47, %67 : vector<16x32xf32>
    %69 = arith.truncf %68 : vector<16x32xf32> to vector<16x32xbf16>
    %c0_49 = arith.constant 0 : index
    %c0_50 = arith.constant 0 : index
    %70 = vector.load %arg12[%c0_49, %c0_50] : memref<32x8xbf16, #tpu.memory_space<vmem>>, vector<32x8xbf16>
    %cst_51 = arith.constant dense<0.000000e+00> : vector<16x8xf32>
    %71 = tpu.matmul %69, %70, %cst_51 {dimension_numbers = #tpu.dot_dimension_numbers<[1], [0], [0], [1], [0, 0, 1, 1], [], []>} : vector<16x32xbf16>, vector<32x8xbf16>, vector<16x8xf32> -> vector<16x8xf32>
    %72 = arith.addf %71, %16 : vector<16x8xf32>
    %73 = vector.shape_cast %72 : vector<16x8xf32> to vector<2x8x8xf32>
    %74 = arith.truncf %73 : vector<2x8x8xf32> to vector<2x8x8xbf16>
    "tpu.trace_start"() <{level = 10 : i32, message = "bqd,bde->bqe"}> : () -> ()
    %cst_52 = arith.constant dense<0.000000e+00> : vector<2x8x8xf32>
    %75 = tpu.matmul %74, %17, %cst_52 {dimension_numbers = #tpu.dot_dimension_numbers<[2], [1], [1], [2], [0, 0, 0, 1, 1, 2], [0], [0]>} : vector<2x8x8xbf16>, vector<2x8x8xbf16>, vector<2x8x8xf32> -> vector<2x8x8xf32>
    "tpu.trace_stop"() : () -> ()
    %cst_53 = arith.constant dense<0xFF800000> : vector<2x8xf32>
    %76 = vector.multi_reduction <maximumf>, %75, %cst_53 [2] : vector<2x8x8xf32> to vector<2x8xf32>
    %77 = vector.shape_cast %76 : vector<2x8xf32> to vector<2x8x1xf32>
    %78 = vector.broadcast %77 : vector<2x8x1xf32> to vector<2x8x8xf32>
    %79 = arith.subf %75, %78 : vector<2x8x8xf32>
    %80 = math.exp %79 : vector<2x8x8xf32>
    %cst_54 = arith.constant dense<0.000000e+00> : vector<2x8xf32>
    %81 = vector.multi_reduction <add>, %80, %cst_54 [2] : vector<2x8x8xf32> to vector<2x8xf32>
    %82 = vector.shape_cast %81 : vector<2x8xf32> to vector<2x8x1xf32>
    %83 = tpu.reciprocal %82 {approx = true} : vector<2x8x1xf32> -> vector<2x8x1xf32>
    %84 = vector.broadcast %83 : vector<2x8x1xf32> to vector<2x8x8xf32>
    %85 = arith.mulf %80, %84 : vector<2x8x8xf32>
    %86 = arith.truncf %85 : vector<2x8x8xf32> to vector<2x8x8xbf16>
    "tpu.trace_start"() <{level = 10 : i32, message = "bqe,bed->bqd"}> : () -> ()
    %cst_55 = arith.constant dense<0.000000e+00> : vector<2x8x8xf32>
    %87 = tpu.matmul %86, %18, %cst_55 {dimension_numbers = #tpu.dot_dimension_numbers<[2], [1], [1], [2], [0, 0, 0, 1, 1, 2], [0], [0]>} : vector<2x8x8xbf16>, vector<2x8x8xbf16>, vector<2x8x8xf32> -> vector<2x8x8xf32>
    "tpu.trace_stop"() : () -> ()
    %88 = vector.shape_cast %87 : vector<2x8x8xf32> to vector<16x8xf32>
    %89 = arith.truncf %88 : vector<16x8xf32> to vector<16x8xbf16>
    %c0_56 = arith.constant 0 : index
    %c0_57 = arith.constant 0 : index
    %90 = vector.load %arg14[%c0_56, %c0_57] : memref<8x32xbf16, #tpu.memory_space<vmem>>, vector<8x32xbf16>
    %cst_58 = arith.constant dense<0.000000e+00> : vector<16x32xf32>
    %91 = tpu.matmul %89, %90, %cst_58 {dimension_numbers = #tpu.dot_dimension_numbers<[1], [0], [0], [1], [0, 0, 1, 1], [], []>} : vector<16x8xbf16>, vector<8x32xbf16>, vector<16x32xf32> -> vector<16x32xf32>
    %c0_59 = arith.constant 0 : index
    %c0_60 = arith.constant 0 : index
    %92 = vector.load %arg15[%c0_59, %c0_60] : memref<1x32xf32, #tpu.memory_space<vmem>>, vector<1x32xf32>
    %93 = vector.broadcast %92 : vector<1x32xf32> to vector<16x32xf32>
    %94 = arith.addf %91, %93 : vector<16x32xf32>
    %95 = arith.addf %68, %94 : vector<16x32xf32>
    %96 = arith.addf %95, %13 : vector<16x32xf32>
    %97 = arith.truncf %96 : vector<16x32xf32> to vector<16x32xbf16>
    %98 = vector.shape_cast %97 : vector<16x32xbf16> to vector<2x8x32xbf16>
    %c0_61 = arith.constant 0 : index
    %c8_62 = arith.constant 8 : index
    %c0_63 = arith.constant 0 : index
    %99 = vector.load %arg21[%c0_61, %c8_62, %c0_63] : memref<2x16x32xbf16, #tpu.memory_space<vmem>>, vector<2x8x32xbf16>
    tpu.vector_store %arg21[%c0_61, %c8_62, %c0_63], %98 {strides = array<i32>} : memref<2x16x32xbf16, #tpu.memory_space<vmem>>, vector<2x8x32xbf16>,
    %c0_64 = arith.constant 0 : index
    %c0_65 = arith.constant 0 : index
    %c0_66 = arith.constant 0 : index
    %100 = vector.load %arg21[%c0_64, %c0_65, %c0_66] : memref<2x16x32xbf16, #tpu.memory_space<vmem>>, vector<2x16x32xbf16>
    %101 = vector.extract_strided_slice %100 {offsets = [0, 6, 0], sizes = [2, 8, 32], strides = [1, 1, 1]} : vector<2x16x32xbf16> to vector<2x8x32xbf16>
    %102 = vector.shape_cast %101 : vector<2x8x32xbf16> to vector<16x32xbf16>
    %103 = vector.extract_strided_slice %100 {offsets = [0, 7, 0], sizes = [2, 8, 32], strides = [1, 1, 1]} : vector<2x16x32xbf16> to vector<2x8x32xbf16>
    %104 = vector.shape_cast %103 : vector<2x8x32xbf16> to vector<16x32xbf16>
    %c1 = arith.constant 1 : index
    %c0_67 = arith.constant 0 : index
    %c0_68 = arith.constant 0 : index
    %c0_69 = arith.constant 0 : index
    %105 = vector.load %arg8[%c1, %c0_67, %c0_68, %c0_69] : memref<5x3x32x32xbf16, #tpu.memory_space<vmem>>, vector<1x3x32x32xbf16>
    %106 = vector.shape_cast %105 : vector<1x3x32x32xbf16> to vector<3x32x32xbf16>
    %c1_70 = arith.constant 1 : index
    %c0_71 = arith.constant 0 : index
    %c0_72 = arith.constant 0 : index
    %c0_73 = arith.constant 0 : index
    %107 = vector.load %arg10[%c1_70, %c0_71, %c0_72, %c0_73] : memref<5x3x32x32xbf16, #tpu.memory_space<vmem>>, vector<1x3x32x32xbf16>
    %108 = vector.shape_cast %107 : vector<1x3x32x32xbf16> to vector<3x32x32xbf16>
    %109 = vector.extract_strided_slice %106 {offsets = [0, 0, 0], sizes = [1, 32, 32], strides = [1, 1, 1]} : vector<3x32x32xbf16> to vector<1x32x32xbf16>
    %110 = vector.shape_cast %109 : vector<1x32x32xbf16> to vector<32x32xbf16>
    %cst_74 = arith.constant dense<0.000000e+00> : vector<16x32xf32>
    %111 = tpu.matmul %102, %110, %cst_74 {dimension_numbers = #tpu.dot_dimension_numbers<[1], [0], [0], [1], [0, 0, 1, 1], [], []>} : vector<16x32xbf16>, vector<32x32xbf16>, vector<16x32xf32> -> vector<16x32xf32>
    %112 = vector.extract_strided_slice %106 {offsets = [1, 0, 0], sizes = [1, 32, 32], strides = [1, 1, 1]} : vector<3x32x32xbf16> to vector<1x32x32xbf16>
    %113 = vector.shape_cast %112 : vector<1x32x32xbf16> to vector<32x32xbf16>
    %cst_75 = arith.constant dense<0.000000e+00> : vector<16x32xf32>
    %114 = tpu.matmul %104, %113, %cst_75 {dimension_numbers = #tpu.dot_dimension_numbers<[1], [0], [0], [1], [0, 0, 1, 1], [], []>} : vector<16x32xbf16>, vector<32x32xbf16>, vector<16x32xf32> -> vector<16x32xf32>
    %115 = arith.addf %111, %114 : vector<16x32xf32>
    %116 = vector.extract_strided_slice %106 {offsets = [2, 0, 0], sizes = [1, 32, 32], strides = [1, 1, 1]} : vector<3x32x32xbf16> to vector<1x32x32xbf16>
    %117 = vector.shape_cast %116 : vector<1x32x32xbf16> to vector<32x32xbf16>
    %cst_76 = arith.constant dense<0.000000e+00> : vector<16x32xf32>
    %118 = tpu.matmul %97, %117, %cst_76 {dimension_numbers = #tpu.dot_dimension_numbers<[1], [0], [0], [1], [0, 0, 1, 1], [], []>} : vector<16x32xbf16>, vector<32x32xbf16>, vector<16x32xf32> -> vector<16x32xf32>
    %119 = arith.addf %115, %118 : vector<16x32xf32>
    %c1_77 = arith.constant 1 : index
    %c0_78 = arith.constant 0 : index
    %c0_79 = arith.constant 0 : index
    %120 = vector.load %arg9[%c1_77, %c0_78, %c0_79] : memref<5x1x32xf32, #tpu.memory_space<vmem>>, vector<1x1x32xf32>
    %121 = vector.shape_cast %120 : vector<1x1x32xf32> to vector<1x32xf32>
    %122 = vector.broadcast %121 : vector<1x32xf32> to vector<16x32xf32>
    %123 = arith.addf %119, %122 : vector<16x32xf32>
    %124 = vector.extract_strided_slice %108 {offsets = [0, 0, 0], sizes = [1, 32, 32], strides = [1, 1, 1]} : vector<3x32x32xbf16> to vector<1x32x32xbf16>
    %125 = vector.shape_cast %124 : vector<1x32x32xbf16> to vector<32x32xbf16>
    %cst_80 = arith.constant dense<0.000000e+00> : vector<16x32xf32>
    %126 = tpu.matmul %102, %125, %cst_80 {dimension_numbers = #tpu.dot_dimension_numbers<[1], [0], [0], [1], [0, 0, 1, 1], [], []>} : vector<16x32xbf16>, vector<32x32xbf16>, vector<16x32xf32> -> vector<16x32xf32>
    %127 = vector.extract_strided_slice %108 {offsets = [1, 0, 0], sizes = [1, 32, 32], strides = [1, 1, 1]} : vector<3x32x32xbf16> to vector<1x32x32xbf16>
    %128 = vector.shape_cast %127 : vector<1x32x32xbf16> to vector<32x32xbf16>
    %cst_81 = arith.constant dense<0.000000e+00> : vector<16x32xf32>
    %129 = tpu.matmul %104, %128, %cst_81 {dimension_numbers = #tpu.dot_dimension_numbers<[1], [0], [0], [1], [0, 0, 1, 1], [], []>} : vector<16x32xbf16>, vector<32x32xbf16>, vector<16x32xf32> -> vector<16x32xf32>
    %130 = arith.addf %126, %129 : vector<16x32xf32>
    %131 = vector.extract_strided_slice %108 {offsets = [2, 0, 0], sizes = [1, 32, 32], strides = [1, 1, 1]} : vector<3x32x32xbf16> to vector<1x32x32xbf16>
    %132 = vector.shape_cast %131 : vector<1x32x32xbf16> to vector<32x32xbf16>
    %cst_82 = arith.constant dense<0.000000e+00> : vector<16x32xf32>
    %133 = tpu.matmul %97, %132, %cst_82 {dimension_numbers = #tpu.dot_dimension_numbers<[1], [0], [0], [1], [0, 0, 1, 1], [], []>} : vector<16x32xbf16>, vector<32x32xbf16>, vector<16x32xf32> -> vector<16x32xf32>
    %134 = arith.addf %130, %133 : vector<16x32xf32>
    %c1_83 = arith.constant 1 : index
    %c0_84 = arith.constant 0 : index
    %c0_85 = arith.constant 0 : index
    %135 = vector.load %arg11[%c1_83, %c0_84, %c0_85] : memref<5x1x32xf32, #tpu.memory_space<vmem>>, vector<1x1x32xf32>
    %136 = vector.shape_cast %135 : vector<1x1x32xf32> to vector<1x32xf32>
    %137 = vector.broadcast %136 : vector<1x32xf32> to vector<16x32xf32>
    %138 = arith.addf %134, %137 : vector<16x32xf32>
    %139 = arith.negf %138 : vector<16x32xf32>
    %140 = math.exp %139 : vector<16x32xf32>
    %cst_86 = arith.constant 1.000000e+00 : f32
    %141 = vector.broadcast %cst_86 : f32 to vector<16x32xf32>
    %142 = arith.addf %141, %140 : vector<16x32xf32>
    %143 = arith.divf %141, %142 : vector<16x32xf32>
    %144 = arith.mulf %123, %143 : vector<16x32xf32>
    %145 = arith.truncf %144 : vector<16x32xf32> to vector<16x32xbf16>
    %c0_87 = arith.constant 0 : index
    %c0_88 = arith.constant 0 : index
    %146 = vector.load %arg12[%c0_87, %c0_88] : memref<32x8xbf16, #tpu.memory_space<vmem>>, vector<32x8xbf16>
    %cst_89 = arith.constant dense<0.000000e+00> : vector<16x8xf32>
    %147 = tpu.matmul %145, %146, %cst_89 {dimension_numbers = #tpu.dot_dimension_numbers<[1], [0], [0], [1], [0, 0, 1, 1], [], []>} : vector<16x32xbf16>, vector<32x8xbf16>, vector<16x8xf32> -> vector<16x8xf32>
    %148 = arith.addf %147, %16 : vector<16x8xf32>
    %149 = vector.shape_cast %148 : vector<16x8xf32> to vector<2x8x8xf32>
    %150 = arith.truncf %149 : vector<2x8x8xf32> to vector<2x8x8xbf16>
    "tpu.trace_start"() <{level = 10 : i32, message = "bqd,bde->bqe"}> : () -> ()
    %cst_90 = arith.constant dense<0.000000e+00> : vector<2x8x8xf32>
    %151 = tpu.matmul %150, %17, %cst_90 {dimension_numbers = #tpu.dot_dimension_numbers<[2], [1], [1], [2], [0, 0, 0, 1, 1, 2], [0], [0]>} : vector<2x8x8xbf16>, vector<2x8x8xbf16>, vector<2x8x8xf32> -> vector<2x8x8xf32>
    "tpu.trace_stop"() : () -> ()
    %cst_91 = arith.constant dense<0xFF800000> : vector<2x8xf32>
    %152 = vector.multi_reduction <maximumf>, %151, %cst_91 [2] : vector<2x8x8xf32> to vector<2x8xf32>
    %153 = vector.shape_cast %152 : vector<2x8xf32> to vector<2x8x1xf32>
    %154 = vector.broadcast %153 : vector<2x8x1xf32> to vector<2x8x8xf32>
    %155 = arith.subf %151, %154 : vector<2x8x8xf32>
    %156 = math.exp %155 : vector<2x8x8xf32>
    %cst_92 = arith.constant dense<0.000000e+00> : vector<2x8xf32>
    %157 = vector.multi_reduction <add>, %156, %cst_92 [2] : vector<2x8x8xf32> to vector<2x8xf32>
    %158 = vector.shape_cast %157 : vector<2x8xf32> to vector<2x8x1xf32>
    %159 = tpu.reciprocal %158 {approx = true} : vector<2x8x1xf32> -> vector<2x8x1xf32>
    %160 = vector.broadcast %159 : vector<2x8x1xf32> to vector<2x8x8xf32>
    %161 = arith.mulf %156, %160 : vector<2x8x8xf32>
    %162 = arith.truncf %161 : vector<2x8x8xf32> to vector<2x8x8xbf16>
    "tpu.trace_start"() <{level = 10 : i32, message = "bqe,bed->bqd"}> : () -> ()
    %cst_93 = arith.constant dense<0.000000e+00> : vector<2x8x8xf32>
    %163 = tpu.matmul %162, %18, %cst_93 {dimension_numbers = #tpu.dot_dimension_numbers<[2], [1], [1], [2], [0, 0, 0, 1, 1, 2], [0], [0]>} : vector<2x8x8xbf16>, vector<2x8x8xbf16>, vector<2x8x8xf32> -> vector<2x8x8xf32>
    "tpu.trace_stop"() : () -> ()
    %164 = vector.shape_cast %163 : vector<2x8x8xf32> to vector<16x8xf32>
    %165 = arith.truncf %164 : vector<16x8xf32> to vector<16x8xbf16>
    %c0_94 = arith.constant 0 : index
    %c0_95 = arith.constant 0 : index
    %166 = vector.load %arg14[%c0_94, %c0_95] : memref<8x32xbf16, #tpu.memory_space<vmem>>, vector<8x32xbf16>
    %cst_96 = arith.constant dense<0.000000e+00> : vector<16x32xf32>
    %167 = tpu.matmul %165, %166, %cst_96 {dimension_numbers = #tpu.dot_dimension_numbers<[1], [0], [0], [1], [0, 0, 1, 1], [], []>} : vector<16x8xbf16>, vector<8x32xbf16>, vector<16x32xf32> -> vector<16x32xf32>
    %c0_97 = arith.constant 0 : index
    %c0_98 = arith.constant 0 : index
    %168 = vector.load %arg15[%c0_97, %c0_98] : memref<1x32xf32, #tpu.memory_space<vmem>>, vector<1x32xf32>
    %169 = vector.broadcast %168 : vector<1x32xf32> to vector<16x32xf32>
    %170 = arith.addf %167, %169 : vector<16x32xf32>
    %171 = arith.addf %144, %170 : vector<16x32xf32>
    %172 = arith.addf %171, %96 : vector<16x32xf32>
    %173 = arith.truncf %172 : vector<16x32xf32> to vector<16x32xbf16>
    %174 = vector.shape_cast %173 : vector<16x32xbf16> to vector<2x8x32xbf16>
    %c0_99 = arith.constant 0 : index
    %c8_100 = arith.constant 8 : index
    %c0_101 = arith.constant 0 : index
    %175 = vector.load %arg21[%c0_99, %c8_100, %c0_101] : memref<2x16x32xbf16, #tpu.memory_space<vmem>>, vector<2x8x32xbf16>
    tpu.vector_store %arg21[%c0_99, %c8_100, %c0_101], %174 {strides = array<i32>} : memref<2x16x32xbf16, #tpu.memory_space<vmem>>, vector<2x8x32xbf16>,
    %c0_102 = arith.constant 0 : index
    %c0_103 = arith.constant 0 : index
    %c0_104 = arith.constant 0 : index
    %176 = vector.load %arg21[%c0_102, %c0_103, %c0_104] : memref<2x16x32xbf16, #tpu.memory_space<vmem>>, vector<2x16x32xbf16>
    %177 = vector.extract_strided_slice %176 {offsets = [0, 6, 0], sizes = [2, 8, 32], strides = [1, 1, 1]} : vector<2x16x32xbf16> to vector<2x8x32xbf16>
    %178 = vector.shape_cast %177 : vector<2x8x32xbf16> to vector<16x32xbf16>
    %179 = vector.extract_strided_slice %176 {offsets = [0, 7, 0], sizes = [2, 8, 32], strides = [1, 1, 1]} : vector<2x16x32xbf16> to vector<2x8x32xbf16>
    %180 = vector.shape_cast %179 : vector<2x8x32xbf16> to vector<16x32xbf16>
    %c2 = arith.constant 2 : index
    %c0_105 = arith.constant 0 : index
    %c0_106 = arith.constant 0 : index
    %c0_107 = arith.constant 0 : index
    %181 = vector.load %arg8[%c2, %c0_105, %c0_106, %c0_107] : memref<5x3x32x32xbf16, #tpu.memory_space<vmem>>, vector<1x3x32x32xbf16>
    %182 = vector.shape_cast %181 : vector<1x3x32x32xbf16> to vector<3x32x32xbf16>
    %c2_108 = arith.constant 2 : index
    %c0_109 = arith.constant 0 : index
    %c0_110 = arith.constant 0 : index
    %c0_111 = arith.constant 0 : index
    %183 = vector.load %arg10[%c2_108, %c0_109, %c0_110, %c0_111] : memref<5x3x32x32xbf16, #tpu.memory_space<vmem>>, vector<1x3x32x32xbf16>
    %184 = vector.shape_cast %183 : vector<1x3x32x32xbf16> to vector<3x32x32xbf16>
    %185 = vector.extract_strided_slice %182 {offsets = [0, 0, 0], sizes = [1, 32, 32], strides = [1, 1, 1]} : vector<3x32x32xbf16> to vector<1x32x32xbf16>
    %186 = vector.shape_cast %185 : vector<1x32x32xbf16> to vector<32x32xbf16>
    %cst_112 = arith.constant dense<0.000000e+00> : vector<16x32xf32>
    %187 = tpu.matmul %178, %186, %cst_112 {dimension_numbers = #tpu.dot_dimension_numbers<[1], [0], [0], [1], [0, 0, 1, 1], [], []>} : vector<16x32xbf16>, vector<32x32xbf16>, vector<16x32xf32> -> vector<16x32xf32>
    %188 = vector.extract_strided_slice %182 {offsets = [1, 0, 0], sizes = [1, 32, 32], strides = [1, 1, 1]} : vector<3x32x32xbf16> to vector<1x32x32xbf16>
    %189 = vector.shape_cast %188 : vector<1x32x32xbf16> to vector<32x32xbf16>
    %cst_113 = arith.constant dense<0.000000e+00> : vector<16x32xf32>
    %190 = tpu.matmul %180, %189, %cst_113 {dimension_numbers = #tpu.dot_dimension_numbers<[1], [0], [0], [1], [0, 0, 1, 1], [], []>} : vector<16x32xbf16>, vector<32x32xbf16>, vector<16x32xf32> -> vector<16x32xf32>
    %191 = arith.addf %187, %190 : vector<16x32xf32>
    %192 = vector.extract_strided_slice %182 {offsets = [2, 0, 0], sizes = [1, 32, 32], strides = [1, 1, 1]} : vector<3x32x32xbf16> to vector<1x32x32xbf16>
    %193 = vector.shape_cast %192 : vector<1x32x32xbf16> to vector<32x32xbf16>
    %cst_114 = arith.constant dense<0.000000e+00> : vector<16x32xf32>
    %194 = tpu.matmul %173, %193, %cst_114 {dimension_numbers = #tpu.dot_dimension_numbers<[1], [0], [0], [1], [0, 0, 1, 1], [], []>} : vector<16x32xbf16>, vector<32x32xbf16>, vector<16x32xf32> -> vector<16x32xf32>
    %195 = arith.addf %191, %194 : vector<16x32xf32>
    %c2_115 = arith.constant 2 : index
    %c0_116 = arith.constant 0 : index
    %c0_117 = arith.constant 0 : index
    %196 = vector.load %arg9[%c2_115, %c0_116, %c0_117] : memref<5x1x32xf32, #tpu.memory_space<vmem>>, vector<1x1x32xf32>
    %197 = vector.shape_cast %196 : vector<1x1x32xf32> to vector<1x32xf32>
    %198 = vector.broadcast %197 : vector<1x32xf32> to vector<16x32xf32>
    %199 = arith.addf %195, %198 : vector<16x32xf32>
    %200 = vector.extract_strided_slice %184 {offsets = [0, 0, 0], sizes = [1, 32, 32], strides = [1, 1, 1]} : vector<3x32x32xbf16> to vector<1x32x32xbf16>
    %201 = vector.shape_cast %200 : vector<1x32x32xbf16> to vector<32x32xbf16>
    %cst_118 = arith.constant dense<0.000000e+00> : vector<16x32xf32>
    %202 = tpu.matmul %178, %201, %cst_118 {dimension_numbers = #tpu.dot_dimension_numbers<[1], [0], [0], [1], [0, 0, 1, 1], [], []>} : vector<16x32xbf16>, vector<32x32xbf16>, vector<16x32xf32> -> vector<16x32xf32>
    %203 = vector.extract_strided_slice %184 {offsets = [1, 0, 0], sizes = [1, 32, 32], strides = [1, 1, 1]} : vector<3x32x32xbf16> to vector<1x32x32xbf16>
    %204 = vector.shape_cast %203 : vector<1x32x32xbf16> to vector<32x32xbf16>
    %cst_119 = arith.constant dense<0.000000e+00> : vector<16x32xf32>
    %205 = tpu.matmul %180, %204, %cst_119 {dimension_numbers = #tpu.dot_dimension_numbers<[1], [0], [0], [1], [0, 0, 1, 1], [], []>} : vector<16x32xbf16>, vector<32x32xbf16>, vector<16x32xf32> -> vector<16x32xf32>
    %206 = arith.addf %202, %205 : vector<16x32xf32>
    %207 = vector.extract_strided_slice %184 {offsets = [2, 0, 0], sizes = [1, 32, 32], strides = [1, 1, 1]} : vector<3x32x32xbf16> to vector<1x32x32xbf16>
    %208 = vector.shape_cast %207 : vector<1x32x32xbf16> to vector<32x32xbf16>
    %cst_120 = arith.constant dense<0.000000e+00> : vector<16x32xf32>
    %209 = tpu.matmul %173, %208, %cst_120 {dimension_numbers = #tpu.dot_dimension_numbers<[1], [0], [0], [1], [0, 0, 1, 1], [], []>} : vector<16x32xbf16>, vector<32x32xbf16>, vector<16x32xf32> -> vector<16x32xf32>
    %210 = arith.addf %206, %209 : vector<16x32xf32>
    %c2_121 = arith.constant 2 : index
    %c0_122 = arith.constant 0 : index
    %c0_123 = arith.constant 0 : index
    %211 = vector.load %arg11[%c2_121, %c0_122, %c0_123] : memref<5x1x32xf32, #tpu.memory_space<vmem>>, vector<1x1x32xf32>
    %212 = vector.shape_cast %211 : vector<1x1x32xf32> to vector<1x32xf32>
    %213 = vector.broadcast %212 : vector<1x32xf32> to vector<16x32xf32>
    %214 = arith.addf %210, %213 : vector<16x32xf32>
    %215 = arith.negf %214 : vector<16x32xf32>
    %216 = math.exp %215 : vector<16x32xf32>
    %cst_124 = arith.constant 1.000000e+00 : f32
    %217 = vector.broadcast %cst_124 : f32 to vector<16x32xf32>
    %218 = arith.addf %217, %216 : vector<16x32xf32>
    %219 = arith.divf %217, %218 : vector<16x32xf32>
    %220 = arith.mulf %199, %219 : vector<16x32xf32>
    %221 = arith.truncf %220 : vector<16x32xf32> to vector<16x32xbf16>
    %c0_125 = arith.constant 0 : index
    %c0_126 = arith.constant 0 : index
    %222 = vector.load %arg12[%c0_125, %c0_126] : memref<32x8xbf16, #tpu.memory_space<vmem>>, vector<32x8xbf16>
    %cst_127 = arith.constant dense<0.000000e+00> : vector<16x8xf32>
    %223 = tpu.matmul %221, %222, %cst_127 {dimension_numbers = #tpu.dot_dimension_numbers<[1], [0], [0], [1], [0, 0, 1, 1], [], []>} : vector<16x32xbf16>, vector<32x8xbf16>, vector<16x8xf32> -> vector<16x8xf32>
    %224 = arith.addf %223, %16 : vector<16x8xf32>
    %225 = vector.shape_cast %224 : vector<16x8xf32> to vector<2x8x8xf32>
    %226 = arith.truncf %225 : vector<2x8x8xf32> to vector<2x8x8xbf16>
    "tpu.trace_start"() <{level = 10 : i32, message = "bqd,bde->bqe"}> : () -> ()
    %cst_128 = arith.constant dense<0.000000e+00> : vector<2x8x8xf32>
    %227 = tpu.matmul %226, %17, %cst_128 {dimension_numbers = #tpu.dot_dimension_numbers<[2], [1], [1], [2], [0, 0, 0, 1, 1, 2], [0], [0]>} : vector<2x8x8xbf16>, vector<2x8x8xbf16>, vector<2x8x8xf32> -> vector<2x8x8xf32>
    "tpu.trace_stop"() : () -> ()
    %cst_129 = arith.constant dense<0xFF800000> : vector<2x8xf32>
    %228 = vector.multi_reduction <maximumf>, %227, %cst_129 [2] : vector<2x8x8xf32> to vector<2x8xf32>
    %229 = vector.shape_cast %228 : vector<2x8xf32> to vector<2x8x1xf32>
    %230 = vector.broadcast %229 : vector<2x8x1xf32> to vector<2x8x8xf32>
    %231 = arith.subf %227, %230 : vector<2x8x8xf32>
    %232 = math.exp %231 : vector<2x8x8xf32>
    %cst_130 = arith.constant dense<0.000000e+00> : vector<2x8xf32>
    %233 = vector.multi_reduction <add>, %232, %cst_130 [2] : vector<2x8x8xf32> to vector<2x8xf32>
    %234 = vector.shape_cast %233 : vector<2x8xf32> to vector<2x8x1xf32>
    %235 = tpu.reciprocal %234 {approx = true} : vector<2x8x1xf32> -> vector<2x8x1xf32>
    %236 = vector.broadcast %235 : vector<2x8x1xf32> to vector<2x8x8xf32>
    %237 = arith.mulf %232, %236 : vector<2x8x8xf32>
    %238 = arith.truncf %237 : vector<2x8x8xf32> to vector<2x8x8xbf16>
    "tpu.trace_start"() <{level = 10 : i32, message = "bqe,bed->bqd"}> : () -> ()
    %cst_131 = arith.constant dense<0.000000e+00> : vector<2x8x8xf32>
    %239 = tpu.matmul %238, %18, %cst_131 {dimension_numbers = #tpu.dot_dimension_numbers<[2], [1], [1], [2], [0, 0, 0, 1, 1, 2], [0], [0]>} : vector<2x8x8xbf16>, vector<2x8x8xbf16>, vector<2x8x8xf32> -> vector<2x8x8xf32>
    "tpu.trace_stop"() : () -> ()
    %240 = vector.shape_cast %239 : vector<2x8x8xf32> to vector<16x8xf32>
    %241 = arith.truncf %240 : vector<16x8xf32> to vector<16x8xbf16>
    %c0_132 = arith.constant 0 : index
    %c0_133 = arith.constant 0 : index
    %242 = vector.load %arg14[%c0_132, %c0_133] : memref<8x32xbf16, #tpu.memory_space<vmem>>, vector<8x32xbf16>
    %cst_134 = arith.constant dense<0.000000e+00> : vector<16x32xf32>
    %243 = tpu.matmul %241, %242, %cst_134 {dimension_numbers = #tpu.dot_dimension_numbers<[1], [0], [0], [1], [0, 0, 1, 1], [], []>} : vector<16x8xbf16>, vector<8x32xbf16>, vector<16x32xf32> -> vector<16x32xf32>
    %c0_135 = arith.constant 0 : index
    %c0_136 = arith.constant 0 : index
    %244 = vector.load %arg15[%c0_135, %c0_136] : memref<1x32xf32, #tpu.memory_space<vmem>>, vector<1x32xf32>
    %245 = vector.broadcast %244 : vector<1x32xf32> to vector<16x32xf32>
    %246 = arith.addf %243, %245 : vector<16x32xf32>
    %247 = arith.addf %220, %246 : vector<16x32xf32>
    %248 = arith.addf %247, %172 : vector<16x32xf32>
    %249 = arith.truncf %248 : vector<16x32xf32> to vector<16x32xbf16>
    %250 = vector.shape_cast %249 : vector<16x32xbf16> to vector<2x8x32xbf16>
    %c0_137 = arith.constant 0 : index
    %c8_138 = arith.constant 8 : index
    %c0_139 = arith.constant 0 : index
    %251 = vector.load %arg21[%c0_137, %c8_138, %c0_139] : memref<2x16x32xbf16, #tpu.memory_space<vmem>>, vector<2x8x32xbf16>
    tpu.vector_store %arg21[%c0_137, %c8_138, %c0_139], %250 {strides = array<i32>} : memref<2x16x32xbf16, #tpu.memory_space<vmem>>, vector<2x8x32xbf16>,
    %c0_140 = arith.constant 0 : index
    %c0_141 = arith.constant 0 : index
    %c0_142 = arith.constant 0 : index
    %252 = vector.load %arg21[%c0_140, %c0_141, %c0_142] : memref<2x16x32xbf16, #tpu.memory_space<vmem>>, vector<2x16x32xbf16>
    %253 = vector.extract_strided_slice %252 {offsets = [0, 6, 0], sizes = [2, 8, 32], strides = [1, 1, 1]} : vector<2x16x32xbf16> to vector<2x8x32xbf16>
    %254 = vector.shape_cast %253 : vector<2x8x32xbf16> to vector<16x32xbf16>
    %255 = vector.extract_strided_slice %252 {offsets = [0, 7, 0], sizes = [2, 8, 32], strides = [1, 1, 1]} : vector<2x16x32xbf16> to vector<2x8x32xbf16>
    %256 = vector.shape_cast %255 : vector<2x8x32xbf16> to vector<16x32xbf16>
    %c3 = arith.constant 3 : index
    %c0_143 = arith.constant 0 : index
    %c0_144 = arith.constant 0 : index
    %c0_145 = arith.constant 0 : index
    %257 = vector.load %arg8[%c3, %c0_143, %c0_144, %c0_145] : memref<5x3x32x32xbf16, #tpu.memory_space<vmem>>, vector<1x3x32x32xbf16>
    %258 = vector.shape_cast %257 : vector<1x3x32x32xbf16> to vector<3x32x32xbf16>
    %c3_146 = arith.constant 3 : index
    %c0_147 = arith.constant 0 : index
    %c0_148 = arith.constant 0 : index
    %c0_149 = arith.constant 0 : index
    %259 = vector.load %arg10[%c3_146, %c0_147, %c0_148, %c0_149] : memref<5x3x32x32xbf16, #tpu.memory_space<vmem>>, vector<1x3x32x32xbf16>
    %260 = vector.shape_cast %259 : vector<1x3x32x32xbf16> to vector<3x32x32xbf16>
    %261 = vector.extract_strided_slice %258 {offsets = [0, 0, 0], sizes = [1, 32, 32], strides = [1, 1, 1]} : vector<3x32x32xbf16> to vector<1x32x32xbf16>
    %262 = vector.shape_cast %261 : vector<1x32x32xbf16> to vector<32x32xbf16>
    %cst_150 = arith.constant dense<0.000000e+00> : vector<16x32xf32>
    %263 = tpu.matmul %254, %262, %cst_150 {dimension_numbers = #tpu.dot_dimension_numbers<[1], [0], [0], [1], [0, 0, 1, 1], [], []>} : vector<16x32xbf16>, vector<32x32xbf16>, vector<16x32xf32> -> vector<16x32xf32>
    %264 = vector.extract_strided_slice %258 {offsets = [1, 0, 0], sizes = [1, 32, 32], strides = [1, 1, 1]} : vector<3x32x32xbf16> to vector<1x32x32xbf16>
    %265 = vector.shape_cast %264 : vector<1x32x32xbf16> to vector<32x32xbf16>
    %cst_151 = arith.constant dense<0.000000e+00> : vector<16x32xf32>
    %266 = tpu.matmul %256, %265, %cst_151 {dimension_numbers = #tpu.dot_dimension_numbers<[1], [0], [0], [1], [0, 0, 1, 1], [], []>} : vector<16x32xbf16>, vector<32x32xbf16>, vector<16x32xf32> -> vector<16x32xf32>
    %267 = arith.addf %263, %266 : vector<16x32xf32>
    %268 = vector.extract_strided_slice %258 {offsets = [2, 0, 0], sizes = [1, 32, 32], strides = [1, 1, 1]} : vector<3x32x32xbf16> to vector<1x32x32xbf16>
    %269 = vector.shape_cast %268 : vector<1x32x32xbf16> to vector<32x32xbf16>
    %cst_152 = arith.constant dense<0.000000e+00> : vector<16x32xf32>
    %270 = tpu.matmul %249, %269, %cst_152 {dimension_numbers = #tpu.dot_dimension_numbers<[1], [0], [0], [1], [0, 0, 1, 1], [], []>} : vector<16x32xbf16>, vector<32x32xbf16>, vector<16x32xf32> -> vector<16x32xf32>
    %271 = arith.addf %267, %270 : vector<16x32xf32>
    %c3_153 = arith.constant 3 : index
    %c0_154 = arith.constant 0 : index
    %c0_155 = arith.constant 0 : index
    %272 = vector.load %arg9[%c3_153, %c0_154, %c0_155] : memref<5x1x32xf32, #tpu.memory_space<vmem>>, vector<1x1x32xf32>
    %273 = vector.shape_cast %272 : vector<1x1x32xf32> to vector<1x32xf32>
    %274 = vector.broadcast %273 : vector<1x32xf32> to vector<16x32xf32>
    %275 = arith.addf %271, %274 : vector<16x32xf32>
    %276 = vector.extract_strided_slice %260 {offsets = [0, 0, 0], sizes = [1, 32, 32], strides = [1, 1, 1]} : vector<3x32x32xbf16> to vector<1x32x32xbf16>
    %277 = vector.shape_cast %276 : vector<1x32x32xbf16> to vector<32x32xbf16>
    %cst_156 = arith.constant dense<0.000000e+00> : vector<16x32xf32>
    %278 = tpu.matmul %254, %277, %cst_156 {dimension_numbers = #tpu.dot_dimension_numbers<[1], [0], [0], [1], [0, 0, 1, 1], [], []>} : vector<16x32xbf16>, vector<32x32xbf16>, vector<16x32xf32> -> vector<16x32xf32>
    %279 = vector.extract_strided_slice %260 {offsets = [1, 0, 0], sizes = [1, 32, 32], strides = [1, 1, 1]} : vector<3x32x32xbf16> to vector<1x32x32xbf16>
    %280 = vector.shape_cast %279 : vector<1x32x32xbf16> to vector<32x32xbf16>
    %cst_157 = arith.constant dense<0.000000e+00> : vector<16x32xf32>
    %281 = tpu.matmul %256, %280, %cst_157 {dimension_numbers = #tpu.dot_dimension_numbers<[1], [0], [0], [1], [0, 0, 1, 1], [], []>} : vector<16x32xbf16>, vector<32x32xbf16>, vector<16x32xf32> -> vector<16x32xf32>
    %282 = arith.addf %278, %281 : vector<16x32xf32>
    %283 = vector.extract_strided_slice %260 {offsets = [2, 0, 0], sizes = [1, 32, 32], strides = [1, 1, 1]} : vector<3x32x32xbf16> to vector<1x32x32xbf16>
    %284 = vector.shape_cast %283 : vector<1x32x32xbf16> to vector<32x32xbf16>
    %cst_158 = arith.constant dense<0.000000e+00> : vector<16x32xf32>
    %285 = tpu.matmul %249, %284, %cst_158 {dimension_numbers = #tpu.dot_dimension_numbers<[1], [0], [0], [1], [0, 0, 1, 1], [], []>} : vector<16x32xbf16>, vector<32x32xbf16>, vector<16x32xf32> -> vector<16x32xf32>
    %286 = arith.addf %282, %285 : vector<16x32xf32>
    %c3_159 = arith.constant 3 : index
    %c0_160 = arith.constant 0 : index
    %c0_161 = arith.constant 0 : index
    %287 = vector.load %arg11[%c3_159, %c0_160, %c0_161] : memref<5x1x32xf32, #tpu.memory_space<vmem>>, vector<1x1x32xf32>
    %288 = vector.shape_cast %287 : vector<1x1x32xf32> to vector<1x32xf32>
    %289 = vector.broadcast %288 : vector<1x32xf32> to vector<16x32xf32>
    %290 = arith.addf %286, %289 : vector<16x32xf32>
    %291 = arith.negf %290 : vector<16x32xf32>
    %292 = math.exp %291 : vector<16x32xf32>
    %cst_162 = arith.constant 1.000000e+00 : f32
    %293 = vector.broadcast %cst_162 : f32 to vector<16x32xf32>
    %294 = arith.addf %293, %292 : vector<16x32xf32>
    %295 = arith.divf %293, %294 : vector<16x32xf32>
    %296 = arith.mulf %275, %295 : vector<16x32xf32>
    %297 = arith.truncf %296 : vector<16x32xf32> to vector<16x32xbf16>
    %c0_163 = arith.constant 0 : index
    %c0_164 = arith.constant 0 : index
    %298 = vector.load %arg12[%c0_163, %c0_164] : memref<32x8xbf16, #tpu.memory_space<vmem>>, vector<32x8xbf16>
    %cst_165 = arith.constant dense<0.000000e+00> : vector<16x8xf32>
    %299 = tpu.matmul %297, %298, %cst_165 {dimension_numbers = #tpu.dot_dimension_numbers<[1], [0], [0], [1], [0, 0, 1, 1], [], []>} : vector<16x32xbf16>, vector<32x8xbf16>, vector<16x8xf32> -> vector<16x8xf32>
    %300 = arith.addf %299, %16 : vector<16x8xf32>
    %301 = vector.shape_cast %300 : vector<16x8xf32> to vector<2x8x8xf32>
    %302 = arith.truncf %301 : vector<2x8x8xf32> to vector<2x8x8xbf16>
    "tpu.trace_start"() <{level = 10 : i32, message = "bqd,bde->bqe"}> : () -> ()
    %cst_166 = arith.constant dense<0.000000e+00> : vector<2x8x8xf32>
    %303 = tpu.matmul %302, %17, %cst_166 {dimension_numbers = #tpu.dot_dimension_numbers<[2], [1], [1], [2], [0, 0, 0, 1, 1, 2], [0], [0]>} : vector<2x8x8xbf16>, vector<2x8x8xbf16>, vector<2x8x8xf32> -> vector<2x8x8xf32>
    "tpu.trace_stop"() : () -> ()
    %cst_167 = arith.constant dense<0xFF800000> : vector<2x8xf32>
    %304 = vector.multi_reduction <maximumf>, %303, %cst_167 [2] : vector<2x8x8xf32> to vector<2x8xf32>
    %305 = vector.shape_cast %304 : vector<2x8xf32> to vector<2x8x1xf32>
    %306 = vector.broadcast %305 : vector<2x8x1xf32> to vector<2x8x8xf32>
    %307 = arith.subf %303, %306 : vector<2x8x8xf32>
    %308 = math.exp %307 : vector<2x8x8xf32>
    %cst_168 = arith.constant dense<0.000000e+00> : vector<2x8xf32>
    %309 = vector.multi_reduction <add>, %308, %cst_168 [2] : vector<2x8x8xf32> to vector<2x8xf32>
    %310 = vector.shape_cast %309 : vector<2x8xf32> to vector<2x8x1xf32>
    %311 = tpu.reciprocal %310 {approx = true} : vector<2x8x1xf32> -> vector<2x8x1xf32>
    %312 = vector.broadcast %311 : vector<2x8x1xf32> to vector<2x8x8xf32>
    %313 = arith.mulf %308, %312 : vector<2x8x8xf32>
    %314 = arith.truncf %313 : vector<2x8x8xf32> to vector<2x8x8xbf16>
    "tpu.trace_start"() <{level = 10 : i32, message = "bqe,bed->bqd"}> : () -> ()
    %cst_169 = arith.constant dense<0.000000e+00> : vector<2x8x8xf32>
    %315 = tpu.matmul %314, %18, %cst_169 {dimension_numbers = #tpu.dot_dimension_numbers<[2], [1], [1], [2], [0, 0, 0, 1, 1, 2], [0], [0]>} : vector<2x8x8xbf16>, vector<2x8x8xbf16>, vector<2x8x8xf32> -> vector<2x8x8xf32>
    "tpu.trace_stop"() : () -> ()
    %316 = vector.shape_cast %315 : vector<2x8x8xf32> to vector<16x8xf32>
    %317 = arith.truncf %316 : vector<16x8xf32> to vector<16x8xbf16>
    %c0_170 = arith.constant 0 : index
    %c0_171 = arith.constant 0 : index
    %318 = vector.load %arg14[%c0_170, %c0_171] : memref<8x32xbf16, #tpu.memory_space<vmem>>, vector<8x32xbf16>
    %cst_172 = arith.constant dense<0.000000e+00> : vector<16x32xf32>
    %319 = tpu.matmul %317, %318, %cst_172 {dimension_numbers = #tpu.dot_dimension_numbers<[1], [0], [0], [1], [0, 0, 1, 1], [], []>} : vector<16x8xbf16>, vector<8x32xbf16>, vector<16x32xf32> -> vector<16x32xf32>
    %c0_173 = arith.constant 0 : index
    %c0_174 = arith.constant 0 : index
    %320 = vector.load %arg15[%c0_173, %c0_174] : memref<1x32xf32, #tpu.memory_space<vmem>>, vector<1x32xf32>
    %321 = vector.broadcast %320 : vector<1x32xf32> to vector<16x32xf32>
    %322 = arith.addf %319, %321 : vector<16x32xf32>
    %323 = arith.addf %296, %322 : vector<16x32xf32>
    %324 = arith.addf %323, %248 : vector<16x32xf32>
    %325 = arith.truncf %324 : vector<16x32xf32> to vector<16x32xbf16>
    %326 = vector.shape_cast %325 : vector<16x32xbf16> to vector<2x8x32xbf16>
    %c0_175 = arith.constant 0 : index
    %c8_176 = arith.constant 8 : index
    %c0_177 = arith.constant 0 : index
    %327 = vector.load %arg21[%c0_175, %c8_176, %c0_177] : memref<2x16x32xbf16, #tpu.memory_space<vmem>>, vector<2x8x32xbf16>
    tpu.vector_store %arg21[%c0_175, %c8_176, %c0_177], %326 {strides = array<i32>} : memref<2x16x32xbf16, #tpu.memory_space<vmem>>, vector<2x8x32xbf16>,
    %c0_178 = arith.constant 0 : index
    %c0_179 = arith.constant 0 : index
    %c0_180 = arith.constant 0 : index
    %328 = vector.load %arg21[%c0_178, %c0_179, %c0_180] : memref<2x16x32xbf16, #tpu.memory_space<vmem>>, vector<2x16x32xbf16>
    %329 = vector.extract_strided_slice %328 {offsets = [0, 6, 0], sizes = [2, 8, 32], strides = [1, 1, 1]} : vector<2x16x32xbf16> to vector<2x8x32xbf16>
    %330 = vector.shape_cast %329 : vector<2x8x32xbf16> to vector<16x32xbf16>
    %331 = vector.extract_strided_slice %328 {offsets = [0, 7, 0], sizes = [2, 8, 32], strides = [1, 1, 1]} : vector<2x16x32xbf16> to vector<2x8x32xbf16>
    %332 = vector.shape_cast %331 : vector<2x8x32xbf16> to vector<16x32xbf16>
    %c4 = arith.constant 4 : index
    %c0_181 = arith.constant 0 : index
    %c0_182 = arith.constant 0 : index
    %c0_183 = arith.constant 0 : index
    %333 = vector.load %arg8[%c4, %c0_181, %c0_182, %c0_183] : memref<5x3x32x32xbf16, #tpu.memory_space<vmem>>, vector<1x3x32x32xbf16>
    %334 = vector.shape_cast %333 : vector<1x3x32x32xbf16> to vector<3x32x32xbf16>
    %c4_184 = arith.constant 4 : index
    %c0_185 = arith.constant 0 : index
    %c0_186 = arith.constant 0 : index
    %c0_187 = arith.constant 0 : index
    %335 = vector.load %arg10[%c4_184, %c0_185, %c0_186, %c0_187] : memref<5x3x32x32xbf16, #tpu.memory_space<vmem>>, vector<1x3x32x32xbf16>
    %336 = vector.shape_cast %335 : vector<1x3x32x32xbf16> to vector<3x32x32xbf16>
    %337 = vector.extract_strided_slice %334 {offsets = [0, 0, 0], sizes = [1, 32, 32], strides = [1, 1, 1]} : vector<3x32x32xbf16> to vector<1x32x32xbf16>
    %338 = vector.shape_cast %337 : vector<1x32x32xbf16> to vector<32x32xbf16>
    %cst_188 = arith.constant dense<0.000000e+00> : vector<16x32xf32>
    %339 = tpu.matmul %330, %338, %cst_188 {dimension_numbers = #tpu.dot_dimension_numbers<[1], [0], [0], [1], [0, 0, 1, 1], [], []>} : vector<16x32xbf16>, vector<32x32xbf16>, vector<16x32xf32> -> vector<16x32xf32>
    %340 = vector.extract_strided_slice %334 {offsets = [1, 0, 0], sizes = [1, 32, 32], strides = [1, 1, 1]} : vector<3x32x32xbf16> to vector<1x32x32xbf16>
    %341 = vector.shape_cast %340 : vector<1x32x32xbf16> to vector<32x32xbf16>
    %cst_189 = arith.constant dense<0.000000e+00> : vector<16x32xf32>
    %342 = tpu.matmul %332, %341, %cst_189 {dimension_numbers = #tpu.dot_dimension_numbers<[1], [0], [0], [1], [0, 0, 1, 1], [], []>} : vector<16x32xbf16>, vector<32x32xbf16>, vector<16x32xf32> -> vector<16x32xf32>
    %343 = arith.addf %339, %342 : vector<16x32xf32>
    %344 = vector.extract_strided_slice %334 {offsets = [2, 0, 0], sizes = [1, 32, 32], strides = [1, 1, 1]} : vector<3x32x32xbf16> to vector<1x32x32xbf16>
    %345 = vector.shape_cast %344 : vector<1x32x32xbf16> to vector<32x32xbf16>
    %cst_190 = arith.constant dense<0.000000e+00> : vector<16x32xf32>
    %346 = tpu.matmul %325, %345, %cst_190 {dimension_numbers = #tpu.dot_dimension_numbers<[1], [0], [0], [1], [0, 0, 1, 1], [], []>} : vector<16x32xbf16>, vector<32x32xbf16>, vector<16x32xf32> -> vector<16x32xf32>
    %347 = arith.addf %343, %346 : vector<16x32xf32>
    %c4_191 = arith.constant 4 : index
    %c0_192 = arith.constant 0 : index
    %c0_193 = arith.constant 0 : index
    %348 = vector.load %arg9[%c4_191, %c0_192, %c0_193] : memref<5x1x32xf32, #tpu.memory_space<vmem>>, vector<1x1x32xf32>
    %349 = vector.shape_cast %348 : vector<1x1x32xf32> to vector<1x32xf32>
    %350 = vector.broadcast %349 : vector<1x32xf32> to vector<16x32xf32>
    %351 = arith.addf %347, %350 : vector<16x32xf32>
    %352 = vector.extract_strided_slice %336 {offsets = [0, 0, 0], sizes = [1, 32, 32], strides = [1, 1, 1]} : vector<3x32x32xbf16> to vector<1x32x32xbf16>
    %353 = vector.shape_cast %352 : vector<1x32x32xbf16> to vector<32x32xbf16>
    %cst_194 = arith.constant dense<0.000000e+00> : vector<16x32xf32>
    %354 = tpu.matmul %330, %353, %cst_194 {dimension_numbers = #tpu.dot_dimension_numbers<[1], [0], [0], [1], [0, 0, 1, 1], [], []>} : vector<16x32xbf16>, vector<32x32xbf16>, vector<16x32xf32> -> vector<16x32xf32>
    %355 = vector.extract_strided_slice %336 {offsets = [1, 0, 0], sizes = [1, 32, 32], strides = [1, 1, 1]} : vector<3x32x32xbf16> to vector<1x32x32xbf16>
    %356 = vector.shape_cast %355 : vector<1x32x32xbf16> to vector<32x32xbf16>
    %cst_195 = arith.constant dense<0.000000e+00> : vector<16x32xf32>
    %357 = tpu.matmul %332, %356, %cst_195 {dimension_numbers = #tpu.dot_dimension_numbers<[1], [0], [0], [1], [0, 0, 1, 1], [], []>} : vector<16x32xbf16>, vector<32x32xbf16>, vector<16x32xf32> -> vector<16x32xf32>
    %358 = arith.addf %354, %357 : vector<16x32xf32>
    %359 = vector.extract_strided_slice %336 {offsets = [2, 0, 0], sizes = [1, 32, 32], strides = [1, 1, 1]} : vector<3x32x32xbf16> to vector<1x32x32xbf16>
    %360 = vector.shape_cast %359 : vector<1x32x32xbf16> to vector<32x32xbf16>
    %cst_196 = arith.constant dense<0.000000e+00> : vector<16x32xf32>
    %361 = tpu.matmul %325, %360, %cst_196 {dimension_numbers = #tpu.dot_dimension_numbers<[1], [0], [0], [1], [0, 0, 1, 1], [], []>} : vector<16x32xbf16>, vector<32x32xbf16>, vector<16x32xf32> -> vector<16x32xf32>
    %362 = arith.addf %358, %361 : vector<16x32xf32>
    %c4_197 = arith.constant 4 : index
    %c0_198 = arith.constant 0 : index
    %c0_199 = arith.constant 0 : index
    %363 = vector.load %arg11[%c4_197, %c0_198, %c0_199] : memref<5x1x32xf32, #tpu.memory_space<vmem>>, vector<1x1x32xf32>
    %364 = vector.shape_cast %363 : vector<1x1x32xf32> to vector<1x32xf32>
    %365 = vector.broadcast %364 : vector<1x32xf32> to vector<16x32xf32>
    %366 = arith.addf %362, %365 : vector<16x32xf32>
    %367 = arith.negf %366 : vector<16x32xf32>
    %368 = math.exp %367 : vector<16x32xf32>
    %cst_200 = arith.constant 1.000000e+00 : f32
    %369 = vector.broadcast %cst_200 : f32 to vector<16x32xf32>
    %370 = arith.addf %369, %368 : vector<16x32xf32>
    %371 = arith.divf %369, %370 : vector<16x32xf32>
    %372 = arith.mulf %351, %371 : vector<16x32xf32>
    %373 = arith.truncf %372 : vector<16x32xf32> to vector<16x32xbf16>
    %c0_201 = arith.constant 0 : index
    %c0_202 = arith.constant 0 : index
    %374 = vector.load %arg12[%c0_201, %c0_202] : memref<32x8xbf16, #tpu.memory_space<vmem>>, vector<32x8xbf16>
    %cst_203 = arith.constant dense<0.000000e+00> : vector<16x8xf32>
    %375 = tpu.matmul %373, %374, %cst_203 {dimension_numbers = #tpu.dot_dimension_numbers<[1], [0], [0], [1], [0, 0, 1, 1], [], []>} : vector<16x32xbf16>, vector<32x8xbf16>, vector<16x8xf32> -> vector<16x8xf32>
    %376 = arith.addf %375, %16 : vector<16x8xf32>
    %377 = vector.shape_cast %376 : vector<16x8xf32> to vector<2x8x8xf32>
    %378 = arith.truncf %377 : vector<2x8x8xf32> to vector<2x8x8xbf16>
    "tpu.trace_start"() <{level = 10 : i32, message = "bqd,bde->bqe"}> : () -> ()
    %cst_204 = arith.constant dense<0.000000e+00> : vector<2x8x8xf32>
    %379 = tpu.matmul %378, %17, %cst_204 {dimension_numbers = #tpu.dot_dimension_numbers<[2], [1], [1], [2], [0, 0, 0, 1, 1, 2], [0], [0]>} : vector<2x8x8xbf16>, vector<2x8x8xbf16>, vector<2x8x8xf32> -> vector<2x8x8xf32>
    "tpu.trace_stop"() : () -> ()
    %cst_205 = arith.constant dense<0xFF800000> : vector<2x8xf32>
    %380 = vector.multi_reduction <maximumf>, %379, %cst_205 [2] : vector<2x8x8xf32> to vector<2x8xf32>
    %381 = vector.shape_cast %380 : vector<2x8xf32> to vector<2x8x1xf32>
    %382 = vector.broadcast %381 : vector<2x8x1xf32> to vector<2x8x8xf32>
    %383 = arith.subf %379, %382 : vector<2x8x8xf32>
    %384 = math.exp %383 : vector<2x8x8xf32>
    %cst_206 = arith.constant dense<0.000000e+00> : vector<2x8xf32>
    %385 = vector.multi_reduction <add>, %384, %cst_206 [2] : vector<2x8x8xf32> to vector<2x8xf32>
    %386 = vector.shape_cast %385 : vector<2x8xf32> to vector<2x8x1xf32>
    %387 = tpu.reciprocal %386 {approx = true} : vector<2x8x1xf32> -> vector<2x8x1xf32>
    %388 = vector.broadcast %387 : vector<2x8x1xf32> to vector<2x8x8xf32>
    %389 = arith.mulf %384, %388 : vector<2x8x8xf32>
    %390 = arith.truncf %389 : vector<2x8x8xf32> to vector<2x8x8xbf16>
    "tpu.trace_start"() <{level = 10 : i32, message = "bqe,bed->bqd"}> : () -> ()
    %cst_207 = arith.constant dense<0.000000e+00> : vector<2x8x8xf32>
    %391 = tpu.matmul %390, %18, %cst_207 {dimension_numbers = #tpu.dot_dimension_numbers<[2], [1], [1], [2], [0, 0, 0, 1, 1, 2], [0], [0]>} : vector<2x8x8xbf16>, vector<2x8x8xbf16>, vector<2x8x8xf32> -> vector<2x8x8xf32>
    "tpu.trace_stop"() : () -> ()
    %392 = vector.shape_cast %391 : vector<2x8x8xf32> to vector<16x8xf32>
    %393 = arith.truncf %392 : vector<16x8xf32> to vector<16x8xbf16>
    %c0_208 = arith.constant 0 : index
    %c0_209 = arith.constant 0 : index
    %394 = vector.load %arg14[%c0_208, %c0_209] : memref<8x32xbf16, #tpu.memory_space<vmem>>, vector<8x32xbf16>
    %cst_210 = arith.constant dense<0.000000e+00> : vector<16x32xf32>
    %395 = tpu.matmul %393, %394, %cst_210 {dimension_numbers = #tpu.dot_dimension_numbers<[1], [0], [0], [1], [0, 0, 1, 1], [], []>} : vector<16x8xbf16>, vector<8x32xbf16>, vector<16x32xf32> -> vector<16x32xf32>
    %c0_211 = arith.constant 0 : index
    %c0_212 = arith.constant 0 : index
    %396 = vector.load %arg15[%c0_211, %c0_212] : memref<1x32xf32, #tpu.memory_space<vmem>>, vector<1x32xf32>
    %397 = vector.broadcast %396 : vector<1x32xf32> to vector<16x32xf32>
    %398 = arith.addf %395, %397 : vector<16x32xf32>
    %399 = arith.addf %372, %398 : vector<16x32xf32>
    %400 = arith.addf %399, %324 : vector<16x32xf32>
    %401 = arith.truncf %400 : vector<16x32xf32> to vector<16x32xbf16>
    %c0_213 = arith.constant 0 : index
    %c0_214 = arith.constant 0 : index
    %402 = vector.load %arg16[%c0_213, %c0_214] : memref<32x8xbf16, #tpu.memory_space<vmem>>, vector<32x8xbf16>
    %cst_215 = arith.constant dense<0.000000e+00> : vector<16x8xf32>
    %403 = tpu.matmul %401, %402, %cst_215 {dimension_numbers = #tpu.dot_dimension_numbers<[1], [0], [0], [1], [0, 0, 1, 1], [], []>} : vector<16x32xbf16>, vector<32x8xbf16>, vector<16x8xf32> -> vector<16x8xf32>
    %c0_216 = arith.constant 0 : index
    %c0_217 = arith.constant 0 : index
    %404 = vector.load %arg17[%c0_216, %c0_217] : memref<1x8xf32, #tpu.memory_space<vmem>>, vector<1x8xf32>
    %405 = vector.broadcast %404 : vector<1x8xf32> to vector<16x8xf32>
    %406 = arith.addf %403, %405 : vector<16x8xf32>
    %407 = arith.truncf %406 : vector<16x8xf32> to vector<16x8xbf16>
    %c0_218 = arith.constant 0 : index
    %c0_219 = arith.constant 0 : index
    %408 = vector.load %arg18[%c0_218, %c0_219] : memref<8x128xbf16, #tpu.memory_space<vmem>>, vector<8x128xbf16>
    %cst_220 = arith.constant dense<0.000000e+00> : vector<16x128xf32>
    %409 = tpu.matmul %407, %408, %cst_220 {dimension_numbers = #tpu.dot_dimension_numbers<[1], [0], [0], [1], [0, 0, 1, 1], [], []>} : vector<16x8xbf16>, vector<8x128xbf16>, vector<16x128xf32> -> vector<16x128xf32>
    %c0_221 = arith.constant 0 : index
    %c0_222 = arith.constant 0 : index
    %410 = vector.load %arg19[%c0_221, %c0_222] : memref<1x128xf32, #tpu.memory_space<vmem>>, vector<1x128xf32>
    %411 = vector.broadcast %410 : vector<1x128xf32> to vector<16x128xf32>
    %412 = arith.addf %409, %411 : vector<16x128xf32>
    %413 = vector.shape_cast %412 : vector<16x128xf32> to vector<2x8x128xf32>
    %c0_223 = arith.constant 0 : index
    %c0_224 = arith.constant 0 : index
    %c0_225 = arith.constant 0 : index
    %414 = vector.load %arg20[%c0_223, %c0_224, %c0_225] : memref<2x8x128xf32, #tpu.memory_space<vmem>>, vector<2x8x128xf32>
    tpu.vector_store %arg20[%c0_223, %c0_224, %c0_225], %413 {strides = array<i32>} : memref<2x8x128xf32, #tpu.memory_space<vmem>>, vector<2x8x128xf32>,
    return
  }
  func.func @transform_0(%arg0: i32) -> (i32, i32, i32) {
    %c0_i32 = arith.constant 0 : i32
    %c0_i32_0 = arith.constant 0 : i32
    %c0_i32_1 = arith.constant 0 : i32
    return %arg0, %c0_i32, %c0_i32_0 : i32, i32, i32
  }
  func.func @transform_1(%arg0: i32) -> (i32, i32, i32) {
    %c0_i32 = arith.constant 0 : i32
    %c0_i32_0 = arith.constant 0 : i32
    %c0_i32_1 = arith.constant 0 : i32
    return %arg0, %c0_i32, %c0_i32_0 : i32, i32, i32
  }
  func.func @transform_2(%arg0: i32) -> (i32, i32, i32) {
    %c0_i32 = arith.constant 0 : i32
    %c0_i32_0 = arith.constant 0 : i32
    %c0_i32_1 = arith.constant 0 : i32
    return %arg0, %c0_i32, %c0_i32_0 : i32, i32, i32
  }
  func.func @transform_3(%arg0: i32) -> (i32, i32) {
    %c0_i32 = arith.constant 0 : i32
    %c0_i32_0 = arith.constant 0 : i32
    %c0_i32_1 = arith.constant 0 : i32
    return %c0_i32, %c0_i32_0 : i32, i32
  }
  func.func @transform_4(%arg0: i32) -> (i32, i32) {
    %c0_i32 = arith.constant 0 : i32
    %c0_i32_0 = arith.constant 0 : i32
    %c0_i32_1 = arith.constant 0 : i32
    return %c0_i32, %c0_i32_0 : i32, i32
  }
  func.func @transform_5(%arg0: i32) -> (i32, i32) {
    %c0_i32 = arith.constant 0 : i32
    %c0_i32_0 = arith.constant 0 : i32
    %c0_i32_1 = arith.constant 0 : i32
    return %c0_i32, %c0_i32_0 : i32, i32
  }
  func.func @transform_6(%arg0: i32) -> (i32, i32) {
    %c0_i32 = arith.constant 0 : i32
    %c0_i32_0 = arith.constant 0 : i32
    %c0_i32_1 = arith.constant 0 : i32
    return %c0_i32, %c0_i32_0 : i32, i32
  }
  func.func @transform_7(%arg0: i32) -> (i32, i32, i32, i32) {
    %c0_i32 = arith.constant 0 : i32
    %c0_i32_0 = arith.constant 0 : i32
    %c0_i32_1 = arith.constant 0 : i32
    %c0_i32_2 = arith.constant 0 : i32
    %c0_i32_3 = arith.constant 0 : i32
    return %c0_i32, %c0_i32_0, %c0_i32_1, %c0_i32_2 : i32, i32, i32, i32
  }
  func.func @transform_8(%arg0: i32) -> (i32, i32, i32) {
    %c0_i32 = arith.constant 0 : i32
    %c0_i32_0 = arith.constant 0 : i32
    %c0_i32_1 = arith.constant 0 : i32
    %c0_i32_2 = arith.constant 0 : i32
    return %c0_i32, %c0_i32_0, %c0_i32_1 : i32, i32, i32
  }
  func.func @transform_9(%arg0: i32) -> (i32, i32, i32, i32) {
    %c0_i32 = arith.constant 0 : i32
    %c0_i32_0 = arith.constant 0 : i32
    %c0_i32_1 = arith.constant 0 : i32
    %c0_i32_2 = arith.constant 0 : i32
    %c0_i32_3 = arith.constant 0 : i32
    return %c0_i32, %c0_i32_0, %c0_i32_1, %c0_i32_2 : i32, i32, i32, i32
  }
  func.func @transform_10(%arg0: i32) -> (i32, i32, i32) {
    %c0_i32 = arith.constant 0 : i32
    %c0_i32_0 = arith.constant 0 : i32
    %c0_i32_1 = arith.constant 0 : i32
    %c0_i32_2 = arith.constant 0 : i32
    return %c0_i32, %c0_i32_0, %c0_i32_1 : i32, i32, i32
  }
  func.func @transform_11(%arg0: i32) -> (i32, i32) {
    %c0_i32 = arith.constant 0 : i32
    %c0_i32_0 = arith.constant 0 : i32
    %c0_i32_1 = arith.constant 0 : i32
    return %c0_i32, %c0_i32_0 : i32, i32
  }
  func.func @transform_12(%arg0: i32) -> (i32, i32) {
    %c0_i32 = arith.constant 0 : i32
    %c0_i32_0 = arith.constant 0 : i32
    %c0_i32_1 = arith.constant 0 : i32
    return %c0_i32, %c0_i32_0 : i32, i32
  }
  func.func @transform_13(%arg0: i32) -> (i32, i32) {
    %c0_i32 = arith.constant 0 : i32
    %c0_i32_0 = arith.constant 0 : i32
    %c0_i32_1 = arith.constant 0 : i32
    return %c0_i32, %c0_i32_0 : i32, i32
  }
  func.func @transform_14(%arg0: i32) -> (i32, i32) {
    %c0_i32 = arith.constant 0 : i32
    %c0_i32_0 = arith.constant 0 : i32
    %c0_i32_1 = arith.constant 0 : i32
    return %c0_i32, %c0_i32_0 : i32, i32
  }
  func.func @transform_15(%arg0: i32) -> (i32, i32) {
    %c0_i32 = arith.constant 0 : i32
    %c0_i32_0 = arith.constant 0 : i32
    %c0_i32_1 = arith.constant 0 : i32
    return %c0_i32, %c0_i32_0 : i32, i32
  }
  func.func @transform_16(%arg0: i32) -> (i32, i32) {
    %c0_i32 = arith.constant 0 : i32
    %c0_i32_0 = arith.constant 0 : i32
    %c0_i32_1 = arith.constant 0 : i32
    return %c0_i32, %c0_i32_0 : i32, i32
  }
  func.func @transform_17(%arg0: i32) -> (i32, i32) {
    %c0_i32 = arith.constant 0 : i32
    %c0_i32_0 = arith.constant 0 : i32
    %c0_i32_1 = arith.constant 0 : i32
    return %c0_i32, %c0_i32_0 : i32, i32
  }
  func.func @transform_18(%arg0: i32) -> (i32, i32) {
    %c0_i32 = arith.constant 0 : i32
    %c0_i32_0 = arith.constant 0 : i32
    %c0_i32_1 = arith.constant 0 : i32
    return %c0_i32, %c0_i32_0 : i32, i32
  }
  func.func @transform_19(%arg0: i32) -> (i32, i32, i32) {
    %c0_i32 = arith.constant 0 : i32
    %c0_i32_0 = arith.constant 0 : i32
    %c0_i32_1 = arith.constant 0 : i32
    return %arg0, %c0_i32, %c0_i32_0 : i32, i32, i32
  }
}

</mosaic_0001>

<bundles_post_ra>
// kernel: tpu_custom_call.1
= control target key start
LH: loop header
LB: loop body
LE: loop exit
PB: predicated region body
PF: predicated region fallthrough
CT: control target
= control target key end

     0   :  { %s6929_s0 = inlined_call_operand.hbm [shape: f32[2,8,4], index: 0, kind: input, shape index: {}]   ;;  %s6930_s1 = inlined_call_operand.hbm [shape: bf16[2,8,8], index: 1, kind: input, shape index: {}]   ;;  %s6931_s2 = inlined_call_operand.hbm [shape: bf16[2,8,8], index: 2, kind: input, shape index: {}]   ;;  %s6932_s3 = inlined_call_operand.hbm [shape: bf16[4,8], index: 3, kind: input, shape index: {}]   ;;  %s6933_s4 = inlined_call_operand.hbm [shape: f32[1,8], index: 4, kind: input, shape index: {}]   ;;  %s6934_s5 = inlined_call_operand.hbm [shape: bf16[8,32], index: 5, kind: input, shape index: {}]   ;;  %s6935_s6 = inlined_call_operand.hbm [shape: f32[1,32], index: 6, kind: input, shape index: {}]   ;;  %s6936_s7 = inlined_call_operand.hbm [shape: bf16[5,3,32,32], index: 7, kind: input, shape index: {}]   ;;  %s6937_s8 = inlined_call_operand.hbm [shape: f32[5,1,32], index: 8, kind: input, shape index: {}]   ;;  %s6938_s9 = inlined_call_operand.hbm [shape: bf16[5,3,32,32], index: 9, kind: input, shape index: {}]   ;;  %s6939_s10 = inlined_call_operand.hbm [shape: f32[5,1,32], index: 10, kind: input, shape index: {}]   ;;  %s6940_s11 = inlined_call_operand.hbm [shape: bf16[32,8], index: 11, kind: input, shape index: {}]   ;;  %s6941_s12 = inlined_call_operand.hbm [shape: f32[1,8], index: 12, kind: input, shape index: {}]   ;;  %s6942_s13 = inlined_call_operand.hbm [shape: bf16[8,32], index: 13, kind: input, shape index: {}]   ;;  %s6943_s14 = inlined_call_operand.hbm [shape: f32[1,32], index: 14, kind: input, shape index: {}]   ;;  %s6944_s15 = inlined_call_operand.hbm [shape: bf16[32,8], index: 15, kind: input, shape index: {}]   ;;  %s6945_s16 = inlined_call_operand.hbm [shape: f32[1,8], index: 16, kind: input, shape index: {}]   ;;  %s6946_s17 = inlined_call_operand.hbm [shape: bf16[8,128], index: 17, kind: input, shape index: {}]   ;;  %s6947_s18 = inlined_call_operand.hbm [shape: f32[1,128], index: 18, kind: input, shape index: {}]   ;;  %s6948_s19 = inlined_call_operand.hbm [shape: f32[2,8,128], index: 19, kind: output, shape index: {}]  }
   0x1   :  { %6956 = sst [smem:[#allocation45_spill]] %s6929_s0 }
   0x2   :  { %6957 = sst [smem:[#allocation46_spill]] %s6930_s1 }
   0x3   :  { %6958 = sst [smem:[#allocation47_spill]] %s6931_s2 }
   0x4   :  { %6959 = sst [smem:[#allocation48_spill]] %s6932_s3 }
   0x5   :  { %6960 = sst [smem:[#allocation49_spill]] %s6945_s16 }
   0x6   :  { %6961 = sst [smem:[#allocation50_spill]] %s6947_s18 }
   0x7   :  { %6962 = sst [smem:[#allocation51_spill]] %s6948_s19 }
   0x8   :  { %24 = vsyncpa [#allocation4], 0 }
   0x9   :  { %25 = vsyncpa [#allocation7], 0 }
   0xa   :  { %26 = vsyncpa [#allocation10], 0 }
   0xb   :  { %27 = vsyncpa [#allocation13], 0 }
   0xc   :  { %28 = vsyncpa [#allocation16], 0 }
   0xd   :  { %29 = vsyncpa [#allocation19], 0 }
   0xe   :  { %30 = vsyncpa [#allocation22], 0 }
   0xf   :  { %31 = vsyncpa [#allocation25], 0 }
  0x10   :  { %32 = vsyncpa [#allocation28], 0 }
  0x11   :  { %33 = vsyncpa [#allocation31], 0 }
  0x12   :  { %34 = vsyncpa [#allocation5], 0  ;;  %s5983_s0 = smov [#allocation6]   ;;  %s6963_s1 = sld [smem:[#allocation46_spill]] }
  0x13   :  { %s52_s30 = sshll.u32 %s5983_s0, 4  ;;  %s53_s30 = int_to_ptr.vmem [resolvable:$true] %s52_s30 }
  0x18   :  { %s5521_s22 = scalar_lea.hbm %s6963_s1, 128 }
  0x19   :  { %p5522_p0 = scmp.ne.s32.totalorder %s6963_s1, %s5521_s22  ;;  %p5525_p1 = scmp.lt.u32.totalorder %s5521_s22, %s6963_s1 }
  0x1b   :  { %p5527_p2 = pnand %p5525_p1, %p5522_p0 }
  0x1d   :  { %5530 = shalt.err (!%p5527_p2)
}
  0x1e   :  { %s5531_s3 = scalar_lea.vmem %s53_s30, 128  ;;  %p5536_p4 = scmp.lt.s32.totalorder %s53_s30, %s53_s30 }
  0x1f   :  { %p5532_p3 = scmp.ne.s32.totalorder %s53_s30, %s5531_s3  ;;  %p5537_p5 = scmp.lt.s32.totalorder %s5531_s3, %s5531_s3 }
  0x21   :  { %p5538_p6 = por %p5537_p5, %p5536_p4 }
  0x23   :  { %p5539_p7 = pnand %p5538_p6, %p5532_p3 }
  0x25   :  { %5542 = shalt.err (!%p5539_p7)
}
  0x26   :  { %s5984_s26 = smov 64   ;;  %s5985_s27 = smov 4  }
  0x27   :  { %58 = dma.hbm_to_vmem [thread:$0]  %s6963_s1, 128, %s53_s30, [#allocation7], %s5984_s26, %s5984_s26, %s5985_s27  }
  0x28   :  { %s5986_s0 = smov [#allocation9]   ;;  %s5987_s21 = smov [#allocation12]  }
  0x29   :  { %s77_s20 = sshll.u32 %s5986_s0, 4  ;;  %s97_s22 = sshll.u32 %s5987_s21, 4  ;;  %s78_s20 = int_to_ptr.vmem [resolvable:$true] %s77_s20  ;;  %s98_s22 = int_to_ptr.vmem [resolvable:$true] %s97_s22 }
  0x2a   :  { %s6964_s24 = sld [smem:[#allocation48_spill]] }
  0x30   :  { %s5543_s25 = scalar_lea.hbm %s6964_s24, 32 }
  0x31   :  { %p5544_p8 = scmp.ne.s32.totalorder %s6964_s24, %s5543_s25  ;;  %p5547_p9 = scmp.lt.u32.totalorder %s5543_s25, %s6964_s24 }
  0x33   :  { %p5549_p10 = pnand %p5547_p9, %p5544_p8 }
  0x35   :  { %5552 = shalt.err (!%p5549_p10)
}
  0x36   :  { %s5553_s30 = scalar_lea.vmem %s78_s20, 32  ;;  %p5558_p12 = scmp.lt.s32.totalorder %s78_s20, %s78_s20 }
  0x37   :  { %p5554_p11 = scmp.ne.s32.totalorder %s78_s20, %s5553_s30  ;;  %p5559_p13 = scmp.lt.s32.totalorder %s5553_s30, %s5553_s30 }
  0x39   :  { %p5560_p0 = por %p5559_p13, %p5558_p12 }
  0x3b   :  { %p5561_p1 = pnand %p5560_p0, %p5554_p11 }
  0x3d   :  { %5564 = shalt.err (!%p5561_p1)
}
  0x3e   :  { %80 = dma.hbm_to_vmem [thread:$0]  %s6964_s24, 32, %s78_s20, [#allocation10]  }
  0x3f   :  { %s5565_s0 = scalar_lea.hbm %s6934_s5, 64 }
  0x40   :  { %p5566_p2 = scmp.ne.s32.totalorder %s6934_s5, %s5565_s0  ;;  %p5569_p3 = scmp.lt.u32.totalorder %s5565_s0, %s6934_s5 }
  0x42   :  { %p5571_p4 = pnand %p5569_p3, %p5566_p2 }
  0x44   :  { %5574 = shalt.err (!%p5571_p4)
}
  0x45   :  { %s5575_s23 = scalar_lea.vmem %s98_s22, 64  ;;  %p5580_p6 = scmp.lt.s32.totalorder %s98_s22, %s98_s22 }
  0x46   :  { %p5576_p5 = scmp.ne.s32.totalorder %s98_s22, %s5575_s23  ;;  %p5581_p7 = scmp.lt.s32.totalorder %s5575_s23, %s5575_s23 }
  0x48   :  { %p5582_p8 = por %p5581_p7, %p5580_p6 }
  0x4a   :  { %p5583_p9 = pnand %p5582_p8, %p5576_p5 }
  0x4c   :  { %5586 = shalt.err (!%p5583_p9)
}
  0x4d   :  { %100 = dma.hbm_to_vmem [thread:$0]  %s6934_s5, 64, %s98_s22, [#allocation13]  }
  0x4e   :  { %s5988_s25 = smov [#allocation15]   ;;  %s5989_s30 = smov [#allocation18]  }
  0x4f   :  { %s116_s3 = sshll.u32 %s5988_s25, 4  ;;  %s140_s1 = sshll.u32 %s5989_s30, 4  ;;  %s117_s3 = int_to_ptr.vmem [resolvable:$true] %s116_s3  ;;  %s141_s1 = int_to_ptr.vmem [resolvable:$true] %s140_s1 }
  0x50   :  { %s5587_s29 = scalar_lea.hbm %s6936_s7, 3840 }
  0x51   :  { %p5588_p10 = scmp.ne.s32.totalorder %s6936_s7, %s5587_s29  ;;  %p5591_p11 = scmp.lt.u32.totalorder %s5587_s29, %s6936_s7 }
  0x53   :  { %p5593_p12 = pnand %p5591_p11, %p5588_p10 }
  0x55   :  { %5596 = shalt.err (!%p5593_p12)
}
  0x56   :  { %s5597_s5 = scalar_lea.vmem %s117_s3, 3840  ;;  %p5602_p0 = scmp.lt.s32.totalorder %s117_s3, %s117_s3 }
  0x57   :  { %p5598_p13 = scmp.ne.s32.totalorder %s117_s3, %s5597_s5  ;;  %p5603_p1 = scmp.lt.s32.totalorder %s5597_s5, %s5597_s5 }
  0x59   :  { %p5604_p2 = por %p5603_p1, %p5602_p0 }
  0x5b   :  { %p5605_p3 = pnand %p5604_p2, %p5598_p13 }
  0x5d   :  { %5608 = shalt.err (!%p5605_p3)
}
  0x5e   :  { %122 = dma.hbm_to_vmem [thread:$0]  %s6936_s7, 3840, %s117_s3, [#allocation16], %s5984_s26, %s5984_s26, %s5985_s27  }
  0x5f   :  { %s5609_s24 = scalar_lea.hbm %s6938_s9, 3840 }
  0x60   :  { %p5610_p4 = scmp.ne.s32.totalorder %s6938_s9, %s5609_s24  ;;  %p5613_p5 = scmp.lt.u32.totalorder %s5609_s24, %s6938_s9 }
  0x62   :  { %p5615_p6 = pnand %p5613_p5, %p5610_p4 }
  0x64   :  { %5618 = shalt.err (!%p5615_p6)
}
  0x65   :  { %s5619_s29 = scalar_lea.vmem %s141_s1, 3840  ;;  %p5624_p8 = scmp.lt.s32.totalorder %s141_s1, %s141_s1 }
  0x66   :  { %p5620_p7 = scmp.ne.s32.totalorder %s141_s1, %s5619_s29  ;;  %p5625_p9 = scmp.lt.s32.totalorder %s5619_s29, %s5619_s29 }
  0x68   :  { %p5626_p10 = por %p5625_p9, %p5624_p8 }
  0x6a   :  { %p5627_p11 = pnand %p5626_p10, %p5620_p7 }
  0x6c   :  { %5630 = shalt.err (!%p5627_p11)
}
  0x6d   :  { %146 = dma.hbm_to_vmem [thread:$0]  %s6938_s9, 3840, %s141_s1, [#allocation19], %s5984_s26, %s5984_s26, %s5985_s27  }
  0x6e   :  { %s5990_s0 = smov [#allocation21]   ;;  %s5991_s18 = smov [#allocation24]  }
  0x6f   :  { %s164_s16 = sshll.u32 %s5990_s0, 4  ;;  %s187_s21 = sshll.u32 %s5991_s18, 4  ;;  %s165_s16 = int_to_ptr.vmem [resolvable:$true] %s164_s16  ;;  %s188_s21 = int_to_ptr.vmem [resolvable:$true] %s187_s21 }
  0x70   :  { %s5631_s2 = scalar_lea.hbm %s6940_s11, 256 }
  0x71   :  { %p5632_p12 = scmp.ne.s32.totalorder %s6940_s11, %s5631_s2  ;;  %p5635_p13 = scmp.lt.u32.totalorder %s5631_s2, %s6940_s11 }
  0x73   :  { %p5637_p0 = pnand %p5635_p13, %p5632_p12 }
  0x75   :  { %5640 = shalt.err (!%p5637_p0)
}
  0x76   :  { %s5641_s9 = scalar_lea.vmem %s165_s16, 256  ;;  %p5646_p2 = scmp.lt.s32.totalorder %s165_s16, %s165_s16 }
  0x77   :  { %p5642_p1 = scmp.ne.s32.totalorder %s165_s16, %s5641_s9  ;;  %p5647_p3 = scmp.lt.s32.totalorder %s5641_s9, %s5641_s9 }
  0x79   :  { %p5648_p4 = por %p5647_p3, %p5646_p2 }
  0x7b   :  { %p5649_p5 = pnand %p5648_p4, %p5642_p1 }
  0x7d   :  { %5652 = shalt.err (!%p5649_p5)
}
  0x7e   :  { %170 = dma.hbm_to_vmem [thread:$0]  %s6940_s11, 256, %s165_s16, [#allocation22], %s5984_s26, %s5984_s26, %s5985_s27  }
  0x7f   :  { %s5653_s29 = scalar_lea.hbm %s6942_s13, 64 }
  0x80   :  { %p5654_p6 = scmp.ne.s32.totalorder %s6942_s13, %s5653_s29  ;;  %p5657_p7 = scmp.lt.u32.totalorder %s5653_s29, %s6942_s13 }
  0x82   :  { %p5659_p8 = pnand %p5657_p7, %p5654_p6 }
  0x84   :  { %5662 = shalt.err (!%p5659_p8)
}
  0x85   :  { %s5663_s5 = scalar_lea.vmem %s188_s21, 64  ;;  %p5668_p10 = scmp.lt.s32.totalorder %s188_s21, %s188_s21 }
  0x86   :  { %p5664_p9 = scmp.ne.s32.totalorder %s188_s21, %s5663_s5  ;;  %p5669_p11 = scmp.lt.s32.totalorder %s5663_s5, %s5663_s5 }
  0x88   :  { %p5670_p12 = por %p5669_p11, %p5668_p10 }
  0x8a   :  { %p5671_p13 = pnand %p5670_p12, %p5664_p9 }
  0x8c   :  { %5674 = shalt.err (!%p5671_p13)
}
  0x8d   :  { %190 = dma.hbm_to_vmem [thread:$0]  %s6942_s13, 64, %s188_s21, [#allocation25]  }
  0x8e   :  { %s5992_s22 = smov [#allocation27]   ;;  %s5993_s23 = smov [#allocation30]  }
  0x8f   :  { %s206_s2 = sshll.u32 %s5992_s22, 4  ;;  %s229_s20 = sshll.u32 %s5993_s23, 4  ;;  %s207_s2 = int_to_ptr.vmem [resolvable:$true] %s206_s2  ;;  %s230_s20 = int_to_ptr.vmem [resolvable:$true] %s229_s20 }
  0x90   :  { %s5675_s9 = scalar_lea.hbm %s6944_s15, 256 }
  0x91   :  { %p5676_p0 = scmp.ne.s32.totalorder %s6944_s15, %s5675_s9  ;;  %p5679_p1 = scmp.lt.u32.totalorder %s5675_s9, %s6944_s15 }
  0x93   :  { %p5681_p2 = pnand %p5679_p1, %p5676_p0 }
  0x95   :  { %5684 = shalt.err (!%p5681_p2)
}
  0x96   :  { %s5685_s13 = scalar_lea.vmem %s207_s2, 256  ;;  %p5690_p4 = scmp.lt.s32.totalorder %s207_s2, %s207_s2 }
  0x97   :  { %p5686_p3 = scmp.ne.s32.totalorder %s207_s2, %s5685_s13  ;;  %p5691_p5 = scmp.lt.s32.totalorder %s5685_s13, %s5685_s13 }
  0x99   :  { %p5692_p6 = por %p5691_p5, %p5690_p4 }
  0x9b   :  { %p5693_p7 = pnand %p5692_p6, %p5686_p3 }
  0x9d   :  { %5696 = shalt.err (!%p5693_p7)
}
  0x9e   :  { %212 = dma.hbm_to_vmem [thread:$0]  %s6944_s15, 256, %s207_s2, [#allocation28], %s5984_s26, %s5984_s26, %s5985_s27  }
  0x9f   :  { %s5697_s0 = scalar_lea.hbm %s6946_s17, 64 }
  0xa0   :  { %p5698_p8 = scmp.ne.s32.totalorder %s6946_s17, %s5697_s0  ;;  %p5701_p9 = scmp.lt.u32.totalorder %s5697_s0, %s6946_s17 }
  0xa2   :  { %p5703_p10 = pnand %p5701_p9, %p5698_p8 }
  0xa4   :  { %5706 = shalt.err (!%p5703_p10)
}
  0xa5   :  { %s5707_s22 = scalar_lea.vmem %s230_s20, 64  ;;  %p5712_p12 = scmp.lt.s32.totalorder %s230_s20, %s230_s20 }
  0xa6   :  { %p5708_p11 = scmp.ne.s32.totalorder %s230_s20, %s5707_s22  ;;  %p5713_p13 = scmp.lt.s32.totalorder %s5707_s22, %s5707_s22 }
  0xa8   :  { %p5714_p0 = por %p5713_p13, %p5712_p12 }
  0xaa   :  { %p5715_p1 = pnand %p5714_p0, %p5708_p11 }
  0xac   :  { %5718 = shalt.err (!%p5715_p1)
}
  0xad   :  { %232 = dma.hbm_to_vmem [thread:$0]  %s6946_s17, 64, %s230_s20, [#allocation31]  }
  0xae   :  { %s5994_s23 = smov [#allocation3]   ;;  %s6965_s1 = sld [smem:[#allocation45_spill]] }
  0xaf   :  { %s40_s24 = sshll.u32 %s5994_s23, 4  ;;  %s41_s24 = int_to_ptr.vmem [resolvable:$true] %s40_s24 }
  0xb4   :  { %s5719_s30 = scalar_lea.hbm %s6965_s1, 256 }
  0xb5   :  { %p5720_p2 = scmp.ne.s32.totalorder %s6965_s1, %s5719_s30  ;;  %p5723_p3 = scmp.lt.u32.totalorder %s5719_s30, %s6965_s1 }
  0xb7   :  { %p5725_p4 = pnand %p5723_p3, %p5720_p2 }
  0xb9   :  { %5728 = shalt.err (!%p5725_p4)
}
  0xba   :  { %s5729_s29 = scalar_lea.vmem %s41_s24, 256  ;;  %p5734_p6 = scmp.lt.s32.totalorder %s41_s24, %s41_s24 }
  0xbb   :  { %p5730_p5 = scmp.ne.s32.totalorder %s41_s24, %s5729_s29  ;;  %p5735_p7 = scmp.lt.s32.totalorder %s5729_s29, %s5729_s29 }
  0xbd   :  { %p5736_p8 = por %p5735_p7, %p5734_p6 }
  0xbf   :  { %p5737_p9 = pnand %p5736_p8, %p5730_p5 }
  0xc1   :  { %5740 = shalt.err (!%p5737_p9)
}
  0xc2   :  { %s5995_s17 = smov 128   ;;  %s5996_s20 = smov 8  }
  0xc3   :  { %46 = dma.hbm_to_vmem [thread:$0]  %s6965_s1, 256, %s41_s24, [#allocation4], %s5995_s17, %s5995_s17, %s5996_s20  }
  0xc4   :  { %s5997_s0 = smov [#allocation8]   ;;  %s5998_s5 = smov [#allocation11]  }
  0xc5   :  { %s64_s18 = sshll.u32 %s5997_s0, 4  ;;  %s87_s11 = sshll.u32 %s5998_s5, 4  ;;  %s65_s18 = int_to_ptr.vmem [resolvable:$true] %s64_s18  ;;  %s88_s11 = int_to_ptr.vmem [resolvable:$true] %s87_s11 }
  0xc6   :  { %s6966_s15 = sld [smem:[#allocation47_spill]] }
  0xcc   :  { %s5741_s2 = scalar_lea.hbm %s6966_s15, 128 }
  0xcd   :  { %p5742_p10 = scmp.ne.s32.totalorder %s6966_s15, %s5741_s2  ;;  %p5745_p11 = scmp.lt.u32.totalorder %s5741_s2, %s6966_s15 }
  0xcf   :  { %p5747_p12 = pnand %p5745_p11, %p5742_p10 }
  0xd1   :  { %5750 = shalt.err (!%p5747_p12)
}
  0xd2   :  { %s5751_s24 = scalar_lea.vmem %s65_s18, 128  ;;  %p5756_p0 = scmp.lt.s32.totalorder %s65_s18, %s65_s18 }
  0xd3   :  { %p5752_p13 = scmp.ne.s32.totalorder %s65_s18, %s5751_s24  ;;  %p5757_p1 = scmp.lt.s32.totalorder %s5751_s24, %s5751_s24 }
  0xd5   :  { %p5758_p2 = por %p5757_p1, %p5756_p0 }
  0xd7   :  { %p5759_p3 = pnand %p5758_p2, %p5752_p13 }
  0xd9   :  { %5762 = shalt.err (!%p5759_p3)
}
  0xda   :  { %70 = dma.hbm_to_vmem [thread:$0]  %s6966_s15, 128, %s65_s18, [#allocation7], %s5984_s26, %s5984_s26, %s5985_s27  }
  0xdb   :  { %s5763_s21 = scalar_lea.hbm %s6933_s4, 16 }
  0xdc   :  { %p5764_p4 = scmp.ne.s32.totalorder %s6933_s4, %s5763_s21  ;;  %p5767_p5 = scmp.lt.u32.totalorder %s5763_s21, %s6933_s4 }
  0xde   :  { %p5769_p6 = pnand %p5767_p5, %p5764_p4 }
  0xe0   :  { %5772 = shalt.err (!%p5769_p6)
}
  0xe1   :  { %s5773_s5 = scalar_lea.vmem %s88_s11, 16  ;;  %s5777_s16 = scalar_lea.vmem %s88_s11, 32 }
  0xe2   :  { %p5774_p7 = scmp.ne.s32.totalorder %s88_s11, %s5773_s5  ;;  %p5778_p8 = scmp.lt.s32.totalorder %s88_s11, %s88_s11 }
  0xe3   :  { %p5779_p9 = scmp.lt.s32.totalorder %s5777_s16, %s5773_s5 }
  0xe5   :  { %p5780_p10 = por %p5779_p9, %p5778_p8 }
  0xe7   :  { %p5781_p11 = pnand %p5780_p10, %p5774_p7 }
  0xe9   :  { %5784 = shalt.err (!%p5781_p11)
}
  0xea   :  { %90 = dma.hbm_to_vmem [thread:$0]  %s6933_s4, 16, %s88_s11, [#allocation10]  }
  0xeb   :  { %s5999_s18 = smov [#allocation14]   ;;  %s6000_s15 = smov [#allocation17]  }
  0xec   :  { %s107_s22 = sshll.u32 %s5999_s18, 4  ;;  %s128_s2 = sshll.u32 %s6000_s15, 4  ;;  %s108_s22 = int_to_ptr.vmem [resolvable:$true] %s107_s22  ;;  %s6277_s2 = int_to_ptr.vmem [resolvable:$true] %s128_s2 }
  0xed   :  { %s5785_s9 = scalar_lea.hbm %s6935_s6, 16 }
  0xee   :  { %p5786_p12 = scmp.ne.s32.totalorder %s6935_s6, %s5785_s9  ;;  %p5789_p13 = scmp.lt.u32.totalorder %s5785_s9, %s6935_s6 }
  0xf0   :  { %p5791_p0 = pnand %p5789_p13, %p5786_p12 }
  0xf2   :  { %5794 = shalt.err (!%p5791_p0)
}
  0xf3   :  { %s5795_s4 = scalar_lea.vmem %s108_s22, 16  ;;  %s5799_s11 = scalar_lea.vmem %s108_s22, 32 }
  0xf4   :  { %p5796_p1 = scmp.ne.s32.totalorder %s108_s22, %s5795_s4  ;;  %p5800_p2 = scmp.lt.s32.totalorder %s108_s22, %s108_s22 }
  0xf5   :  { %p5801_p3 = scmp.lt.s32.totalorder %s5799_s11, %s5795_s4 }
  0xf7   :  { %p5802_p4 = por %p5801_p3, %p5800_p2 }
  0xf9   :  { %p5803_p5 = pnand %p5802_p4, %p5796_p1 }
  0xfb   :  { %5806 = shalt.err (!%p5803_p5)
}
  0xfc   :  { %110 = dma.hbm_to_vmem [thread:$0]  %s6935_s6, 16, %s108_s22, [#allocation13]  }
  0xfd   :  { %s5807_s7 = scalar_lea.hbm %s6937_s8, 80 }
  0xfe   :  { %p5808_p6 = scmp.ne.s32.totalorder %s6937_s8, %s5807_s7  ;;  %p5811_p7 = scmp.lt.u32.totalorder %s5807_s7, %s6937_s8 }
 0x100   :  { %p5813_p8 = pnand %p5811_p7, %p5808_p6 }
 0x102   :  { %5816 = shalt.err (!%p5813_p8)
}
 0x103   :  { %s5817_s26 = scalar_lea.vmem %s6277_s2, 80  ;;  %s5821_s6 = scalar_lea.vmem %s6277_s2, 96 }
 0x104   :  { %p5818_p9 = scmp.ne.s32.totalorder %s6277_s2, %s5817_s26  ;;  %p5822_p10 = scmp.lt.s32.totalorder %s6277_s2, %s6277_s2 }
 0x105   :  { %p5823_p11 = scmp.lt.s32.totalorder %s5821_s6, %s5817_s26 }
 0x107   :  { %p5824_p12 = por %p5823_p11, %p5822_p10 }
 0x109   :  { %p5825_p13 = pnand %p5824_p12, %p5818_p9 }
 0x10b   :  { %5828 = shalt.err (!%p5825_p13)
}
 0x10c   :  { %s6001_s27 = smov 16   ;;  %s6002_s18 = smov 1  }
 0x10d   :  { %134 = dma.hbm_to_vmem [thread:$0]  %s6937_s8, 80, %s6277_s2, [#allocation16], %s6001_s27, %s6001_s27, %s6002_s18  }
 0x10e   :  { %s6003_s23 = smov [#allocation20]   ;;  %s6004_s9 = smov [#allocation23]  }
 0x10f   :  { %s152_s25 = sshll.u32 %s6003_s23, 4  ;;  %s177_s30 = sshll.u32 %s6004_s9, 4  ;;  %s153_s25 = int_to_ptr.vmem [resolvable:$true] %s152_s25  ;;  %s178_s30 = int_to_ptr.vmem [resolvable:$true] %s177_s30 }
 0x110   :  { %s5829_s28 = scalar_lea.hbm %s6939_s10, 80 }
 0x111   :  { %p5830_p0 = scmp.ne.s32.totalorder %s6939_s10, %s5829_s28  ;;  %p5833_p1 = scmp.lt.u32.totalorder %s5829_s28, %s6939_s10 }
 0x113   :  { %p5835_p2 = pnand %p5833_p1, %p5830_p0 }
 0x115   :  { %5838 = shalt.err (!%p5835_p2)
}
 0x116   :  { %s5839_s8 = scalar_lea.vmem %s153_s25, 80  ;;  %s5843_s2 = scalar_lea.vmem %s153_s25, 96 }
 0x117   :  { %p5840_p3 = scmp.ne.s32.totalorder %s153_s25, %s5839_s8  ;;  %p5844_p4 = scmp.lt.s32.totalorder %s153_s25, %s153_s25 }
 0x118   :  { %p5845_p5 = scmp.lt.s32.totalorder %s5843_s2, %s5839_s8 }
 0x11a   :  { %p5846_p6 = por %p5845_p5, %p5844_p4 }
 0x11c   :  { %p5847_p7 = pnand %p5846_p6, %p5840_p3 }
 0x11e   :  { %5850 = shalt.err (!%p5847_p7)
}
 0x11f   :  { %158 = dma.hbm_to_vmem [thread:$0]  %s6939_s10, 80, %s153_s25, [#allocation19], %s6001_s27, %s6001_s27, %s6002_s18  }
 0x120   :  { %s5851_s0 = scalar_lea.hbm %s6941_s12, 16 }
 0x121   :  { %p5852_p8 = scmp.ne.s32.totalorder %s6941_s12, %s5851_s0  ;;  %p5855_p9 = scmp.lt.u32.totalorder %s5851_s0, %s6941_s12 }
 0x123   :  { %p5857_p10 = pnand %p5855_p9, %p5852_p8 }
 0x125   :  { %5860 = shalt.err (!%p5857_p10)
}
 0x126   :  { %s5861_s22 = scalar_lea.vmem %s178_s30, 16  ;;  %s5865_s15 = scalar_lea.vmem %s178_s30, 32 }
 0x127   :  { %p5862_p11 = scmp.ne.s32.totalorder %s178_s30, %s5861_s22  ;;  %p5866_p12 = scmp.lt.s32.totalorder %s178_s30, %s178_s30 }
 0x128   :  { %p5867_p13 = scmp.lt.s32.totalorder %s5865_s15, %s5861_s22 }
 0x12a   :  { %p5868_p0 = por %p5867_p13, %p5866_p12 }
 0x12c   :  { %p5869_p1 = pnand %p5868_p0, %p5862_p11 }
 0x12e   :  { %5872 = shalt.err (!%p5869_p1)
}
 0x12f   :  { %180 = dma.hbm_to_vmem [thread:$0]  %s6941_s12, 16, %s178_s30, [#allocation22]  }
 0x130   :  { %s6005_s18 = smov [#allocation26]   ;;  %s6006_s25 = smov [#allocation29]  }
 0x131   :  { %s197_s23 = sshll.u32 %s6005_s18, 4  ;;  %s219_s9 = sshll.u32 %s6006_s25, 4  ;;  %s198_s23 = int_to_ptr.vmem [resolvable:$true] %s197_s23  ;;  %s220_s9 = int_to_ptr.vmem [resolvable:$true] %s219_s9 }
 0x132   :  { %s5873_s28 = scalar_lea.hbm %s6943_s14, 16 }
 0x133   :  { %p5874_p2 = scmp.ne.s32.totalorder %s6943_s14, %s5873_s28  ;;  %p5877_p3 = scmp.lt.u32.totalorder %s5873_s28, %s6943_s14 }
 0x135   :  { %p5879_p4 = pnand %p5877_p3, %p5874_p2 }
 0x137   :  { %5882 = shalt.err (!%p5879_p4)
}
 0x138   :  { %s5883_s12 = scalar_lea.vmem %s198_s23, 16  ;;  %s5887_s30 = scalar_lea.vmem %s198_s23, 32 }
 0x139   :  { %p5884_p5 = scmp.ne.s32.totalorder %s198_s23, %s5883_s12  ;;  %p5888_p6 = scmp.lt.s32.totalorder %s198_s23, %s198_s23 }
 0x13a   :  { %p5889_p7 = scmp.lt.s32.totalorder %s5887_s30, %s5883_s12 }
 0x13c   :  { %p5890_p8 = por %p5889_p7, %p5888_p6 }
 0x13e   :  { %p5891_p9 = pnand %p5890_p8, %p5884_p5 }
 0x140   :  { %5894 = shalt.err (!%p5891_p9)
}
 0x141   :  { %200 = dma.hbm_to_vmem [thread:$0]  %s6943_s14, 16, %s198_s23, [#allocation25]  }
 0x142   :  { %s6967_s7 = sld [smem:[#allocation49_spill]] }
 0x148   :  { %s5895_s3 = scalar_lea.hbm %s6967_s7, 16 }
 0x149   :  { %p5896_p10 = scmp.ne.s32.totalorder %s6967_s7, %s5895_s3  ;;  %p5899_p11 = scmp.lt.u32.totalorder %s5895_s3, %s6967_s7 }
 0x14b   :  { %p5901_p12 = pnand %p5899_p11, %p5896_p10 }
 0x14d   :  { %5904 = shalt.err (!%p5901_p12)
}
 0x14e   :  { %s5905_s6 = scalar_lea.vmem %s220_s9, 16  ;;  %s5909_s22 = scalar_lea.vmem %s220_s9, 32 }
 0x14f   :  { %p5906_p13 = scmp.ne.s32.totalorder %s220_s9, %s5905_s6  ;;  %p5910_p0 = scmp.lt.s32.totalorder %s220_s9, %s220_s9 }
 0x150   :  { %p5911_p1 = scmp.lt.s32.totalorder %s5909_s22, %s5905_s6 }
 0x152   :  { %p5912_p2 = por %p5911_p1, %p5910_p0 }
 0x154   :  { %p5913_p3 = pnand %p5912_p2, %p5906_p13 }
 0x156   :  { %5916 = shalt.err (!%p5913_p3)
}
 0x157   :  { %222 = dma.hbm_to_vmem [thread:$0]  %s6967_s7, 16, %s220_s9, [#allocation28]  }
 0x158   :  { %s6007_s10 = smov [#allocation32]   ;;  %s6968_s25 = sld [smem:[#allocation50_spill]] }
 0x159   :  { %s239_s27 = sshll.u32 %s6007_s10, 4  ;;  %s240_s27 = int_to_ptr.vmem [resolvable:$true] %s239_s27 }
 0x15e   :  { %s5917_s24 = scalar_lea.hbm %s6968_s25, 16 }
 0x15f   :  { %p5918_p4 = scmp.ne.s32.totalorder %s6968_s25, %s5917_s24  ;;  %p5921_p5 = scmp.lt.u32.totalorder %s5917_s24, %s6968_s25 }
 0x161   :  { %p5923_p6 = pnand %p5921_p5, %p5918_p4 }
 0x163   :  { %5926 = shalt.err (!%p5923_p6)
}
 0x164   :  { %s5927_s19 = scalar_lea.vmem %s240_s27, 16  ;;  %s5931_s9 = scalar_lea.vmem %s240_s27, 32 }
 0x165   :  { %p5928_p7 = scmp.ne.s32.totalorder %s240_s27, %s5927_s19  ;;  %p5932_p8 = scmp.lt.s32.totalorder %s240_s27, %s240_s27 }
 0x166   :  { %p5933_p9 = scmp.lt.s32.totalorder %s5931_s9, %s5927_s19 }
 0x168   :  { %p5934_p10 = por %p5933_p9, %p5932_p8 }
 0x16a   :  { %p5935_p11 = pnand %p5934_p10, %p5928_p7 }
 0x16c   :  { %5938 = shalt.err (!%p5935_p11)
}
 0x16d   :  { %242 = dma.hbm_to_vmem [thread:$0]  %s6968_s25, 16, %s240_s27, [#allocation31]  }
 0x16e   :  { %5961 = dma.done.wait [#allocation4], 256  }
 0x16f   :  { %5962 = vsyncadd [#allocation4], 4294967040 }
 0x170   :  { %5963 = dma.done.wait [#allocation7], 256  }
 0x171   :  { %5964 = vsyncadd [#allocation7], 4294967040 }
 0x172   :  { %5965 = dma.done.wait [#allocation10], 48  }
 0x173   :  { %5966 = vsyncadd [#allocation10], 4294967248 }
 0x174   :  { %5967 = dma.done.wait [#allocation13], 80  }
 0x175   :  { %5968 = vsyncadd [#allocation13], 4294967216 }
 0x176   :  { %5969 = dma.done.wait [#allocation16], 3920  }
 0x177   :  { %5970 = vsyncadd [#allocation16], 4294963376 }
 0x178   :  { %5971 = dma.done.wait [#allocation19], 3920  }
 0x179   :  { %5972 = vsyncadd [#allocation19], 4294963376 }
 0x17a   :  { %5973 = dma.done.wait [#allocation22], 272  }
 0x17b   :  { %5974 = vsyncadd [#allocation22], 4294967024 }
 0x17c   :  { %5975 = dma.done.wait [#allocation25], 80  }
 0x17d   :  { %5976 = vsyncadd [#allocation25], 4294967216 }
 0x17e   :  { %5977 = dma.done.wait [#allocation28], 272  }
 0x17f   :  { %5978 = vsyncadd [#allocation28], 4294967024 }
 0x180   :  { %5979 = dma.done.wait [#allocation31], 80  }
 0x181   :  { %5980 = vsyncadd [#allocation31], 4294967216  ;;  %v6008_v0 = vmov 0.0   ;;  %vm6009_vm0 = vmmov 0   ;;  %vm317_vm1 = vcmask 1041408   ;;  %v302_v2 = vld [vmem:[#allocation3] sm:$0xff] }
 0x182   :  { %4864 = vmatprep.subr.bf16.mxu0 %v6008_v0  ;;  %4866 = vmatprep.mubr.msk.bf16.mxu0 %vm6009_vm0, %v6008_v0  ;;  %v305_v1 = vld [vmem:[#allocation9] sm:$0x3]  ;;  %v303_v3 = vld [vmem:[#allocation3 + $0x8] sm:$0xff]  ;;  %vm313_vm2 = vcmask 31744   ;;  %v363_v6 = vld [vmem:[#allocation12] sm:$0xf] }
 0x183   :  { %4870 = vmatprep.subr.bf16.mxu1 %v6008_v0  ;;  %4872 = vmatprep.mubr.msk.bf16.mxu1 %vm6009_vm0, %v6008_v0  ;;  %v319_v4 = vsel %vm317_vm1, %v305_v1, 0  ;;  %v304_v5 = vpack.c.bf16 %v303_v3, %v302_v2  ;;  %vm375_vm3 = vcmask 1043456   ;;  %v4464_v8 = vld [vmem:[#allocation11] ss:$0 sm:$0xff]  ;;  %vm371_vm4 = vcmask 64512   ;;  %v5349_v17 = vld [vmem:[#allocation15] sm:$0xff]  }
 0x184   :  { %4865 = vmatpush3.bf16.msra.mxu0 %v319_v4  ;;  %v377_v7 = vsel %vm375_vm3, %v363_v6, 0  ;;  %vm433_vm5 = vcmask 257024   ;;  %v6010_v16 = vmov 1065369472   ;;  %v5350_v18 = vld [vmem:[#allocation15 + $0x10] sm:$0xff]   ;;  %v5351_v19 = vld [vmem:[#allocation15 + $0x8] sm:$0xff]  }
 0x185   :  { %4876 = vmatprep.subr.bf16.mxu0 %v6008_v0  ;;  %4871 = vmatpush3.bf16.msra.mxu1 %v377_v7  ;;  %434 = vst.msk [vmem:[#allocation2] sm:$0xf] %vm433_vm5, %v6010_v16  ;;  %435 = vst.msk [vmem:[#allocation2 + $0x8] sm:$0xf] %vm433_vm5, %v6010_v16  ;;  %v5352_v20 = vld [vmem:[#allocation15 + $0x18] sm:$0xff]   ;;  %vm444_vm6 = vcmask 261124  }
 0x186   :  { %4884 = vmatprep.subr.bf16.mxu1 %v6008_v0  ;;  %v4466_v21 = vld [vmem:[#allocation14] ss:$0 sm:$0xff]  ;;  %vm459_vm7 = vcmask 1040384   ;;  %vm460_vm8 = vcmask 1044484   ;;  %vm470_vm10 = vsmask.f32 256 }
 0x187   :  { %4867 = vmatmul.mubr.msk.bf16.vlgmr.msra.gmra.mrb[0].mxu0 %vm313_vm2, %v304_v5  ;;  %vm6403_vm9 = vmor %vm459_vm7, %vm460_vm8  ;;  %vm471_vm11 = vsmask.f32 4368  ;;  %vm538_vm12 = vcmask 261120   ;;  %v5357_v49 = vld [vmem:[#allocation18 + $0x10] sm:$0xff]   ;;  %v5359_v58 = vld [vmem:[#allocation18 + $0x18] sm:$0xff]   ;;  %s6011_s30 = smov [#allocation33]  }
 0x188   :  { %4880 = vmatprep.mubr.msk.bf16.mxu0 %vm6009_vm0, %v6008_v0  ;;  %4877 = vmatpush3.bf16.msra.mxu0 %v5350_v18  ;;  %vm6412_vm13 = vmor %vm470_vm10, %vm471_vm11  ;;  %v5358_v61 = vld [vmem:[#allocation15 + $0x20] sm:$0xff]   ;;  %v5361_v63 = vld [vmem:[#allocation18 + $0x20] sm:$0xff]   ;;  %s4443_s8 = sshll.u32 %s6011_s30, 4  ;;  %s4444_s8 = int_to_ptr.vmem [resolvable:$true] %s4443_s8 }
 0x189   :  { %4878 = vmatprep.subr.bf16.mxu0 %v6008_v0  ;;  %v5360_v1 = vld [vmem:[#allocation15 + $0x28] sm:$0xff]   ;;  %v5363_v2 = vld [vmem:[#allocation18 + $0x28] sm:$0xff]   ;;  %v5362_v3 = vld [vmem:[#allocation18] sm:$0xff]   ;;  %s5939_s2 = scalar_lea.vmem %s4444_s8, 256  ;;  %p5944_p13 = scmp.lt.s32.totalorder %s4444_s8, %s4444_s8 }
 0x18a   :  { %v5364_v5 = vld [vmem:[#allocation18 + $0x8] sm:$0xff]   ;;  %v5365_v6 = vld [vmem:[#allocation21] sm:$0xff]   ;;  %v5366_v7 = vld [vmem:[#allocation21 + $0x8] sm:$0xff]   ;;  %p5940_p12 = scmp.ne.s32.totalorder %s4444_s8, %s5939_s2  ;;  %p5945_p0 = scmp.lt.s32.totalorder %s5939_s2, %s5939_s2 }
 0x18b   :  { %v5435_v54 = vld [vmem:[#allocation18 + $0xe8] sm:$0xff]  }
 0x18c   :  { %4879 = vmatpush3.bf16.msra.mxu0 %v5352_v20  ;;  %p5946_p1 = por %p5945_p0, %p5944_p13 }
 0x18d   :  { %4892 = vmatprep.subr.bf16.mxu0 %v6008_v0 }
 0x18e   :  { %p5947_p2 = pnand %p5946_p1, %p5940_p12 }
 0x25a   :  { %v355_v9 = vpop.f32.mrb[0].mxu0 }
 0x25b   :  { %v4868_v10 = vpop.f32.mrb[1].mxu0  ;;  %v6380_v12 = vadd.f32 %v4464_v8, %v355_v9 }
 0x25c   :  { %v358_v11 = vpop.f32.mrb[2].mxu0 }
 0x25d   :  { %v6382_v13 = vadd.f32 %v4464_v8, %v358_v11  ;;  %v4869_v14 = vpop.f32.mrb[3].mxu0  ;;  %v429_v8 = vld [vmem:[#allocation6] sm:$0xf] }
 0x25e   :  { %v6451_v9 = vsel %vm375_vm3, %v429_v8, 0 }
 0x25f   :  { %v362_v15 = vpack.c.bf16 %v6382_v13, %v6380_v12 }
 0x261   :  { %4873 = vmatmul.mubr.msk.bf16.vlgmr.msra.gmra.mrb[0].mxu1 %vm371_vm4, %v362_v15 }
 0x262   :  { %4888 = vmatprep.mubr.msk.bf16.mxu1 %vm6009_vm0, %v6008_v0  ;;  %4885 = vmatpush3.bf16.msra.mxu1 %v5349_v17 }
 0x263   :  { %4886 = vmatprep.subr.bf16.mxu1 %v6008_v0 }
 0x266   :  { %4887 = vmatpush3.bf16.msra.mxu1 %v5351_v19 }
 0x267   :  { %4900 = vmatprep.subr.bf16.mxu1 %v6008_v0 }
 0x334   :  { %v413_v22 = vpop.f32.mrb[0].mxu1 }
 0x335   :  { %v6393_v23 = vadd.f32 %v4466_v21, %v413_v22  ;;  %v4874_v24 = vpop.f32.mrb[1].mxu1 }
 0x336   :  { %v416_v25 = vpop.f32.mrb[2].mxu1 }
 0x337   :  { %v4690_v26 = vpack.c.bf16 %v6393_v23, %v6393_v23  ;;  %v6397_v27 = vadd.f32 %v4466_v21, %v416_v25  ;;  %v4875_v28 = vpop.f32.mrb[3].mxu1 }
 0x339   :  { %445 = vst.msk [vmem:[#allocation2] sm:$0xf0] %vm444_vm6, %v4690_v26  ;;  %v4691_v29 = vpack.c.bf16 %v6397_v27, %v6397_v27  ;;  %v436_v4 = vpack.c.bf16 %v6397_v27, %v6393_v23 }
 0x33b   :  { %446 = vst.msk [vmem:[#allocation2 + $0x8] sm:$0xf0] %vm444_vm6, %v4691_v29 }
 0x340   :  { %v447_v30 = vld [vmem:[#allocation2] sm:$0xff] }
 0x341   :  { %v4471_v31 = vcombine.low %v447_v30, %v447_v30  ;;  %v4472_v32 = vcombine.high %v447_v30, %v447_v30 }
 0x342   :  { %v448_v33 = vld [vmem:[#allocation2 + $0x8] sm:$0xff] }
 0x343   :  { %v4473_v34 = vcombine.low %v448_v33, %v448_v33  ;;  %v4474_v35 = vcombine.high %v448_v33, %v448_v33  ;;  %v4475_v36 = vrot.slane %v4471_v31, 11  ;;  %v464_v37 = vrot.slane %v4472_v32, 7 }
 0x344   :  { %v479_v39 = vshrl.u32 %v4472_v32, 16  ;;  %v474_v42 = vshrl.u32 %v4471_v31, 16  ;;  %v482_v44 = vshll.u32 %v4472_v32, 16 }
 0x345   :  { %v4476_v40 = vrot.slane %v4473_v34, 11  ;;  %v468_v41 = vrot.slane %v4474_v35, 7  ;;  %v487_v45 = vshrl.u32 %v4473_v34, 16  ;;  %v492_v46 = vshrl.u32 %v4474_v35, 16 }
 0x346   :  { %v481_v43 = vrot.slane %v479_v39, 7  ;;  %v465_v47 = vsel %vm6403_vm9, %v4475_v36, %v464_v37  ;;  %v495_v53 = vshll.u32 %v4474_v35, 16  ;;  %v4477_v55 = vrot.slane %v474_v42, 11  ;;  %v4500_v42 = vld [vmem:[#allocation20] ss:$0 sm:$0xff] }
 0x347   :  { %v469_v48 = vsel %vm6403_vm9, %v4476_v40, %v468_v41  ;;  %v494_v52 = vrot.slane %v492_v46, 7  ;;  %v4478_v56 = vrot.slane %v487_v45, 11 }
 0x348   :  { %v4483_v50 = vcombine.low %v465_v47, %v469_v48  ;;  %v484_v51 = vor.u32 %v482_v44, %v481_v43 }
 0x349   :  { %v497_v57 = vor.u32 %v495_v53, %v494_v52 }
 0x34a   :  { %4889 = vmatmul.mubr.msk.bf16.vlgmr.msra.gmra.mrb[4].mxu1 %vm538_vm12, %v4483_v50  ;;  %v485_v59 = vsel %vm6412_vm13, %v4477_v55, %v484_v51 }
 0x34b   :  { %4901 = vmatpush3.bf16.msra.mxu1 %v5357_v49  ;;  %4904 = vmatprep.mubr.msk.bf16.mxu1 %vm6009_vm0, %v6008_v0  ;;  %v498_v60 = vsel %vm6412_vm13, %v4478_v56, %v497_v57  ;;  %v4490_v57 = vld [vmem:[#allocation17] ss:$0 sm:$0xff] }
 0x34c   :  { %4902 = vmatprep.subr.bf16.mxu1 %v6008_v0  ;;  %v4479_v62 = vcombine.low %v485_v59, %v498_v60 }
 0x34e   :  { %4881 = vmatmul.mubr.msk.bf16.vlgmr.msra.gmra.mrb[4].mxu0 %vm538_vm12, %v4479_v62 }
 0x34f   :  { %4903 = vmatpush3.bf16.msra.mxu1 %v5359_v58  ;;  %4893 = vmatpush3.bf16.msra.mxu0 %v5358_v61 }
 0x350   :  { %4916 = vmatprep.subr.bf16.mxu1 %v6008_v0  ;;  %4894 = vmatprep.subr.bf16.mxu0 %v6008_v0 }
 0x351   :  { %4896 = vmatprep.mubr.msk.bf16.mxu0 %vm6009_vm0, %v6008_v0 }
 0x352   :  { %4905 = vmatmul.mubr.msk.bf16.vlgmr.msra.gmra.mrb[8].mxu1 %vm538_vm12, %v4479_v62 }
 0x353   :  { %4917 = vmatpush3.bf16.msra.mxu1 %v5361_v63  ;;  %4920 = vmatprep.mubr.msk.bf16.mxu1 %vm6009_vm0, %v6008_v0 }
 0x354   :  { %4895 = vmatpush3.bf16.msra.mxu0 %v5360_v1  ;;  %4918 = vmatprep.subr.bf16.mxu1 %v6008_v0 }
 0x355   :  { %4908 = vmatprep.subr.bf16.mxu0 %v6008_v0 }
 0x357   :  { %4897 = vmatmul.mubr.msk.bf16.vlgmr.msra.gmra.mrb[8].mxu0 %vm538_vm12, %v436_v4  ;;  %4919 = vmatpush3.bf16.msra.mxu1 %v5363_v2  ;;  %v430_v2 = vld [vmem:[#allocation6 + $0x4] sm:$0xf] }
 0x358   :  { %4909 = vmatpush3.bf16.msra.mxu0 %v5362_v3  ;;  %4912 = vmatprep.mubr.msk.bf16.mxu0 %vm6009_vm0, %v6008_v0  ;;  %v6465_v3 = vsel %vm375_vm3, %v430_v2, 0  ;;  %v5367_v2 = vld [vmem:[#allocation15 + $0x30] sm:$0xff]  }
 0x359   :  { %4910 = vmatprep.subr.bf16.mxu0 %v6008_v0  ;;  %4932 = vmatprep.subr.bf16.mxu1 %v6008_v0 }
 0x35a   :  { %4921 = vmatmul.mubr.msk.bf16.vlgmr.msra.gmra.mrb[12].mxu1 %vm538_vm12, %v436_v4  ;;  %v4468_v4 = vld [vmem:[#allocation23] ss:$0 sm:$0xff] }
 0x35b   :  { %4934 = vmatprep.mubr.msk.bf16.mxu1 %vm6009_vm0, %v6008_v0  ;;  %4933 = vmatpush3.bf16.msra.mxu1 %v6451_v9 }
 0x35c   :  { %4911 = vmatpush3.bf16.msra.mxu0 %v5364_v5  ;;  %4944 = vmatprep.subr.bf16.mxu1 %v6008_v0  ;;  %v6470_v5 = vadd.f32 %v4468_v4, %v6380_v12 }
 0x35d   :  { %4924 = vmatprep.subr.bf16.mxu0 %v6008_v0 }
 0x35f   :  { %4913 = vmatmul.mubr.msk.bf16.vlgmr.msra.gmra.mrb[12].mxu0 %vm538_vm12, %v4483_v50 }
 0x360   :  { %4928 = vmatprep.mubr.msk.bf16.mxu0 %vm6009_vm0, %v6008_v0  ;;  %4925 = vmatpush3.bf16.msra.mxu0 %v5365_v6 }
 0x361   :  { %4926 = vmatprep.subr.bf16.mxu0 %v6008_v0 }
 0x364   :  { %4927 = vmatpush3.bf16.msra.mxu0 %v5366_v7  ;;  %v6473_v7 = vadd.f32 %v4468_v4, %v6382_v13  ;;  %v5368_v4 = vld [vmem:[#allocation15 + $0x40] sm:$0xff]  }
 0x365   :  { %4938 = vmatprep.subr.bf16.mxu0 %v6008_v0 }
 0x41d   :  { %v635_v10 = vpop.f32.mrb[4].mxu1 }
 0x41e   :  { %v4890_v11 = vpop.f32.mrb[5].mxu1 }
 0x41f   :  { %v638_v14 = vpop.f32.mrb[6].mxu1 }
 0x420   :  { %v4891_v15 = vpop.f32.mrb[7].mxu1 }
 0x421   :  { %v576_v16 = vpop.f32.mrb[4].mxu0 }
 0x422   :  { %v636_v17 = vadd.f32 %v635_v10, %v576_v16  ;;  %v4882_v18 = vpop.f32.mrb[5].mxu0 }
 0x423   :  { %v579_v19 = vpop.f32.mrb[6].mxu0 }
 0x424   :  { %v639_v20 = vadd.f32 %v638_v14, %v579_v19  ;;  %v4883_v21 = vpop.f32.mrb[7].mxu0 }
 0x425   :  { %v755_v22 = vpop.f32.mrb[8].mxu1 }
 0x426   :  { %v4906_v24 = vpop.f32.mrb[9].mxu1 }
 0x427   :  { %v758_v25 = vpop.f32.mrb[10].mxu1 }
 0x428   :  { %v4907_v26 = vpop.f32.mrb[11].mxu1 }
 0x42a   :  { %v691_v28 = vpop.f32.mrb[8].mxu0 }
 0x42b   :  { %v698_v29 = vadd.f32 %v691_v28, %v636_v17  ;;  %v4898_v30 = vpop.f32.mrb[9].mxu0 }
 0x42c   :  { %v694_v31 = vpop.f32.mrb[10].mxu0 }
 0x42d   :  { %v699_v32 = vadd.f32 %v694_v31, %v639_v20  ;;  %v4899_v33 = vpop.f32.mrb[11].mxu0  ;;  %v861_v34 = vpop.f32.mrb[12].mxu1  ;;  %v707_v58 = vadd.f32 %v4490_v57, %v698_v29 }
 0x42e   :  { %v4922_v35 = vpop.f32.mrb[13].mxu1 }
 0x42f   :  { %v864_v36 = vpop.f32.mrb[14].mxu1  ;;  %v708_v60 = vadd.f32 %v4490_v57, %v699_v32 }
 0x430   :  { %v4923_v37 = vpop.f32.mrb[15].mxu1 }
 0x432   :  { %v808_v39 = vpop.f32.mrb[12].mxu0 }
 0x433   :  { %v809_v40 = vadd.f32 %v808_v39, %v755_v22  ;;  %v4914_v41 = vpop.f32.mrb[13].mxu0  ;;  %v431_v39 = vld [vmem:[#allocation8] sm:$0xf] }
 0x434   :  { %v811_v43 = vpop.f32.mrb[14].mxu0  ;;  %v432_v41 = vld [vmem:[#allocation8 + $0x4] sm:$0xf] }
 0x435   :  { %v868_v44 = vadd.f32 %v861_v34, %v809_v40  ;;  %v812_v45 = vadd.f32 %v811_v43, %v758_v25  ;;  %v4915_v46 = vpop.f32.mrb[15].mxu0  ;;  %v6488_v40 = vsel %vm375_vm3, %v431_v39, 0 }
 0x436   :  { %v1165_v46 = vld [vmem:[#allocation24] sm:$0xf] }
 0x437   :  { %v877_v47 = vadd.f32 %v4500_v42, %v868_v44  ;;  %v869_v48 = vadd.f32 %v864_v36, %v812_v45 }
 0x439   :  { %v4501_v49 = vmul.f32 -1.442695, %v877_v47  ;;  %v878_v50 = vadd.f32 %v4500_v42, %v869_v48  ;;  %v6493_v42 = vsel %vm375_vm3, %v432_v41, 0  ;;  %v5375_v41 = vld [vmem:[#allocation18 + $0x40] sm:$0xff]  }
 0x43b   :  { %5441 = vpow2.f32 %v4501_v49  ;;  %v4502_v51 = vmul.f32 -1.442695, %v878_v50  ;;  %v1177_v49 = vsel %vm375_vm3, %v1165_v46, 0 }
 0x43d   :  { %5443 = vpow2.f32 %v4502_v51 }
 0x445   :  { %v5442_v52 = vpop.eup %5441 }
 0x446   :  { %v885_v53 = vadd.f32 1.0, %v5442_v52 }
 0x447   :  { %v5444_v55 = vpop.eup %5443 }
 0x448   :  { %5445 = vrcp.f32 %v885_v53  ;;  %v886_v56 = vadd.f32 1.0, %v5444_v55 }
 0x44a   :  { %5447 = vrcp.f32 %v886_v56 }
 0x452   :  { %v5446_v59 = vpop.eup %5445 }
 0x453   :  { %v6455_v61 = vmul.f32 %v5446_v59, %v707_v58 }
 0x454   :  { %v5448_v62 = vpop.eup %5447 }
 0x455   :  { %v6457_v63 = vmul.f32 %v5448_v62, %v708_v60 }
 0x457   :  { %v893_v1 = vpack.c.bf16 %v6457_v63, %v6455_v61 }
 0x459   :  { %4929 = vmatmul.mubr.msk.bf16.vlgmr.msra.gmra.mrb[16].mxu0 %vm538_vm12, %v893_v1 }
 0x45a   :  { %4940 = vmatprep.mubr.msk.bf16.mxu0 %vm6009_vm0, %v6008_v0  ;;  %4939 = vmatpush3.bf16.msra.mxu0 %v6465_v3 }
 0x45b   :  { %4950 = vmatprep.subr.bf16.mxu0 %v6008_v0 }
 0x52c   :  { %v947_v6 = vpop.f32.mrb[16].mxu0 }
 0x52d   :  { %v948_v8 = vadd.f32 %v947_v6, %v6470_v5  ;;  %v4930_v10 = vpop.f32.mrb[17].mxu0  ;;  %v5369_v6 = vld [vmem:[#allocation15 + $0x38] sm:$0xff]  }
 0x52e   :  { %v950_v11 = vpop.f32.mrb[18].mxu0  ;;  %v6512_v10 = vld [vmem:[#allocation26] ss:$0 sm:$0xff] }
 0x52f   :  { %v954_v14 = vpack.c.bf16 %v948_v8, %v948_v8  ;;  %v951_v15 = vadd.f32 %v950_v11, %v6473_v7  ;;  %v4931_v16 = vpop.f32.mrb[19].mxu0  ;;  %v5370_v8 = vld [vmem:[#allocation15 + $0x48] sm:$0xff]  }
 0x531   :  { %v955_v17 = vpack.c.bf16 %v951_v15, %v951_v15  ;;  %4935 = vmatmul.mubr.msk.bf16.vlgmr.msra.gmra.mrb[16].mxu1 %vm371_vm4, %v954_v14 }
 0x532   :  { %4946 = vmatprep.mubr.msk.bf16.mxu1 %vm6009_vm0, %v6008_v0  ;;  %4945 = vmatpush3.bf16.msra.mxu1 %v6488_v40 }
 0x533   :  { %4941 = vmatmul.mubr.msk.bf16.vlgmr.msra.gmra.mrb[20].mxu0 %vm371_vm4, %v955_v17  ;;  %4956 = vmatprep.subr.bf16.mxu1 %v6008_v0 }
 0x534   :  { %4952 = vmatprep.mubr.msk.bf16.mxu0 %vm6009_vm0, %v6008_v0  ;;  %4951 = vmatpush3.bf16.msra.mxu0 %v6493_v42 }
 0x535   :  { %4962 = vmatprep.subr.bf16.mxu0 %v6008_v0 }
 0x604   :  { %v996_v12 = vpop.f32.mrb[16].mxu1 }
 0x605   :  { %v4936_v13 = vpop.f32.mrb[17].mxu1  ;;  %v1048_v18 = vsel %vm371_vm4, %v996_v12, -inf }
 0x606   :  { %1049 = vmax.xlane.f32.xlu0 %v1048_v18  ;;  %v999_v19 = vpop.f32.mrb[18].mxu1  ;;  %v1042_v20 = vpop.f32.mrb[20].mxu0 }
 0x607   :  { %v4937_v21 = vpop.f32.mrb[19].mxu1  ;;  %v4942_v22 = vpop.f32.mrb[21].mxu0  ;;  %v1051_v26 = vsel %vm371_vm4, %v1042_v20, -inf }
 0x608   :  { %v1045_v24 = vpop.f32.mrb[22].mxu0 }
 0x609   :  { %v4943_v25 = vpop.f32.mrb[23].mxu0 }
 0x60a   :  { %1052 = vmax.xlane.f32.xlu0 %v1051_v26 }
 0x693   :  { %v1050_v28 = vpop.xlane.xlu0 %1049 }
 0x694   :  { %v1054_v29 = vsub.f32 %v996_v12, %v1050_v28 }
 0x696   :  { %v1056_v30 = vmul.f32 1.442695, %v1054_v29 }
 0x697   :  { %v1053_v31 = vpop.xlane.xlu0 %1052 }
 0x698   :  { %5449 = vpow2.f32 %v1056_v30  ;;  %v1055_v32 = vsub.f32 %v1042_v20, %v1053_v31 }
 0x69a   :  { %v1058_v33 = vmul.f32 1.442695, %v1055_v32 }
 0x69c   :  { %5451 = vpow2.f32 %v1058_v33 }
 0x6a2   :  { %v5450_v34 = vpop.eup %5449 }
 0x6a3   :  { %v1060_v35 = vsel %vm371_vm4, %v5450_v34, 0.0 }
 0x6a4   :  { %1061 = vadd.xlane.f32.xlu1 %v1060_v35 }
 0x6a6   :  { %v5452_v36 = vpop.eup %5451 }
 0x6a7   :  { %v1063_v37 = vsel %vm371_vm4, %v5452_v36, 0.0 }
 0x6a8   :  { %1064 = vadd.xlane.f32.xlu1 %v1063_v37 }
 0x731   :  { %v1062_v43 = vpop.xlane.xlu1 %1061 }
 0x732   :  { %5453 = vrcp.f32 %v1062_v43 }
 0x735   :  { %v1065_v44 = vpop.xlane.xlu1 %1064 }
 0x736   :  { %5455 = vrcp.f32 %v1065_v44 }
 0x73c   :  { %v5454_v45 = vpop.eup %5453 }
 0x73d   :  { %v1068_v47 = vmul.f32 %v5454_v45, %v5450_v34 }
 0x73f   :  { %v1070_v48 = vpack.c.bf16 %v1068_v47, %v1068_v47 }
 0x740   :  { %v5456_v50 = vpop.eup %5455 }
 0x741   :  { %v1069_v51 = vmul.f32 %v5456_v50, %v5452_v36  ;;  %4947 = vmatmul.mubr.msk.bf16.vlgmr.msra.gmra.mrb[20].mxu1 %vm371_vm4, %v1070_v48  ;;  %v5377_v50 = vld [vmem:[#allocation18 + $0x48] sm:$0xff]  }
 0x742   :  { %4957 = vmatpush3.bf16.msra.mxu1 %v1177_v49  ;;  %4958 = vmatprep.mubr.msk.bf16.mxu1 %vm6009_vm0, %v6008_v0 }
 0x743   :  { %v1071_v52 = vpack.c.bf16 %v1069_v51, %v1069_v51  ;;  %4970 = vmatprep.subr.bf16.mxu1 %v6008_v0 }
 0x745   :  { %4953 = vmatmul.mubr.msk.bf16.vlgmr.msra.gmra.mrb[24].mxu0 %vm371_vm4, %v1071_v52 }
 0x746   :  { %4966 = vmatprep.mubr.msk.bf16.mxu0 %vm6009_vm0, %v6008_v0  ;;  %4963 = vmatpush3.bf16.msra.mxu0 %v5368_v4 }
 0x747   :  { %4964 = vmatprep.subr.bf16.mxu0 %v6008_v0 }
 0x74a   :  { %4965 = vmatpush3.bf16.msra.mxu0 %v5370_v8 }
 0x74b   :  { %4978 = vmatprep.subr.bf16.mxu0 %v6008_v0 }
 0x814   :  { %v1112_v53 = vpop.f32.mrb[20].mxu1 }
 0x815   :  { %v4948_v55 = vpop.f32.mrb[21].mxu1 }
 0x816   :  { %v1115_v56 = vpop.f32.mrb[22].mxu1 }
 0x817   :  { %v4949_v57 = vpop.f32.mrb[23].mxu1  ;;  %v5379_v56 = vld [vmem:[#allocation18 + $0x50] sm:$0xff]  }
 0x818   :  { %v1158_v58 = vpop.f32.mrb[24].mxu0  ;;  %v5378_v57 = vld [vmem:[#allocation15 + $0x58] sm:$0xff]  }
 0x819   :  { %v1164_v59 = vpack.c.bf16 %v1158_v58, %v1112_v53  ;;  %v4954_v60 = vpop.f32.mrb[25].mxu0  ;;  %v5376_v53 = vld [vmem:[#allocation15 + $0x50] sm:$0xff]  }
 0x81a   :  { %v1161_v62 = vpop.f32.mrb[26].mxu0  ;;  %v5381_v58 = vld [vmem:[#allocation18 + $0x58] sm:$0xff]  }
 0x81b   :  { %v4955_v1 = vpop.f32.mrb[27].mxu0  ;;  %4959 = vmatmul.mubr.msk.bf16.vlgmr.msra.gmra.mrb[24].mxu1 %vm371_vm4, %v1164_v59  ;;  %v5380_v59 = vld [vmem:[#allocation18 + $0x30] sm:$0xff]   ;;  %v5382_v62 = vld [vmem:[#allocation18 + $0x38] sm:$0xff]  }
 0x81c   :  { %4974 = vmatprep.mubr.msk.bf16.mxu1 %vm6009_vm0, %v6008_v0  ;;  %4971 = vmatpush3.bf16.msra.mxu1 %v5367_v2  ;;  %v5383_v1 = vld [vmem:[#allocation21] sm:$0xff]   ;;  %v5384_v2 = vld [vmem:[#allocation21 + $0x8] sm:$0xff]  }
 0x81d   :  { %4972 = vmatprep.subr.bf16.mxu1 %v6008_v0 }
 0x820   :  { %4973 = vmatpush3.bf16.msra.mxu1 %v5369_v6 }
 0x821   :  { %4986 = vmatprep.subr.bf16.mxu1 %v6008_v0 }
 0x8ee   :  { %v1213_v11 = vpop.f32.mrb[24].mxu1 }
 0x8ef   :  { %v1214_v14 = vadd.f32 %v6512_v10, %v1213_v11  ;;  %v4960_v15 = vpop.f32.mrb[25].mxu1 }
 0x8f0   :  { %v1216_v16 = vpop.f32.mrb[26].mxu1 }
 0x8f1   :  { %v1220_v17 = vadd.f32 %v1214_v14, %v6455_v61  ;;  %v1217_v12 = vadd.f32 %v6512_v10, %v1216_v16  ;;  %v4961_v13 = vpop.f32.mrb[27].mxu1 }
 0x8f3   :  { %v6518_v18 = vadd.f32 %v1220_v17, %v6393_v23  ;;  %v1221_v19 = vadd.f32 %v1217_v12, %v6457_v63 }
 0x8f5   :  { %v4692_v20 = vpack.c.bf16 %v6518_v18, %v6518_v18  ;;  %v6524_v21 = vadd.f32 %v1221_v19, %v6397_v27 }
 0x8f7   :  { %1232 = vst.msk [vmem:[#allocation2] sm:$0xf0] %vm444_vm6, %v4692_v20  ;;  %v4693_v22 = vpack.c.bf16 %v6524_v21, %v6524_v21  ;;  %v1224_v60 = vpack.c.bf16 %v6524_v21, %v6518_v18 }
 0x8f9   :  { %1233 = vst.msk [vmem:[#allocation2 + $0x8] sm:$0xf0] %vm444_vm6, %v4693_v22 }
 0x8fe   :  { %v1234_v61 = vld [vmem:[#allocation2] sm:$0xff] }
 0x8ff   :  { %v4514_v24 = vcombine.low %v1234_v61, %v1234_v61  ;;  %v4515_v25 = vcombine.high %v1234_v61, %v1234_v61 }
 0x900   :  { %v1235_v23 = vld [vmem:[#allocation2 + $0x8] sm:$0xff] }
 0x901   :  { %v4516_v26 = vcombine.low %v1235_v23, %v1235_v23  ;;  %v4517_v28 = vcombine.high %v1235_v23, %v1235_v23  ;;  %v4518_v63 = vrot.slane %v4514_v24, 11  ;;  %v1248_v29 = vrot.slane %v4515_v25, 7 }
 0x902   :  { %v1260_v30 = vshrl.u32 %v4515_v25, 16  ;;  %v1255_v27 = vshrl.u32 %v4514_v24, 16  ;;  %v1263_v34 = vshll.u32 %v4515_v25, 16 }
 0x903   :  { %v4519_v31 = vrot.slane %v4516_v26, 11  ;;  %v1252_v32 = vrot.slane %v4517_v28, 7  ;;  %v1268_v35 = vshrl.u32 %v4516_v26, 16  ;;  %v1273_v36 = vshrl.u32 %v4517_v28, 16 }
 0x904   :  { %v1262_v33 = vrot.slane %v1260_v30, 7  ;;  %v1249_v37 = vsel %vm6403_vm9, %v4518_v63, %v1248_v29  ;;  %v1276_v46 = vshll.u32 %v4517_v28, 16  ;;  %v4520_v47 = vrot.slane %v1255_v27, 11 }
 0x905   :  { %v1253_v39 = vsel %vm6403_vm9, %v4519_v31, %v1252_v32  ;;  %v1275_v45 = vrot.slane %v1273_v36, 7  ;;  %v4521_v48 = vrot.slane %v1268_v35, 11  ;;  %v4543_v35 = vld [vmem:[#allocation20 + $0x1] ss:$0 sm:$0xff] }
 0x906   :  { %v4526_v43 = vcombine.low %v1249_v37, %v1253_v39  ;;  %v1265_v44 = vor.u32 %v1263_v34, %v1262_v33 }
 0x907   :  { %v1278_v49 = vor.u32 %v1276_v46, %v1275_v45 }
 0x908   :  { %4975 = vmatmul.mubr.msk.bf16.vlgmr.msra.gmra.mrb[28].mxu1 %vm538_vm12, %v4526_v43  ;;  %v1266_v51 = vsel %vm6412_vm13, %v4520_v47, %v1265_v44 }
 0x909   :  { %4987 = vmatpush3.bf16.msra.mxu1 %v5375_v41  ;;  %4990 = vmatprep.mubr.msk.bf16.mxu1 %vm6009_vm0, %v6008_v0  ;;  %v1279_v52 = vsel %vm6412_vm13, %v4521_v48, %v1278_v49 }
 0x90a   :  { %4988 = vmatprep.subr.bf16.mxu1 %v6008_v0  ;;  %v4522_v55 = vcombine.low %v1266_v51, %v1279_v52  ;;  %v4533_v52 = vld [vmem:[#allocation17 + $0x1] ss:$0 sm:$0xff] }
 0x90c   :  { %4967 = vmatmul.mubr.msk.bf16.vlgmr.msra.gmra.mrb[28].mxu0 %vm538_vm12, %v4522_v55 }
 0x90d   :  { %4989 = vmatpush3.bf16.msra.mxu1 %v5377_v50  ;;  %4979 = vmatpush3.bf16.msra.mxu0 %v5376_v53 }
 0x90e   :  { %5002 = vmatprep.subr.bf16.mxu1 %v6008_v0  ;;  %4980 = vmatprep.subr.bf16.mxu0 %v6008_v0 }
 0x90f   :  { %4982 = vmatprep.mubr.msk.bf16.mxu0 %vm6009_vm0, %v6008_v0 }
 0x910   :  { %4991 = vmatmul.mubr.msk.bf16.vlgmr.msra.gmra.mrb[32].mxu1 %vm538_vm12, %v4522_v55 }
 0x911   :  { %5003 = vmatpush3.bf16.msra.mxu1 %v5379_v56  ;;  %5006 = vmatprep.mubr.msk.bf16.mxu1 %vm6009_vm0, %v6008_v0 }
 0x912   :  { %4981 = vmatpush3.bf16.msra.mxu0 %v5378_v57  ;;  %5004 = vmatprep.subr.bf16.mxu1 %v6008_v0 }
 0x913   :  { %4994 = vmatprep.subr.bf16.mxu0 %v6008_v0 }
 0x915   :  { %4983 = vmatmul.mubr.msk.bf16.vlgmr.msra.gmra.mrb[32].mxu0 %vm538_vm12, %v1224_v60  ;;  %5005 = vmatpush3.bf16.msra.mxu1 %v5381_v58 }
 0x916   :  { %4995 = vmatpush3.bf16.msra.mxu0 %v5380_v59  ;;  %4998 = vmatprep.mubr.msk.bf16.mxu0 %vm6009_vm0, %v6008_v0 }
 0x917   :  { %4996 = vmatprep.subr.bf16.mxu0 %v6008_v0  ;;  %5018 = vmatprep.subr.bf16.mxu1 %v6008_v0 }
 0x918   :  { %5007 = vmatmul.mubr.msk.bf16.vlgmr.msra.gmra.mrb[36].mxu1 %vm538_vm12, %v1224_v60 }
 0x919   :  { %5019 = vmatpush3.bf16.msra.mxu1 %v6451_v9  ;;  %5020 = vmatprep.mubr.msk.bf16.mxu1 %vm6009_vm0, %v6008_v0 }
 0x91a   :  { %4997 = vmatpush3.bf16.msra.mxu0 %v5382_v62  ;;  %5030 = vmatprep.subr.bf16.mxu1 %v6008_v0 }
 0x91b   :  { %5010 = vmatprep.subr.bf16.mxu0 %v6008_v0 }
 0x91d   :  { %4999 = vmatmul.mubr.msk.bf16.vlgmr.msra.gmra.mrb[36].mxu0 %vm538_vm12, %v4526_v43 }
 0x91e   :  { %5014 = vmatprep.mubr.msk.bf16.mxu0 %vm6009_vm0, %v6008_v0  ;;  %5011 = vmatpush3.bf16.msra.mxu0 %v5383_v1 }
 0x91f   :  { %5012 = vmatprep.subr.bf16.mxu0 %v6008_v0 }
 0x922   :  { %5013 = vmatpush3.bf16.msra.mxu0 %v5384_v2 }
 0x923   :  { %5024 = vmatprep.subr.bf16.mxu0 %v6008_v0 }
 0x9db   :  { %v1417_v4 = vpop.f32.mrb[28].mxu1 }
 0x9dc   :  { %v4976_v6 = vpop.f32.mrb[29].mxu1 }
 0x9dd   :  { %v1420_v8 = vpop.f32.mrb[30].mxu1 }
 0x9de   :  { %v4977_v11 = vpop.f32.mrb[31].mxu1 }
 0x9df   :  { %v1358_v14 = vpop.f32.mrb[28].mxu0 }
 0x9e0   :  { %v1418_v15 = vadd.f32 %v1417_v4, %v1358_v14  ;;  %v4968_v16 = vpop.f32.mrb[29].mxu0 }
 0x9e1   :  { %v1361_v17 = vpop.f32.mrb[30].mxu0 }
 0x9e2   :  { %v1421_v12 = vadd.f32 %v1420_v8, %v1361_v17  ;;  %v4969_v13 = vpop.f32.mrb[31].mxu0 }
 0x9e3   :  { %v1538_v19 = vpop.f32.mrb[32].mxu1 }
 0x9e4   :  { %v4992_v20 = vpop.f32.mrb[33].mxu1 }
 0x9e5   :  { %v1541_v22 = vpop.f32.mrb[34].mxu1 }
 0x9e6   :  { %v4993_v61 = vpop.f32.mrb[35].mxu1 }
 0x9e8   :  { %v1473_v24 = vpop.f32.mrb[32].mxu0 }
 0x9e9   :  { %v1480_v25 = vadd.f32 %v1473_v24, %v1418_v15  ;;  %v4984_v23 = vpop.f32.mrb[33].mxu0 }
 0x9ea   :  { %v1476_v26 = vpop.f32.mrb[34].mxu0 }
 0x9eb   :  { %v1481_v28 = vadd.f32 %v1476_v26, %v1421_v12  ;;  %v4985_v63 = vpop.f32.mrb[35].mxu0  ;;  %v1644_v29 = vpop.f32.mrb[36].mxu1  ;;  %v1490_v53 = vadd.f32 %v4533_v52, %v1480_v25 }
 0x9ec   :  { %v5008_v30 = vpop.f32.mrb[37].mxu1 }
 0x9ed   :  { %v1647_v31 = vpop.f32.mrb[38].mxu1  ;;  %v1491_v56 = vadd.f32 %v4533_v52, %v1481_v28 }
 0x9ee   :  { %v5009_v32 = vpop.f32.mrb[39].mxu1 }
 0x9f0   :  { %v1591_v27 = vpop.f32.mrb[36].mxu0 }
 0x9f1   :  { %v1592_v33 = vadd.f32 %v1591_v27, %v1538_v19  ;;  %v5000_v34 = vpop.f32.mrb[37].mxu0 }
 0x9f2   :  { %v1594_v36 = vpop.f32.mrb[38].mxu0 }
 0x9f3   :  { %v1651_v37 = vadd.f32 %v1644_v29, %v1592_v33  ;;  %v1595_v39 = vadd.f32 %v1594_v36, %v1541_v22  ;;  %v5001_v41 = vpop.f32.mrb[39].mxu0  ;;  %v1937_v36 = vld [vmem:[#allocation24] sm:$0xf] }
 0x9f5   :  { %v1661_v43 = vadd.f32 %v4543_v35, %v1651_v37  ;;  %v1652_v44 = vadd.f32 %v1647_v31, %v1595_v39 }
 0x9f7   :  { %v4544_v45 = vmul.f32 -1.442695, %v1661_v43  ;;  %v1662_v46 = vadd.f32 %v4543_v35, %v1652_v44  ;;  %v1949_v44 = vsel %vm375_vm3, %v1937_v36, 0 }
 0x9f9   :  { %5457 = vpow2.f32 %v4544_v45  ;;  %v4545_v47 = vmul.f32 -1.442695, %v1662_v46 }
 0x9fb   :  { %5459 = vpow2.f32 %v4545_v47 }
 0xa03   :  { %v5458_v48 = vpop.eup %5457 }
 0xa04   :  { %v1669_v49 = vadd.f32 1.0, %v5458_v48 }
 0xa05   :  { %v5460_v50 = vpop.eup %5459 }
 0xa06   :  { %5461 = vrcp.f32 %v1669_v49  ;;  %v1670_v51 = vadd.f32 1.0, %v5460_v50 }
 0xa08   :  { %5463 = vrcp.f32 %v1670_v51 }
 0xa10   :  { %v5462_v55 = vpop.eup %5461 }
 0xa11   :  { %v6570_v57 = vmul.f32 %v5462_v55, %v1490_v53 }
 0xa12   :  { %v5464_v58 = vpop.eup %5463 }
 0xa13   :  { %v6572_v59 = vmul.f32 %v5464_v58, %v1491_v56  ;;  %v5385_v56 = vld [vmem:[#allocation15 + $0x60] sm:$0xff]   ;;  %v5386_v58 = vld [vmem:[#allocation15 + $0x70] sm:$0xff]  }
 0xa15   :  { %v1677_v60 = vpack.c.bf16 %v6572_v59, %v6570_v57 }
 0xa17   :  { %5015 = vmatmul.mubr.msk.bf16.vlgmr.msra.gmra.mrb[40].mxu0 %vm538_vm12, %v1677_v60  ;;  %v5387_v60 = vld [vmem:[#allocation15 + $0x68] sm:$0xff]  }
 0xa18   :  { %5025 = vmatpush3.bf16.msra.mxu0 %v6465_v3  ;;  %5026 = vmatprep.mubr.msk.bf16.mxu0 %vm6009_vm0, %v6008_v0 }
 0xa19   :  { %5036 = vmatprep.subr.bf16.mxu0 %v6008_v0 }
 0xaea   :  { %v1731_v62 = vpop.f32.mrb[40].mxu0 }
 0xaeb   :  { %v1732_v1 = vadd.f32 %v1731_v62, %v6470_v5  ;;  %v5016_v2 = vpop.f32.mrb[41].mxu0  ;;  %v5388_v62 = vld [vmem:[#allocation15 + $0x78] sm:$0xff]  }
 0xaec   :  { %v1734_v4 = vpop.f32.mrb[42].mxu0 }
 0xaed   :  { %v1738_v6 = vpack.c.bf16 %v1732_v1, %v1732_v1  ;;  %v1735_v8 = vadd.f32 %v1734_v4, %v6473_v7  ;;  %v5017_v11 = vpop.f32.mrb[43].mxu0 }
 0xaef   :  { %v1739_v14 = vpack.c.bf16 %v1735_v8, %v1735_v8  ;;  %5021 = vmatmul.mubr.msk.bf16.vlgmr.msra.gmra.mrb[40].mxu1 %vm371_vm4, %v1738_v6 }
 0xaf0   :  { %5031 = vmatpush3.bf16.msra.mxu1 %v6488_v40  ;;  %5032 = vmatprep.mubr.msk.bf16.mxu1 %vm6009_vm0, %v6008_v0 }
 0xaf1   :  { %5027 = vmatmul.mubr.msk.bf16.vlgmr.msra.gmra.mrb[44].mxu0 %vm371_vm4, %v1739_v14  ;;  %5042 = vmatprep.subr.bf16.mxu1 %v6008_v0 }
 0xaf2   :  { %5037 = vmatpush3.bf16.msra.mxu0 %v6493_v42  ;;  %5038 = vmatprep.mubr.msk.bf16.mxu0 %vm6009_vm0, %v6008_v0 }
 0xaf3   :  { %5048 = vmatprep.subr.bf16.mxu0 %v6008_v0 }
 0xbc2   :  { %v1777_v15 = vpop.f32.mrb[40].mxu1 }
 0xbc3   :  { %v5022_v16 = vpop.f32.mrb[41].mxu1  ;;  %v1826_v17 = vsel %vm371_vm4, %v1777_v15, -inf }
 0xbc4   :  { %1827 = vmax.xlane.f32.xlu0 %v1826_v17  ;;  %v1780_v12 = vpop.f32.mrb[42].mxu1  ;;  %v1820_v13 = vpop.f32.mrb[44].mxu0 }
 0xbc5   :  { %v5023_v19 = vpop.f32.mrb[43].mxu1  ;;  %v5028_v20 = vpop.f32.mrb[45].mxu0  ;;  %v1829_v22 = vsel %vm371_vm4, %v1820_v13, -inf }
 0xbc6   :  { %1830 = vmax.xlane.f32.xlu1 %v1829_v22  ;;  %v1823_v61 = vpop.f32.mrb[46].mxu0 }
 0xbc7   :  { %v5029_v24 = vpop.f32.mrb[47].mxu0 }
 0xc51   :  { %v1828_v25 = vpop.xlane.xlu0 %1827 }
 0xc52   :  { %v1832_v23 = vsub.f32 %v1777_v15, %v1828_v25 }
 0xc53   :  { %v1831_v26 = vpop.xlane.xlu1 %1830 }
 0xc54   :  { %v1834_v28 = vmul.f32 1.442695, %v1832_v23  ;;  %v1833_v63 = vsub.f32 %v1820_v13, %v1831_v26 }
 0xc56   :  { %5465 = vpow2.f32 %v1834_v28  ;;  %v1836_v29 = vmul.f32 1.442695, %v1833_v63 }
 0xc58   :  { %5467 = vpow2.f32 %v1836_v29 }
 0xc60   :  { %v5466_v30 = vpop.eup %5465 }
 0xc61   :  { %v1838_v31 = vsel %vm371_vm4, %v5466_v30, 0.0 }
 0xc62   :  { %v5468_v32 = vpop.eup %5467  ;;  %1839 = vadd.xlane.f32.xlu0 %v1838_v31 }
 0xc63   :  { %v1841_v27 = vsel %vm371_vm4, %v5468_v32, 0.0 }
 0xc64   :  { %1842 = vadd.xlane.f32.xlu1 %v1841_v27  ;;  %v5393_v27 = vld [vmem:[#allocation18 + $0x70] sm:$0xff]  }
 0xcef   :  { %v1840_v33 = vpop.xlane.xlu0 %1839 }
 0xcf0   :  { %5469 = vrcp.f32 %v1840_v33 }
 0xcf1   :  { %v1843_v34 = vpop.xlane.xlu1 %1842 }
 0xcf2   :  { %5471 = vrcp.f32 %v1843_v34 }
 0xcfa   :  { %v5470_v35 = vpop.eup %5469 }
 0xcfb   :  { %v1846_v37 = vmul.f32 %v5470_v35, %v5466_v30 }
 0xcfc   :  { %v5472_v39 = vpop.eup %5471 }
 0xcfd   :  { %v1847_v41 = vmul.f32 %v5472_v39, %v5468_v32  ;;  %v1848_v43 = vpack.c.bf16 %v1846_v37, %v1846_v37 }
 0xcff   :  { %5033 = vmatmul.mubr.msk.bf16.vlgmr.msra.gmra.mrb[44].mxu1 %vm371_vm4, %v1848_v43  ;;  %v1849_v45 = vpack.c.bf16 %v1847_v41, %v1847_v41  ;;  %v5395_v43 = vld [vmem:[#allocation18 + $0x78] sm:$0xff]  }
 0xd00   :  { %5043 = vmatpush3.bf16.msra.mxu1 %v1949_v44  ;;  %5044 = vmatprep.mubr.msk.bf16.mxu1 %vm6009_vm0, %v6008_v0 }
 0xd01   :  { %5039 = vmatmul.mubr.msk.bf16.vlgmr.msra.gmra.mrb[48].mxu0 %vm371_vm4, %v1849_v45  ;;  %5056 = vmatprep.subr.bf16.mxu1 %v6008_v0 }
 0xd02   :  { %5052 = vmatprep.mubr.msk.bf16.mxu0 %vm6009_vm0, %v6008_v0  ;;  %5049 = vmatpush3.bf16.msra.mxu0 %v5386_v58 }
 0xd03   :  { %5050 = vmatprep.subr.bf16.mxu0 %v6008_v0 }
 0xd06   :  { %5051 = vmatpush3.bf16.msra.mxu0 %v5388_v62 }
 0xd07   :  { %5064 = vmatprep.subr.bf16.mxu0 %v6008_v0 }
 0xdd2   :  { %v1887_v46 = vpop.f32.mrb[44].mxu1 }
 0xdd3   :  { %v5034_v47 = vpop.f32.mrb[45].mxu1 }
 0xdd4   :  { %v1890_v48 = vpop.f32.mrb[46].mxu1  ;;  %v1930_v49 = vpop.f32.mrb[48].mxu0 }
 0xdd5   :  { %v1936_v50 = vpack.c.bf16 %v1930_v49, %v1887_v46  ;;  %v5035_v51 = vpop.f32.mrb[47].mxu1  ;;  %v5040_v52 = vpop.f32.mrb[49].mxu0  ;;  %v5394_v46 = vld [vmem:[#allocation15 + $0x80] sm:$0xff]   ;;  %v5397_v48 = vld [vmem:[#allocation18 + $0x80] sm:$0xff]   ;;  %v5396_v49 = vld [vmem:[#allocation15 + $0x88] sm:$0xff]  }
 0xdd6   :  { %v1933_v53 = vpop.f32.mrb[50].mxu0  ;;  %v5398_v51 = vld [vmem:[#allocation18 + $0x60] sm:$0xff]  }
 0xdd7   :  { %v5041_v55 = vpop.f32.mrb[51].mxu0  ;;  %5045 = vmatmul.mubr.msk.bf16.vlgmr.msra.gmra.mrb[48].mxu1 %vm371_vm4, %v1936_v50  ;;  %v5399_v50 = vld [vmem:[#allocation18 + $0x88] sm:$0xff]  }
 0xdd8   :  { %5060 = vmatprep.mubr.msk.bf16.mxu1 %vm6009_vm0, %v6008_v0  ;;  %5057 = vmatpush3.bf16.msra.mxu1 %v5385_v56  ;;  %v5400_v53 = vld [vmem:[#allocation18 + $0x68] sm:$0xff]   ;;  %v5401_v55 = vld [vmem:[#allocation21] sm:$0xff]   ;;  %v5402_v56 = vld [vmem:[#allocation21 + $0x8] sm:$0xff]  }
 0xdd9   :  { %5058 = vmatprep.subr.bf16.mxu1 %v6008_v0 }
 0xddc   :  { %5059 = vmatpush3.bf16.msra.mxu1 %v5387_v60 }
 0xddd   :  { %5072 = vmatprep.subr.bf16.mxu1 %v6008_v0 }
 0xeaa   :  { %v1985_v1 = vpop.f32.mrb[48].mxu1 }
 0xeab   :  { %v1986_v2 = vadd.f32 %v6512_v10, %v1985_v1  ;;  %v5046_v4 = vpop.f32.mrb[49].mxu1 }
 0xeac   :  { %v1988_v6 = vpop.f32.mrb[50].mxu1 }
 0xead   :  { %v1992_v8 = vadd.f32 %v1986_v2, %v6570_v57  ;;  %v1989_v11 = vadd.f32 %v6512_v10, %v1988_v6  ;;  %v5047_v14 = vpop.f32.mrb[51].mxu1 }
 0xeaf   :  { %v6616_v15 = vadd.f32 %v1992_v8, %v6518_v18  ;;  %v1993_v16 = vadd.f32 %v1989_v11, %v6572_v59 }
 0xeb1   :  { %v4694_v17 = vpack.c.bf16 %v6616_v15, %v6616_v15  ;;  %v6622_v12 = vadd.f32 %v1993_v16, %v6524_v21 }
 0xeb3   :  { %2004 = vst.msk [vmem:[#allocation2] sm:$0xf0] %vm444_vm6, %v4694_v17  ;;  %v4695_v13 = vpack.c.bf16 %v6622_v12, %v6622_v12  ;;  %v1996_v52 = vpack.c.bf16 %v6622_v12, %v6616_v15 }
 0xeb5   :  { %2005 = vst.msk [vmem:[#allocation2 + $0x8] sm:$0xf0] %vm444_vm6, %v4695_v13 }
 0xeba   :  { %v2006_v57 = vld [vmem:[#allocation2] sm:$0xff] }
 0xebb   :  { %v4557_v19 = vcombine.low %v2006_v57, %v2006_v57  ;;  %v4558_v20 = vcombine.high %v2006_v57, %v2006_v57 }
 0xebc   :  { %v2007_v18 = vld [vmem:[#allocation2 + $0x8] sm:$0xff] }
 0xebd   :  { %v4559_v22 = vcombine.low %v2007_v18, %v2007_v18  ;;  %v4560_v61 = vcombine.high %v2007_v18, %v2007_v18  ;;  %v4561_v59 = vrot.slane %v4557_v19, 11  ;;  %v2020_v24 = vrot.slane %v4558_v20, 7 }
 0xebe   :  { %v2032_v25 = vshrl.u32 %v4558_v20, 16  ;;  %v2027_v21 = vshrl.u32 %v4557_v19, 16  ;;  %v2035_v63 = vshll.u32 %v4558_v20, 16 }
 0xebf   :  { %v4562_v23 = vrot.slane %v4559_v22, 11  ;;  %v2024_v26 = vrot.slane %v4560_v61, 7  ;;  %v2040_v29 = vshrl.u32 %v4559_v22, 16  ;;  %v2045_v30 = vshrl.u32 %v4560_v61, 16 }
 0xec0   :  { %v2034_v28 = vrot.slane %v2032_v25, 7  ;;  %v2021_v31 = vsel %vm6403_vm9, %v4561_v59, %v2020_v24  ;;  %v2048_v36 = vshll.u32 %v4560_v61, 16  ;;  %v4563_v37 = vrot.slane %v2027_v21, 11 }
 0xec1   :  { %v2025_v32 = vsel %vm6403_vm9, %v4562_v23, %v2024_v26  ;;  %v2047_v35 = vrot.slane %v2045_v30, 7  ;;  %v4564_v39 = vrot.slane %v2040_v29, 11  ;;  %v4586_v29 = vld [vmem:[#allocation20 + $0x2] ss:$0 sm:$0xff] }
 0xec2   :  { %v4569_v33 = vcombine.low %v2021_v31, %v2025_v32  ;;  %v2037_v34 = vor.u32 %v2035_v63, %v2034_v28 }
 0xec3   :  { %v2050_v41 = vor.u32 %v2048_v36, %v2047_v35 }
 0xec4   :  { %5061 = vmatmul.mubr.msk.bf16.vlgmr.msra.gmra.mrb[52].mxu1 %vm538_vm12, %v4569_v33  ;;  %v2038_v44 = vsel %vm6412_vm13, %v4563_v37, %v2037_v34 }
 0xec5   :  { %5073 = vmatpush3.bf16.msra.mxu1 %v5393_v27  ;;  %5076 = vmatprep.mubr.msk.bf16.mxu1 %vm6009_vm0, %v6008_v0  ;;  %v2051_v45 = vsel %vm6412_vm13, %v4564_v39, %v2050_v41 }
 0xec6   :  { %5074 = vmatprep.subr.bf16.mxu1 %v6008_v0  ;;  %v4565_v47 = vcombine.low %v2038_v44, %v2051_v45  ;;  %v4576_v45 = vld [vmem:[#allocation17 + $0x2] ss:$0 sm:$0xff] }
 0xec8   :  { %5053 = vmatmul.mubr.msk.bf16.vlgmr.msra.gmra.mrb[52].mxu0 %vm538_vm12, %v4565_v47 }
 0xec9   :  { %5075 = vmatpush3.bf16.msra.mxu1 %v5395_v43  ;;  %5065 = vmatpush3.bf16.msra.mxu0 %v5394_v46 }
 0xeca   :  { %5088 = vmatprep.subr.bf16.mxu1 %v6008_v0  ;;  %5066 = vmatprep.subr.bf16.mxu0 %v6008_v0 }
 0xecb   :  { %5068 = vmatprep.mubr.msk.bf16.mxu0 %vm6009_vm0, %v6008_v0 }
 0xecc   :  { %5077 = vmatmul.mubr.msk.bf16.vlgmr.msra.gmra.mrb[56].mxu1 %vm538_vm12, %v4565_v47 }
 0xecd   :  { %5089 = vmatpush3.bf16.msra.mxu1 %v5397_v48  ;;  %5092 = vmatprep.mubr.msk.bf16.mxu1 %vm6009_vm0, %v6008_v0 }
 0xece   :  { %5067 = vmatpush3.bf16.msra.mxu0 %v5396_v49  ;;  %5090 = vmatprep.subr.bf16.mxu1 %v6008_v0 }
 0xecf   :  { %5080 = vmatprep.subr.bf16.mxu0 %v6008_v0 }
 0xed1   :  { %5069 = vmatmul.mubr.msk.bf16.vlgmr.msra.gmra.mrb[56].mxu0 %vm538_vm12, %v1996_v52  ;;  %5091 = vmatpush3.bf16.msra.mxu1 %v5399_v50 }
 0xed2   :  { %5081 = vmatpush3.bf16.msra.mxu0 %v5398_v51  ;;  %5084 = vmatprep.mubr.msk.bf16.mxu0 %vm6009_vm0, %v6008_v0 }
 0xed3   :  { %5082 = vmatprep.subr.bf16.mxu0 %v6008_v0  ;;  %5104 = vmatprep.subr.bf16.mxu1 %v6008_v0 }
 0xed4   :  { %5093 = vmatmul.mubr.msk.bf16.vlgmr.msra.gmra.mrb[60].mxu1 %vm538_vm12, %v1996_v52 }
 0xed5   :  { %5105 = vmatpush3.bf16.msra.mxu1 %v6451_v9  ;;  %5106 = vmatprep.mubr.msk.bf16.mxu1 %vm6009_vm0, %v6008_v0 }
 0xed6   :  { %5083 = vmatpush3.bf16.msra.mxu0 %v5400_v53  ;;  %5116 = vmatprep.subr.bf16.mxu1 %v6008_v0 }
 0xed7   :  { %5096 = vmatprep.subr.bf16.mxu0 %v6008_v0 }
 0xed9   :  { %5085 = vmatmul.mubr.msk.bf16.vlgmr.msra.gmra.mrb[60].mxu0 %vm538_vm12, %v4569_v33 }
 0xeda   :  { %5100 = vmatprep.mubr.msk.bf16.mxu0 %vm6009_vm0, %v6008_v0  ;;  %5097 = vmatpush3.bf16.msra.mxu0 %v5401_v55 }
 0xedb   :  { %5098 = vmatprep.subr.bf16.mxu0 %v6008_v0 }
 0xede   :  { %5099 = vmatpush3.bf16.msra.mxu0 %v5402_v56 }
 0xedf   :  { %5110 = vmatprep.subr.bf16.mxu0 %v6008_v0 }
 0xf97   :  { %v2189_v58 = vpop.f32.mrb[52].mxu1 }
 0xf98   :  { %v5062_v60 = vpop.f32.mrb[53].mxu1 }
 0xf99   :  { %v2192_v62 = vpop.f32.mrb[54].mxu1 }
 0xf9a   :  { %v5063_v1 = vpop.f32.mrb[55].mxu1 }
 0xf9b   :  { %v2130_v2 = vpop.f32.mrb[52].mxu0 }
 0xf9c   :  { %v2190_v4 = vadd.f32 %v2189_v58, %v2130_v2  ;;  %v5054_v6 = vpop.f32.mrb[53].mxu0 }
 0xf9d   :  { %v2133_v8 = vpop.f32.mrb[54].mxu0 }
 0xf9e   :  { %v2193_v11 = vadd.f32 %v2192_v62, %v2133_v8  ;;  %v5055_v14 = vpop.f32.mrb[55].mxu0 }
 0xf9f   :  { %v2310_v16 = vpop.f32.mrb[56].mxu1 }
 0xfa0   :  { %v5078_v17 = vpop.f32.mrb[57].mxu1 }
 0xfa1   :  { %v2313_v13 = vpop.f32.mrb[58].mxu1 }
 0xfa2   :  { %v5079_v57 = vpop.f32.mrb[59].mxu1 }
 0xfa4   :  { %v2245_v19 = vpop.f32.mrb[56].mxu0 }
 0xfa5   :  { %v2252_v20 = vadd.f32 %v2245_v19, %v2190_v4  ;;  %v5070_v18 = vpop.f32.mrb[57].mxu0 }
 0xfa6   :  { %v2248_v22 = vpop.f32.mrb[58].mxu0 }
 0xfa7   :  { %v2253_v61 = vadd.f32 %v2248_v22, %v2193_v11  ;;  %v5071_v59 = vpop.f32.mrb[59].mxu0  ;;  %v2416_v24 = vpop.f32.mrb[60].mxu1  ;;  %v2262_v46 = vadd.f32 %v4576_v45, %v2252_v20 }
 0xfa8   :  { %v5094_v25 = vpop.f32.mrb[61].mxu1 }
 0xfa9   :  { %v2419_v23 = vpop.f32.mrb[62].mxu1  ;;  %v2263_v48 = vadd.f32 %v4576_v45, %v2253_v61 }
 0xfaa   :  { %v5095_v26 = vpop.f32.mrb[63].mxu1 }
 0xfac   :  { %v2363_v21 = vpop.f32.mrb[60].mxu0 }
 0xfad   :  { %v2364_v28 = vadd.f32 %v2363_v21, %v2310_v16  ;;  %v5086_v63 = vpop.f32.mrb[61].mxu0 }
 0xfae   :  { %v2366_v30 = vpop.f32.mrb[62].mxu0 }
 0xfaf   :  { %v2423_v31 = vadd.f32 %v2416_v24, %v2364_v28  ;;  %v2367_v32 = vadd.f32 %v2366_v30, %v2313_v13  ;;  %v5087_v27 = vpop.f32.mrb[63].mxu0  ;;  %v2709_v30 = vld [vmem:[#allocation24] sm:$0xf] }
 0xfb1   :  { %v2433_v33 = vadd.f32 %v4586_v29, %v2423_v31  ;;  %v2424_v34 = vadd.f32 %v2419_v23, %v2367_v32 }
 0xfb3   :  { %v4587_v35 = vmul.f32 -1.442695, %v2433_v33  ;;  %v2434_v36 = vadd.f32 %v4586_v29, %v2424_v34  ;;  %v2721_v34 = vsel %vm375_vm3, %v2709_v30, 0 }
 0xfb5   :  { %5473 = vpow2.f32 %v4587_v35  ;;  %v4588_v37 = vmul.f32 -1.442695, %v2434_v36 }
 0xfb7   :  { %5475 = vpow2.f32 %v4588_v37 }
 0xfbf   :  { %v5474_v39 = vpop.eup %5473 }
 0xfc0   :  { %v2441_v41 = vadd.f32 1.0, %v5474_v39 }
 0xfc1   :  { %v5476_v43 = vpop.eup %5475 }
 0xfc2   :  { %5477 = vrcp.f32 %v2441_v41  ;;  %v2442_v44 = vadd.f32 1.0, %v5476_v43 }
 0xfc4   :  { %5479 = vrcp.f32 %v2442_v44 }
 0xfcc   :  { %v5478_v47 = vpop.eup %5477 }
 0xfcd   :  { %v6668_v49 = vmul.f32 %v5478_v47, %v2262_v46 }
 0xfce   :  { %v5480_v50 = vpop.eup %5479 }
 0xfcf   :  { %v6670_v51 = vmul.f32 %v5480_v50, %v2263_v48  ;;  %v5403_v48 = vld [vmem:[#allocation15 + $0x90] sm:$0xff]   ;;  %v5404_v50 = vld [vmem:[#allocation15 + $0xa0] sm:$0xff]  }
 0xfd1   :  { %v2449_v52 = vpack.c.bf16 %v6670_v51, %v6668_v49 }
 0xfd3   :  { %5101 = vmatmul.mubr.msk.bf16.vlgmr.msra.gmra.mrb[64].mxu0 %vm538_vm12, %v2449_v52  ;;  %v5405_v52 = vld [vmem:[#allocation15 + $0x98] sm:$0xff]  }
 0xfd4   :  { %5111 = vmatpush3.bf16.msra.mxu0 %v6465_v3  ;;  %5112 = vmatprep.mubr.msk.bf16.mxu0 %vm6009_vm0, %v6008_v0 }
 0xfd5   :  { %5122 = vmatprep.subr.bf16.mxu0 %v6008_v0 }
0x10a6   :  { %v2503_v53 = vpop.f32.mrb[64].mxu0 }
0x10a7   :  { %v2504_v55 = vadd.f32 %v2503_v53, %v6470_v5  ;;  %v5102_v56 = vpop.f32.mrb[65].mxu0  ;;  %v5406_v53 = vld [vmem:[#allocation15 + $0xa8] sm:$0xff]  }
0x10a8   :  { %v2506_v58 = vpop.f32.mrb[66].mxu0 }
0x10a9   :  { %v2510_v60 = vpack.c.bf16 %v2504_v55, %v2504_v55  ;;  %v2507_v62 = vadd.f32 %v2506_v58, %v6473_v7  ;;  %v5103_v1 = vpop.f32.mrb[67].mxu0 }
0x10ab   :  { %v2511_v2 = vpack.c.bf16 %v2507_v62, %v2507_v62  ;;  %5107 = vmatmul.mubr.msk.bf16.vlgmr.msra.gmra.mrb[64].mxu1 %vm371_vm4, %v2510_v60 }
0x10ac   :  { %5117 = vmatpush3.bf16.msra.mxu1 %v6488_v40  ;;  %5118 = vmatprep.mubr.msk.bf16.mxu1 %vm6009_vm0, %v6008_v0 }
0x10ad   :  { %5113 = vmatmul.mubr.msk.bf16.vlgmr.msra.gmra.mrb[68].mxu0 %vm371_vm4, %v2511_v2  ;;  %5128 = vmatprep.subr.bf16.mxu1 %v6008_v0 }
0x10ae   :  { %5123 = vmatpush3.bf16.msra.mxu0 %v6493_v42  ;;  %5124 = vmatprep.mubr.msk.bf16.mxu0 %vm6009_vm0, %v6008_v0 }
0x10af   :  { %5134 = vmatprep.subr.bf16.mxu0 %v6008_v0 }
0x117e   :  { %v2549_v4 = vpop.f32.mrb[64].mxu1 }
0x117f   :  { %v5108_v6 = vpop.f32.mrb[65].mxu1  ;;  %v2598_v8 = vsel %vm371_vm4, %v2549_v4, -inf }
0x1180   :  { %2599 = vmax.xlane.f32.xlu0 %v2598_v8  ;;  %v2552_v11 = vpop.f32.mrb[66].mxu1  ;;  %v2592_v14 = vpop.f32.mrb[68].mxu0 }
0x1181   :  { %v5109_v16 = vpop.f32.mrb[67].mxu1  ;;  %v5114_v17 = vpop.f32.mrb[69].mxu0  ;;  %v2601_v13 = vsel %vm371_vm4, %v2592_v14, -inf }
0x1182   :  { %2602 = vmax.xlane.f32.xlu1 %v2601_v13  ;;  %v2595_v57 = vpop.f32.mrb[70].mxu0 }
0x1183   :  { %v5115_v19 = vpop.f32.mrb[71].mxu0 }
0x120d   :  { %v2600_v20 = vpop.xlane.xlu0 %2599 }
0x120e   :  { %v2604_v18 = vsub.f32 %v2549_v4, %v2600_v20 }
0x120f   :  { %v2603_v22 = vpop.xlane.xlu1 %2602 }
0x1210   :  { %v2606_v61 = vmul.f32 1.442695, %v2604_v18  ;;  %v2605_v59 = vsub.f32 %v2592_v14, %v2603_v22 }
0x1212   :  { %5481 = vpow2.f32 %v2606_v61  ;;  %v2608_v24 = vmul.f32 1.442695, %v2605_v59 }
0x1214   :  { %5483 = vpow2.f32 %v2608_v24 }
0x121c   :  { %v5482_v25 = vpop.eup %5481 }
0x121d   :  { %v2610_v23 = vsel %vm371_vm4, %v5482_v25, 0.0 }
0x121e   :  { %v5484_v26 = vpop.eup %5483  ;;  %2611 = vadd.xlane.f32.xlu0 %v2610_v23 }
0x121f   :  { %v2613_v21 = vsel %vm371_vm4, %v5484_v26, 0.0 }
0x1220   :  { %2614 = vadd.xlane.f32.xlu1 %v2613_v21 }
0x12ab   :  { %v2612_v28 = vpop.xlane.xlu0 %2611 }
0x12ac   :  { %5485 = vrcp.f32 %v2612_v28 }
0x12ad   :  { %v2615_v63 = vpop.xlane.xlu1 %2614 }
0x12ae   :  { %5487 = vrcp.f32 %v2615_v63 }
0x12b6   :  { %v5486_v29 = vpop.eup %5485 }
0x12b7   :  { %v2618_v31 = vmul.f32 %v5486_v29, %v5482_v25 }
0x12b8   :  { %v5488_v32 = vpop.eup %5487 }
0x12b9   :  { %v2619_v27 = vmul.f32 %v5488_v32, %v5484_v26  ;;  %v2620_v33 = vpack.c.bf16 %v2618_v31, %v2618_v31  ;;  %v5411_v26 = vld [vmem:[#allocation18 + $0xa0] sm:$0xff]  }
0x12bb   :  { %5119 = vmatmul.mubr.msk.bf16.vlgmr.msra.gmra.mrb[68].mxu1 %vm371_vm4, %v2620_v33  ;;  %v2621_v35 = vpack.c.bf16 %v2619_v27, %v2619_v27  ;;  %v5413_v27 = vld [vmem:[#allocation18 + $0xa8] sm:$0xff]  }
0x12bc   :  { %5129 = vmatpush3.bf16.msra.mxu1 %v2721_v34  ;;  %5130 = vmatprep.mubr.msk.bf16.mxu1 %vm6009_vm0, %v6008_v0 }
0x12bd   :  { %5125 = vmatmul.mubr.msk.bf16.vlgmr.msra.gmra.mrb[72].mxu0 %vm371_vm4, %v2621_v35  ;;  %5142 = vmatprep.subr.bf16.mxu1 %v6008_v0  ;;  %v5412_v35 = vld [vmem:[#allocation15 + $0xb0] sm:$0xff]  }
0x12be   :  { %5138 = vmatprep.mubr.msk.bf16.mxu0 %vm6009_vm0, %v6008_v0  ;;  %5135 = vmatpush3.bf16.msra.mxu0 %v5404_v50 }
0x12bf   :  { %5136 = vmatprep.subr.bf16.mxu0 %v6008_v0 }
0x12c2   :  { %5137 = vmatpush3.bf16.msra.mxu0 %v5406_v53 }
0x12c3   :  { %5150 = vmatprep.subr.bf16.mxu0 %v6008_v0 }
0x138e   :  { %v2659_v36 = vpop.f32.mrb[68].mxu1 }
0x138f   :  { %v5120_v37 = vpop.f32.mrb[69].mxu1 }
0x1390   :  { %v2662_v39 = vpop.f32.mrb[70].mxu1  ;;  %v2702_v41 = vpop.f32.mrb[72].mxu0  ;;  %v5415_v37 = vld [vmem:[#allocation18 + $0xb0] sm:$0xff]  }
0x1391   :  { %v2708_v43 = vpack.c.bf16 %v2702_v41, %v2659_v36  ;;  %v5121_v44 = vpop.f32.mrb[71].mxu1  ;;  %v5126_v45 = vpop.f32.mrb[73].mxu0  ;;  %v5414_v39 = vld [vmem:[#allocation15 + $0xb8] sm:$0xff]   ;;  %v5417_v41 = vld [vmem:[#allocation18 + $0xb8] sm:$0xff]  }
0x1392   :  { %v2705_v46 = vpop.f32.mrb[74].mxu0  ;;  %v5418_v45 = vld [vmem:[#allocation18 + $0x98] sm:$0xff]  }
0x1393   :  { %v5127_v47 = vpop.f32.mrb[75].mxu0  ;;  %5131 = vmatmul.mubr.msk.bf16.vlgmr.msra.gmra.mrb[72].mxu1 %vm371_vm4, %v2708_v43  ;;  %v5416_v43 = vld [vmem:[#allocation18 + $0x90] sm:$0xff]  }
0x1394   :  { %5146 = vmatprep.mubr.msk.bf16.mxu1 %vm6009_vm0, %v6008_v0  ;;  %5143 = vmatpush3.bf16.msra.mxu1 %v5403_v48  ;;  %v5419_v46 = vld [vmem:[#allocation21] sm:$0xff]   ;;  %v5420_v47 = vld [vmem:[#allocation21 + $0x8] sm:$0xff]  }
0x1395   :  { %5144 = vmatprep.subr.bf16.mxu1 %v6008_v0 }
0x1398   :  { %5145 = vmatpush3.bf16.msra.mxu1 %v5405_v52 }
0x1399   :  { %5158 = vmatprep.subr.bf16.mxu1 %v6008_v0 }
0x1466   :  { %v2757_v55 = vpop.f32.mrb[72].mxu1 }
0x1467   :  { %v2758_v56 = vadd.f32 %v6512_v10, %v2757_v55  ;;  %v5132_v58 = vpop.f32.mrb[73].mxu1 }
0x1468   :  { %v2760_v60 = vpop.f32.mrb[74].mxu1 }
0x1469   :  { %v2764_v62 = vadd.f32 %v2758_v56, %v6668_v49  ;;  %v2761_v1 = vadd.f32 %v6512_v10, %v2760_v60  ;;  %v5133_v2 = vpop.f32.mrb[75].mxu1 }
0x146b   :  { %v6714_v4 = vadd.f32 %v2764_v62, %v6616_v15  ;;  %v2765_v6 = vadd.f32 %v2761_v1, %v6670_v51 }
0x146d   :  { %v4696_v8 = vpack.c.bf16 %v6714_v4, %v6714_v4  ;;  %v6720_v11 = vadd.f32 %v2765_v6, %v6622_v12 }
0x146f   :  { %2776 = vst.msk [vmem:[#allocation2] sm:$0xf0] %vm444_vm6, %v4696_v8  ;;  %v4697_v14 = vpack.c.bf16 %v6720_v11, %v6720_v11  ;;  %v2768_v44 = vpack.c.bf16 %v6720_v11, %v6714_v4 }
0x1471   :  { %2777 = vst.msk [vmem:[#allocation2 + $0x8] sm:$0xf0] %vm444_vm6, %v4697_v14 }
0x1476   :  { %v2778_v10 = vld [vmem:[#allocation2] sm:$0xff] }
0x1477   :  { %v4600_v49 = vcombine.low %v2778_v10, %v2778_v10  ;;  %v4601_v16 = vcombine.high %v2778_v10, %v2778_v10 }
0x1478   :  { %v2779_v15 = vld [vmem:[#allocation2 + $0x8] sm:$0xff] }
0x1479   :  { %v4602_v17 = vcombine.low %v2779_v15, %v2779_v15  ;;  %v4603_v13 = vcombine.high %v2779_v15, %v2779_v15  ;;  %v4604_v51 = vrot.slane %v4600_v49, 11  ;;  %v2792_v57 = vrot.slane %v4601_v16, 7 }
0x147a   :  { %v2804_v19 = vshrl.u32 %v4601_v16, 16  ;;  %v2799_v12 = vshrl.u32 %v4600_v49, 16  ;;  %v2807_v61 = vshll.u32 %v4601_v16, 16 }
0x147b   :  { %v4605_v20 = vrot.slane %v4602_v17, 11  ;;  %v2796_v18 = vrot.slane %v4603_v13, 7  ;;  %v2812_v59 = vshrl.u32 %v4602_v17, 16  ;;  %v2817_v24 = vshrl.u32 %v4603_v13, 16 }
0x147c   :  { %v2806_v22 = vrot.slane %v2804_v19, 7  ;;  %v2793_v25 = vsel %vm6403_vm9, %v4604_v51, %v2792_v57  ;;  %v2820_v29 = vshll.u32 %v4603_v13, 16  ;;  %v4606_v30 = vrot.slane %v2799_v12, 11 }
0x147d   :  { %v2797_v23 = vsel %vm6403_vm9, %v4605_v20, %v2796_v18  ;;  %v2819_v63 = vrot.slane %v2817_v24, 7  ;;  %v4607_v31 = vrot.slane %v2812_v59, 11 }
0x147e   :  { %v4612_v21 = vcombine.low %v2793_v25, %v2797_v23  ;;  %v2809_v28 = vor.u32 %v2807_v61, %v2806_v22  ;;  %v4629_v61 = vld [vmem:[#allocation20 + $0x3] ss:$0 sm:$0xff] }
0x147f   :  { %v2822_v32 = vor.u32 %v2820_v29, %v2819_v63 }
0x1480   :  { %5147 = vmatmul.mubr.msk.bf16.vlgmr.msra.gmra.mrb[76].mxu1 %vm538_vm12, %v4612_v21  ;;  %v2810_v33 = vsel %vm6412_vm13, %v4606_v30, %v2809_v28 }
0x1481   :  { %5159 = vmatpush3.bf16.msra.mxu1 %v5411_v26  ;;  %5162 = vmatprep.mubr.msk.bf16.mxu1 %vm6009_vm0, %v6008_v0  ;;  %v2823_v34 = vsel %vm6412_vm13, %v4607_v31, %v2822_v32 }
0x1482   :  { %5160 = vmatprep.subr.bf16.mxu1 %v6008_v0  ;;  %v4608_v36 = vcombine.low %v2810_v33, %v2823_v34  ;;  %v4619_v33 = vld [vmem:[#allocation17 + $0x3] ss:$0 sm:$0xff] }
0x1484   :  { %5139 = vmatmul.mubr.msk.bf16.vlgmr.msra.gmra.mrb[76].mxu0 %vm538_vm12, %v4608_v36 }
0x1485   :  { %5161 = vmatpush3.bf16.msra.mxu1 %v5413_v27  ;;  %5151 = vmatpush3.bf16.msra.mxu0 %v5412_v35 }
0x1486   :  { %5174 = vmatprep.subr.bf16.mxu1 %v6008_v0  ;;  %5152 = vmatprep.subr.bf16.mxu0 %v6008_v0 }
0x1487   :  { %5154 = vmatprep.mubr.msk.bf16.mxu0 %vm6009_vm0, %v6008_v0 }
0x1488   :  { %5163 = vmatmul.mubr.msk.bf16.vlgmr.msra.gmra.mrb[80].mxu1 %vm538_vm12, %v4608_v36 }
0x1489   :  { %5175 = vmatpush3.bf16.msra.mxu1 %v5415_v37  ;;  %5178 = vmatprep.mubr.msk.bf16.mxu1 %vm6009_vm0, %v6008_v0 }
0x148a   :  { %5153 = vmatpush3.bf16.msra.mxu0 %v5414_v39  ;;  %5176 = vmatprep.subr.bf16.mxu1 %v6008_v0 }
0x148b   :  { %5166 = vmatprep.subr.bf16.mxu0 %v6008_v0 }
0x148d   :  { %5155 = vmatmul.mubr.msk.bf16.vlgmr.msra.gmra.mrb[80].mxu0 %vm538_vm12, %v2768_v44  ;;  %5177 = vmatpush3.bf16.msra.mxu1 %v5417_v41 }
0x148e   :  { %5167 = vmatpush3.bf16.msra.mxu0 %v5416_v43  ;;  %5170 = vmatprep.mubr.msk.bf16.mxu0 %vm6009_vm0, %v6008_v0 }
0x148f   :  { %5168 = vmatprep.subr.bf16.mxu0 %v6008_v0  ;;  %5190 = vmatprep.subr.bf16.mxu1 %v6008_v0 }
0x1490   :  { %5179 = vmatmul.mubr.msk.bf16.vlgmr.msra.gmra.mrb[84].mxu1 %vm538_vm12, %v2768_v44 }
0x1491   :  { %5191 = vmatpush3.bf16.msra.mxu1 %v6451_v9  ;;  %5192 = vmatprep.mubr.msk.bf16.mxu1 %vm6009_vm0, %v6008_v0 }
0x1492   :  { %5169 = vmatpush3.bf16.msra.mxu0 %v5418_v45  ;;  %5202 = vmatprep.subr.bf16.mxu1 %v6008_v0 }
0x1493   :  { %5182 = vmatprep.subr.bf16.mxu0 %v6008_v0 }
0x1495   :  { %5171 = vmatmul.mubr.msk.bf16.vlgmr.msra.gmra.mrb[84].mxu0 %vm538_vm12, %v4612_v21 }
0x1496   :  { %5186 = vmatprep.mubr.msk.bf16.mxu0 %vm6009_vm0, %v6008_v0  ;;  %5183 = vmatpush3.bf16.msra.mxu0 %v5419_v46 }
0x1497   :  { %5184 = vmatprep.subr.bf16.mxu0 %v6008_v0 }
0x149a   :  { %5185 = vmatpush3.bf16.msra.mxu0 %v5420_v47 }
0x149b   :  { %5196 = vmatprep.subr.bf16.mxu0 %v6008_v0 }
0x1553   :  { %v2961_v48 = vpop.f32.mrb[76].mxu1 }
0x1554   :  { %v5148_v50 = vpop.f32.mrb[77].mxu1 }
0x1555   :  { %v2964_v52 = vpop.f32.mrb[78].mxu1 }
0x1556   :  { %v5149_v53 = vpop.f32.mrb[79].mxu1 }
0x1557   :  { %v2902_v55 = vpop.f32.mrb[76].mxu0 }
0x1558   :  { %v2962_v56 = vadd.f32 %v2961_v48, %v2902_v55  ;;  %v5140_v58 = vpop.f32.mrb[77].mxu0 }
0x1559   :  { %v2905_v60 = vpop.f32.mrb[78].mxu0 }
0x155a   :  { %v2965_v62 = vadd.f32 %v2964_v52, %v2905_v60  ;;  %v5141_v1 = vpop.f32.mrb[79].mxu0 }
0x155b   :  { %v3082_v2 = vpop.f32.mrb[80].mxu1 }
0x155c   :  { %v5164_v6 = vpop.f32.mrb[81].mxu1 }
0x155d   :  { %v3085_v8 = vpop.f32.mrb[82].mxu1 }
0x155e   :  { %v5165_v14 = vpop.f32.mrb[83].mxu1 }
0x1560   :  { %v3017_v10 = vpop.f32.mrb[80].mxu0 }
0x1561   :  { %v3024_v49 = vadd.f32 %v3017_v10, %v2962_v56  ;;  %v5156_v16 = vpop.f32.mrb[81].mxu0 }
0x1562   :  { %v3020_v15 = vpop.f32.mrb[82].mxu0 }
0x1563   :  { %v3025_v17 = vadd.f32 %v3020_v15, %v2965_v62  ;;  %v5157_v13 = vpop.f32.mrb[83].mxu0  ;;  %v3188_v51 = vpop.f32.mrb[84].mxu1  ;;  %v3034_v34 = vadd.f32 %v4619_v33, %v3024_v49 }
0x1564   :  { %v5180_v57 = vpop.f32.mrb[85].mxu1 }
0x1565   :  { %v3191_v19 = vpop.f32.mrb[86].mxu1  ;;  %v3035_v36 = vadd.f32 %v4619_v33, %v3025_v17 }
0x1566   :  { %v5181_v20 = vpop.f32.mrb[87].mxu1 }
0x1568   :  { %v3135_v18 = vpop.f32.mrb[84].mxu0 }
0x1569   :  { %v3136_v12 = vadd.f32 %v3135_v18, %v3082_v2  ;;  %v5172_v22 = vpop.f32.mrb[85].mxu0 }
0x156a   :  { %v3138_v59 = vpop.f32.mrb[86].mxu0 }
0x156b   :  { %v3195_v24 = vadd.f32 %v3188_v51, %v3136_v12  ;;  %v3139_v25 = vadd.f32 %v3138_v59, %v3085_v8  ;;  %v5173_v23 = vpop.f32.mrb[87].mxu0 }
0x156d   :  { %v3205_v26 = vadd.f32 %v4629_v61, %v3195_v24  ;;  %v3196_v21 = vadd.f32 %v3191_v19, %v3139_v25 }
0x156f   :  { %v4630_v28 = vmul.f32 -1.442695, %v3205_v26  ;;  %v3206_v63 = vadd.f32 %v4629_v61, %v3196_v21  ;;  %v3481_v61 = vld [vmem:[#allocation24] sm:$0xf] }
0x1570   :  { %v3493_v26 = vsel %vm375_vm3, %v3481_v61, 0 }
0x1571   :  { %5489 = vpow2.f32 %v4630_v28  ;;  %v4631_v29 = vmul.f32 -1.442695, %v3206_v63 }
0x1573   :  { %5491 = vpow2.f32 %v4631_v29 }
0x157b   :  { %v5490_v30 = vpop.eup %5489 }
0x157c   :  { %v3213_v31 = vadd.f32 1.0, %v5490_v30 }
0x157d   :  { %v5492_v32 = vpop.eup %5491 }
0x157e   :  { %5493 = vrcp.f32 %v3213_v31  ;;  %v3214_v27 = vadd.f32 1.0, %v5492_v32 }
0x1580   :  { %5495 = vrcp.f32 %v3214_v27 }
0x1588   :  { %v5494_v35 = vpop.eup %5493 }
0x1589   :  { %v6766_v37 = vmul.f32 %v5494_v35, %v3034_v34  ;;  %v5421_v35 = vld [vmem:[#allocation15 + $0xc0] sm:$0xff]  }
0x158a   :  { %v5496_v39 = vpop.eup %5495 }
0x158b   :  { %v6768_v41 = vmul.f32 %v5496_v39, %v3035_v36  ;;  %v5422_v36 = vld [vmem:[#allocation15 + $0xd0] sm:$0xff]   ;;  %v5423_v39 = vld [vmem:[#allocation15 + $0xc8] sm:$0xff]  }
0x158d   :  { %v3221_v43 = vpack.c.bf16 %v6768_v41, %v6766_v37 }
0x158f   :  { %5187 = vmatmul.mubr.msk.bf16.vlgmr.msra.gmra.mrb[88].mxu0 %vm538_vm12, %v3221_v43  ;;  %v5424_v43 = vld [vmem:[#allocation15 + $0xd8] sm:$0xff]  }
0x1590   :  { %5197 = vmatpush3.bf16.msra.mxu0 %v6465_v3  ;;  %5198 = vmatprep.mubr.msk.bf16.mxu0 %vm6009_vm0, %v6008_v0 }
0x1591   :  { %5208 = vmatprep.subr.bf16.mxu0 %v6008_v0 }
0x1662   :  { %v3275_v44 = vpop.f32.mrb[88].mxu0 }
0x1663   :  { %v3276_v45 = vadd.f32 %v3275_v44, %v6470_v5  ;;  %v5188_v46 = vpop.f32.mrb[89].mxu0  ;;  %v6808_v44 = vld [vmem:[#allocation26] ss:$0 sm:$0xff] }
0x1664   :  { %v3278_v47 = vpop.f32.mrb[90].mxu0 }
0x1665   :  { %v3282_v48 = vpack.c.bf16 %v3276_v45, %v3276_v45  ;;  %v3279_v50 = vadd.f32 %v3278_v47, %v6473_v7  ;;  %v5189_v52 = vpop.f32.mrb[91].mxu0 }
0x1667   :  { %v3283_v53 = vpack.c.bf16 %v3279_v50, %v3279_v50  ;;  %5193 = vmatmul.mubr.msk.bf16.vlgmr.msra.gmra.mrb[88].mxu1 %vm371_vm4, %v3282_v48 }
0x1668   :  { %5203 = vmatpush3.bf16.msra.mxu1 %v6488_v40  ;;  %5204 = vmatprep.mubr.msk.bf16.mxu1 %vm6009_vm0, %v6008_v0 }
0x1669   :  { %5199 = vmatmul.mubr.msk.bf16.vlgmr.msra.gmra.mrb[92].mxu0 %vm371_vm4, %v3283_v53  ;;  %5214 = vmatprep.subr.bf16.mxu1 %v6008_v0 }
0x166a   :  { %5209 = vmatpush3.bf16.msra.mxu0 %v6493_v42  ;;  %5210 = vmatprep.mubr.msk.bf16.mxu0 %vm6009_vm0, %v6008_v0 }
0x166b   :  { %5220 = vmatprep.subr.bf16.mxu0 %v6008_v0 }
0x173a   :  { %v3321_v55 = vpop.f32.mrb[88].mxu1 }
0x173b   :  { %v5194_v56 = vpop.f32.mrb[89].mxu1  ;;  %v3370_v58 = vsel %vm371_vm4, %v3321_v55, -inf }
0x173c   :  { %3371 = vmax.xlane.f32.xlu0 %v3370_v58  ;;  %v3324_v60 = vpop.f32.mrb[90].mxu1  ;;  %v3364_v62 = vpop.f32.mrb[92].mxu0 }
0x173d   :  { %v5195_v1 = vpop.f32.mrb[91].mxu1  ;;  %v5200_v2 = vpop.f32.mrb[93].mxu0  ;;  %v3373_v6 = vsel %vm371_vm4, %v3364_v62, -inf }
0x173e   :  { %3374 = vmax.xlane.f32.xlu1 %v3373_v6  ;;  %v3367_v8 = vpop.f32.mrb[94].mxu0 }
0x173f   :  { %v5201_v14 = vpop.f32.mrb[95].mxu0 }
0x17c9   :  { %v3372_v10 = vpop.xlane.xlu0 %3371 }
0x17ca   :  { %v3376_v49 = vsub.f32 %v3321_v55, %v3372_v10 }
0x17cb   :  { %v3375_v16 = vpop.xlane.xlu1 %3374 }
0x17cc   :  { %v3378_v15 = vmul.f32 1.442695, %v3376_v49  ;;  %v3377_v17 = vsub.f32 %v3364_v62, %v3375_v16 }
0x17ce   :  { %5497 = vpow2.f32 %v3378_v15  ;;  %v3380_v13 = vmul.f32 1.442695, %v3377_v17 }
0x17d0   :  { %5499 = vpow2.f32 %v3380_v13 }
0x17d8   :  { %v5498_v51 = vpop.eup %5497 }
0x17d9   :  { %v3382_v57 = vsel %vm371_vm4, %v5498_v51, 0.0 }
0x17da   :  { %v5500_v19 = vpop.eup %5499  ;;  %3383 = vadd.xlane.f32.xlu0 %v3382_v57 }
0x17db   :  { %v3385_v20 = vsel %vm371_vm4, %v5500_v19, 0.0 }
0x17dc   :  { %3386 = vadd.xlane.f32.xlu1 %v3385_v20  ;;  %v5429_v20 = vld [vmem:[#allocation18 + $0xd0] sm:$0xff]  }
0x1867   :  { %v3384_v18 = vpop.xlane.xlu0 %3383 }
0x1868   :  { %5501 = vrcp.f32 %v3384_v18 }
0x1869   :  { %v3387_v12 = vpop.xlane.xlu1 %3386 }
0x186a   :  { %5503 = vrcp.f32 %v3387_v12 }
0x1872   :  { %v5502_v22 = vpop.eup %5501 }
0x1873   :  { %v3390_v59 = vmul.f32 %v5502_v22, %v5498_v51 }
0x1874   :  { %v5504_v24 = vpop.eup %5503 }
0x1875   :  { %v3391_v25 = vmul.f32 %v5504_v24, %v5500_v19  ;;  %v3392_v23 = vpack.c.bf16 %v3390_v59, %v3390_v59 }
0x1877   :  { %5205 = vmatmul.mubr.msk.bf16.vlgmr.msra.gmra.mrb[92].mxu1 %vm371_vm4, %v3392_v23  ;;  %v3393_v21 = vpack.c.bf16 %v3391_v25, %v3391_v25  ;;  %v5431_v23 = vld [vmem:[#allocation18 + $0xd8] sm:$0xff]  }
0x1878   :  { %5215 = vmatpush3.bf16.msra.mxu1 %v3493_v26  ;;  %5216 = vmatprep.mubr.msk.bf16.mxu1 %vm6009_vm0, %v6008_v0 }
0x1879   :  { %5211 = vmatmul.mubr.msk.bf16.vlgmr.msra.gmra.mrb[96].mxu0 %vm371_vm4, %v3393_v21  ;;  %5228 = vmatprep.subr.bf16.mxu1 %v6008_v0  ;;  %v5430_v21 = vld [vmem:[#allocation15 + $0xe0] sm:$0xff]  }
0x187a   :  { %5224 = vmatprep.mubr.msk.bf16.mxu0 %vm6009_vm0, %v6008_v0  ;;  %5221 = vmatpush3.bf16.msra.mxu0 %v5422_v36 }
0x187b   :  { %5222 = vmatprep.subr.bf16.mxu0 %v6008_v0 }
0x187e   :  { %5223 = vmatpush3.bf16.msra.mxu0 %v5424_v43 }
0x187f   :  { %5236 = vmatprep.subr.bf16.mxu0 %v6008_v0 }
0x194a   :  { %v3431_v28 = vpop.f32.mrb[92].mxu1 }
0x194b   :  { %v5206_v63 = vpop.f32.mrb[93].mxu1 }
0x194c   :  { %v3434_v29 = vpop.f32.mrb[94].mxu1  ;;  %v3474_v30 = vpop.f32.mrb[96].mxu0  ;;  %v5433_v63 = vld [vmem:[#allocation18 + $0xe0] sm:$0xff]  }
0x194d   :  { %v3480_v31 = vpack.c.bf16 %v3474_v30, %v3431_v28  ;;  %v5207_v32 = vpop.f32.mrb[95].mxu1  ;;  %v5212_v27 = vpop.f32.mrb[97].mxu0  ;;  %v5432_v29 = vld [vmem:[#allocation15 + $0xe8] sm:$0xff]   ;;  %v5434_v30 = vld [vmem:[#allocation18 + $0xc0] sm:$0xff]  }
0x194e   :  { %v3477_v33 = vpop.f32.mrb[98].mxu0  ;;  %v5436_v32 = vld [vmem:[#allocation18 + $0xc8] sm:$0xff]   ;;  %v5437_v27 = vld [vmem:[#allocation21] sm:$0xff]  }
0x194f   :  { %v5213_v34 = vpop.f32.mrb[99].mxu0  ;;  %5217 = vmatmul.mubr.msk.bf16.vlgmr.msra.gmra.mrb[96].mxu1 %vm371_vm4, %v3480_v31  ;;  %v5438_v33 = vld [vmem:[#allocation21 + $0x8] sm:$0xff]  }
0x1950   :  { %5232 = vmatprep.mubr.msk.bf16.mxu1 %vm6009_vm0, %v6008_v0  ;;  %5229 = vmatpush3.bf16.msra.mxu1 %v5421_v35 }
0x1951   :  { %5230 = vmatprep.subr.bf16.mxu1 %v6008_v0 }
0x1954   :  { %5231 = vmatpush3.bf16.msra.mxu1 %v5423_v39 }
0x1955   :  { %5244 = vmatprep.subr.bf16.mxu1 %v6008_v0 }
0x1a22   :  { %v3529_v45 = vpop.f32.mrb[96].mxu1 }
0x1a23   :  { %v3530_v46 = vadd.f32 %v6808_v44, %v3529_v45  ;;  %v5218_v47 = vpop.f32.mrb[97].mxu1 }
0x1a24   :  { %v3532_v48 = vpop.f32.mrb[98].mxu1 }
0x1a25   :  { %v3536_v50 = vadd.f32 %v3530_v46, %v6766_v37  ;;  %v3533_v52 = vadd.f32 %v6808_v44, %v3532_v48  ;;  %v5219_v53 = vpop.f32.mrb[99].mxu1 }
0x1a27   :  { %v6814_v55 = vadd.f32 %v3536_v50, %v6714_v4  ;;  %v3537_v56 = vadd.f32 %v3533_v52, %v6768_v41 }
0x1a29   :  { %v4698_v58 = vpack.c.bf16 %v6814_v55, %v6814_v55  ;;  %v6820_v60 = vadd.f32 %v3537_v56, %v6720_v11 }
0x1a2b   :  { %3548 = vst.msk [vmem:[#allocation2] sm:$0xf0] %vm444_vm6, %v4698_v58  ;;  %v4699_v62 = vpack.c.bf16 %v6820_v60, %v6820_v60  ;;  %v3540_v31 = vpack.c.bf16 %v6820_v60, %v6814_v55 }
0x1a2d   :  { %3549 = vst.msk [vmem:[#allocation2 + $0x8] sm:$0xf0] %vm444_vm6, %v4699_v62 }
0x1a32   :  { %v3550_v37 = vld [vmem:[#allocation2] sm:$0xff] }
0x1a33   :  { %v4643_v1 = vcombine.low %v3550_v37, %v3550_v37  ;;  %v4644_v2 = vcombine.high %v3550_v37, %v3550_v37 }
0x1a34   :  { %v3551_v4 = vld [vmem:[#allocation2 + $0x8] sm:$0xff] }
0x1a35   :  { %v4645_v6 = vcombine.low %v3551_v4, %v3551_v4  ;;  %v4646_v8 = vcombine.high %v3551_v4, %v3551_v4  ;;  %v4647_v41 = vrot.slane %v4643_v1, 11  ;;  %v3564_v14 = vrot.slane %v4644_v2, 7 }
0x1a36   :  { %v3576_v10 = vshrl.u32 %v4644_v2, 16  ;;  %v3571_v11 = vshrl.u32 %v4643_v1, 16  ;;  %v3579_v17 = vshll.u32 %v4644_v2, 16 }
0x1a37   :  { %v4648_v49 = vrot.slane %v4645_v6, 11  ;;  %v3568_v16 = vrot.slane %v4646_v8, 7  ;;  %v3584_v13 = vshrl.u32 %v4645_v6, 16  ;;  %v3589_v51 = vshrl.u32 %v4646_v8, 16 }
0x1a38   :  { %v3578_v15 = vrot.slane %v3576_v10, 7  ;;  %v3565_v57 = vsel %vm6403_vm9, %v4647_v41, %v3564_v14  ;;  %v3592_v61 = vshll.u32 %v4646_v8, 16  ;;  %v4649_v59 = vrot.slane %v3571_v11, 11  ;;  %v4672_v11 = vld [vmem:[#allocation20 + $0x4] ss:$0 sm:$0xff] }
0x1a39   :  { %v3569_v19 = vsel %vm6403_vm9, %v4648_v49, %v3568_v16  ;;  %v3591_v22 = vrot.slane %v3589_v51, 7  ;;  %v4650_v24 = vrot.slane %v3584_v13, 11 }
0x1a3a   :  { %v4655_v18 = vcombine.low %v3565_v57, %v3569_v19  ;;  %v3581_v12 = vor.u32 %v3579_v17, %v3578_v15 }
0x1a3b   :  { %v3594_v25 = vor.u32 %v3592_v61, %v3591_v22 }
0x1a3c   :  { %5233 = vmatmul.mubr.msk.bf16.vlgmr.msra.gmra.mrb[100].mxu1 %vm538_vm12, %v4655_v18  ;;  %v3582_v26 = vsel %vm6412_vm13, %v4649_v59, %v3581_v12 }
0x1a3d   :  { %5245 = vmatpush3.bf16.msra.mxu1 %v5429_v20  ;;  %5248 = vmatprep.mubr.msk.bf16.mxu1 %vm6009_vm0, %v6008_v0  ;;  %v3595_v38 = vsel %vm6412_vm13, %v4650_v24, %v3594_v25  ;;  %v4662_v25 = vld [vmem:[#allocation17 + $0x4] ss:$0 sm:$0xff] }
0x1a3e   :  { %5246 = vmatprep.subr.bf16.mxu1 %v6008_v0  ;;  %v4651_v28 = vcombine.low %v3582_v26, %v3595_v38 }
0x1a40   :  { %5225 = vmatmul.mubr.msk.bf16.vlgmr.msra.gmra.mrb[100].mxu0 %vm538_vm12, %v4651_v28 }
0x1a41   :  { %5247 = vmatpush3.bf16.msra.mxu1 %v5431_v23  ;;  %5237 = vmatpush3.bf16.msra.mxu0 %v5430_v21 }
0x1a42   :  { %5260 = vmatprep.subr.bf16.mxu1 %v6008_v0  ;;  %5238 = vmatprep.subr.bf16.mxu0 %v6008_v0 }
0x1a43   :  { %5240 = vmatprep.mubr.msk.bf16.mxu0 %vm6009_vm0, %v6008_v0 }
0x1a44   :  { %5249 = vmatmul.mubr.msk.bf16.vlgmr.msra.gmra.mrb[104].mxu1 %vm538_vm12, %v4651_v28 }
0x1a45   :  { %5261 = vmatpush3.bf16.msra.mxu1 %v5433_v63  ;;  %5264 = vmatprep.mubr.msk.bf16.mxu1 %vm6009_vm0, %v6008_v0 }
0x1a46   :  { %5239 = vmatpush3.bf16.msra.mxu0 %v5432_v29  ;;  %5262 = vmatprep.subr.bf16.mxu1 %v6008_v0 }
0x1a47   :  { %5252 = vmatprep.subr.bf16.mxu0 %v6008_v0 }
0x1a49   :  { %5241 = vmatmul.mubr.msk.bf16.vlgmr.msra.gmra.mrb[104].mxu0 %vm538_vm12, %v3540_v31  ;;  %5263 = vmatpush3.bf16.msra.mxu1 %v5435_v54 }
0x1a4a   :  { %5253 = vmatpush3.bf16.msra.mxu0 %v5434_v30  ;;  %5256 = vmatprep.mubr.msk.bf16.mxu0 %vm6009_vm0, %v6008_v0 }
0x1a4b   :  { %5254 = vmatprep.subr.bf16.mxu0 %v6008_v0  ;;  %5276 = vmatprep.subr.bf16.mxu1 %v6008_v0 }
0x1a4c   :  { %5265 = vmatmul.mubr.msk.bf16.vlgmr.msra.gmra.mrb[108].mxu1 %vm538_vm12, %v3540_v31 }
0x1a4d   :  { %5277 = vmatpush3.bf16.msra.mxu1 %v6451_v9  ;;  %5278 = vmatprep.mubr.msk.bf16.mxu1 %vm6009_vm0, %v6008_v0 }
0x1a4e   :  { %5255 = vmatpush3.bf16.msra.mxu0 %v5436_v32  ;;  %5288 = vmatprep.subr.bf16.mxu1 %v6008_v0 }
0x1a4f   :  { %5268 = vmatprep.subr.bf16.mxu0 %v6008_v0 }
0x1a51   :  { %5257 = vmatmul.mubr.msk.bf16.vlgmr.msra.gmra.mrb[108].mxu0 %vm538_vm12, %v4655_v18 }
0x1a52   :  { %5272 = vmatprep.mubr.msk.bf16.mxu0 %vm6009_vm0, %v6008_v0  ;;  %5269 = vmatpush3.bf16.msra.mxu0 %v5437_v27 }
0x1a53   :  { %5270 = vmatprep.subr.bf16.mxu0 %v6008_v0 }
0x1a56   :  { %5271 = vmatpush3.bf16.msra.mxu0 %v5438_v33 }
0x1a57   :  { %5282 = vmatprep.subr.bf16.mxu0 %v6008_v0 }
0x1b0f   :  { %v3733_v9 = vpop.f32.mrb[100].mxu1 }
0x1b10   :  { %v5234_v34 = vpop.f32.mrb[101].mxu1 }
0x1b11   :  { %v3736_v35 = vpop.f32.mrb[102].mxu1 }
0x1b12   :  { %v5235_v36 = vpop.f32.mrb[103].mxu1 }
0x1b13   :  { %v3674_v39 = vpop.f32.mrb[100].mxu0 }
0x1b14   :  { %v3734_v43 = vadd.f32 %v3733_v9, %v3674_v39  ;;  %v5226_v45 = vpop.f32.mrb[101].mxu0 }
0x1b15   :  { %v3677_v46 = vpop.f32.mrb[102].mxu0 }
0x1b16   :  { %v3737_v47 = vadd.f32 %v3736_v35, %v3677_v46  ;;  %v5227_v48 = vpop.f32.mrb[103].mxu0 }
0x1b17   :  { %v3854_v50 = vpop.f32.mrb[104].mxu1 }
0x1b18   :  { %v5250_v52 = vpop.f32.mrb[105].mxu1 }
0x1b19   :  { %v3857_v53 = vpop.f32.mrb[106].mxu1 }
0x1b1a   :  { %v5251_v56 = vpop.f32.mrb[107].mxu1 }
0x1b1c   :  { %v3789_v58 = vpop.f32.mrb[104].mxu0 }
0x1b1d   :  { %v3796_v62 = vadd.f32 %v3789_v58, %v3734_v43  ;;  %v5242_v37 = vpop.f32.mrb[105].mxu0 }
0x1b1e   :  { %v3792_v1 = vpop.f32.mrb[106].mxu0 }
0x1b1f   :  { %v3797_v2 = vadd.f32 %v3792_v1, %v3737_v47  ;;  %v5243_v4 = vpop.f32.mrb[107].mxu0  ;;  %v3960_v6 = vpop.f32.mrb[108].mxu1  ;;  %v3806_v23 = vadd.f32 %v4662_v25, %v3796_v62 }
0x1b20   :  { %v5266_v8 = vpop.f32.mrb[109].mxu1 }
0x1b21   :  { %v3963_v41 = vpop.f32.mrb[110].mxu1  ;;  %v3807_v38 = vadd.f32 %v4662_v25, %v3797_v2 }
0x1b22   :  { %v5267_v14 = vpop.f32.mrb[111].mxu1 }
0x1b24   :  { %v3907_v10 = vpop.f32.mrb[108].mxu0 }
0x1b25   :  { %v3908_v49 = vadd.f32 %v3907_v10, %v3854_v50  ;;  %v5258_v16 = vpop.f32.mrb[109].mxu0 }
0x1b26   :  { %v3910_v15 = vpop.f32.mrb[110].mxu0 }
0x1b27   :  { %v3967_v17 = vadd.f32 %v3960_v6, %v3908_v49  ;;  %v3911_v13 = vadd.f32 %v3910_v15, %v3857_v53  ;;  %v5259_v51 = vpop.f32.mrb[111].mxu0  ;;  %v4253_v6 = vld [vmem:[#allocation24] sm:$0xf] }
0x1b28   :  { %v4265_v49 = vsel %vm375_vm3, %v4253_v6, 0 }
0x1b29   :  { %v3977_v57 = vadd.f32 %v4672_v11, %v3967_v17  ;;  %v3968_v19 = vadd.f32 %v3963_v41, %v3911_v13 }
0x1b2b   :  { %v4673_v20 = vmul.f32 -1.442695, %v3977_v57  ;;  %v3978_v18 = vadd.f32 %v4672_v11, %v3968_v19 }
0x1b2d   :  { %5505 = vpow2.f32 %v4673_v20  ;;  %v4674_v12 = vmul.f32 -1.442695, %v3978_v18 }
0x1b2f   :  { %5507 = vpow2.f32 %v4674_v12  ;;  %v5439_v12 = vld [vmem:[#allocation27] sm:$0xff]  }
0x1b37   :  { %v5506_v22 = vpop.eup %5505 }
0x1b38   :  { %v3985_v61 = vadd.f32 1.0, %v5506_v22  ;;  %v5440_v22 = vld [vmem:[#allocation27 + $0x8] sm:$0xff]  }
0x1b39   :  { %v5508_v59 = vpop.eup %5507 }
0x1b3a   :  { %5509 = vrcp.f32 %v3985_v61  ;;  %v3986_v24 = vadd.f32 1.0, %v5508_v59  ;;  %v4381_v61 = vld [vmem:[#allocation30] sm:$0xf] }
0x1b3b   :  { %v4393_v59 = vsel %vm375_vm3, %v4381_v61, 0 }
0x1b3c   :  { %5511 = vrcp.f32 %v3986_v24 }
0x1b44   :  { %v5510_v26 = vpop.eup %5509 }
0x1b45   :  { %v6866_v21 = vmul.f32 %v5510_v26, %v3806_v23 }
0x1b46   :  { %v5512_v28 = vpop.eup %5511 }
0x1b47   :  { %v6868_v63 = vmul.f32 %v5512_v28, %v3807_v38 }
0x1b49   :  { %v3993_v29 = vpack.c.bf16 %v6868_v63, %v6866_v21 }
0x1b4b   :  { %5273 = vmatmul.mubr.msk.bf16.vlgmr.msra.gmra.mrb[112].mxu0 %vm538_vm12, %v3993_v29 }
0x1b4c   :  { %5283 = vmatpush3.bf16.msra.mxu0 %v6465_v3  ;;  %5284 = vmatprep.mubr.msk.bf16.mxu0 %vm6009_vm0, %v6008_v0 }
0x1b4d   :  { %5294 = vmatprep.subr.bf16.mxu0 %v6008_v0 }
0x1c1e   :  { %v4047_v54 = vpop.f32.mrb[112].mxu0 }
0x1c1f   :  { %v4048_v30 = vadd.f32 %v4047_v54, %v6470_v5  ;;  %v5274_v31 = vpop.f32.mrb[113].mxu0 }
0x1c20   :  { %v4050_v32 = vpop.f32.mrb[114].mxu0 }
0x1c21   :  { %v4054_v27 = vpack.c.bf16 %v4048_v30, %v4048_v30  ;;  %v4051_v33 = vadd.f32 %v4050_v32, %v6473_v7  ;;  %v5275_v9 = vpop.f32.mrb[115].mxu0  ;;  %v4684_v32 = vld [vmem:[#allocation29] ss:$0 sm:$0xff] }
0x1c23   :  { %v4055_v34 = vpack.c.bf16 %v4051_v33, %v4051_v33  ;;  %5279 = vmatmul.mubr.msk.bf16.vlgmr.msra.gmra.mrb[112].mxu1 %vm371_vm4, %v4054_v27 }
0x1c24   :  { %5289 = vmatpush3.bf16.msra.mxu1 %v6488_v40  ;;  %5290 = vmatprep.mubr.msk.bf16.mxu1 %vm6009_vm0, %v6008_v0 }
0x1c25   :  { %5285 = vmatmul.mubr.msk.bf16.vlgmr.msra.gmra.mrb[116].mxu0 %vm371_vm4, %v4055_v34  ;;  %5300 = vmatprep.subr.bf16.mxu1 %v6008_v0 }
0x1c26   :  { %5295 = vmatpush3.bf16.msra.mxu0 %v6493_v42  ;;  %5296 = vmatprep.mubr.msk.bf16.mxu0 %vm6009_vm0, %v6008_v0 }
0x1c27   :  { %5306 = vmatprep.subr.bf16.mxu0 %v6008_v0 }
0x1cf6   :  { %v4093_v3 = vpop.f32.mrb[112].mxu1 }
0x1cf7   :  { %v5280_v5 = vpop.f32.mrb[113].mxu1  ;;  %v4142_v7 = vsel %vm371_vm4, %v4093_v3, -inf }
0x1cf8   :  { %4143 = vmax.xlane.f32.xlu0 %v4142_v7  ;;  %v4096_v40 = vpop.f32.mrb[114].mxu1  ;;  %v4136_v35 = vpop.f32.mrb[116].mxu0 }
0x1cf9   :  { %v5281_v36 = vpop.f32.mrb[115].mxu1  ;;  %v5286_v39 = vpop.f32.mrb[117].mxu0  ;;  %v4145_v43 = vsel %vm371_vm4, %v4136_v35, -inf }
0x1cfa   :  { %4146 = vmax.xlane.f32.xlu1 %v4145_v43  ;;  %v4139_v45 = vpop.f32.mrb[118].mxu0 }
0x1cfb   :  { %v5287_v46 = vpop.f32.mrb[119].mxu0 }
0x1d85   :  { %v4144_v42 = vpop.xlane.xlu0 %4143 }
0x1d86   :  { %v4148_v47 = vsub.f32 %v4093_v3, %v4144_v42 }
0x1d87   :  { %v4147_v48 = vpop.xlane.xlu1 %4146 }
0x1d88   :  { %v4150_v50 = vmul.f32 1.442695, %v4148_v47  ;;  %v4149_v52 = vsub.f32 %v4136_v35, %v4147_v48 }
0x1d8a   :  { %5513 = vpow2.f32 %v4150_v50  ;;  %v4152_v53 = vmul.f32 1.442695, %v4149_v52 }
0x1d8c   :  { %5515 = vpow2.f32 %v4152_v53 }
0x1d94   :  { %v5514_v56 = vpop.eup %5513 }
0x1d95   :  { %v4154_v58 = vsel %vm371_vm4, %v5514_v56, 0.0 }
0x1d96   :  { %v5516_v62 = vpop.eup %5515  ;;  %4155 = vadd.xlane.f32.xlu0 %v4154_v58 }
0x1d97   :  { %v4157_v37 = vsel %vm371_vm4, %v5516_v62, 0.0 }
0x1d98   :  { %4158 = vadd.xlane.f32.xlu1 %v4157_v37 }
0x1e23   :  { %v4156_v1 = vpop.xlane.xlu0 %4155 }
0x1e24   :  { %5517 = vrcp.f32 %v4156_v1 }
0x1e25   :  { %v4159_v2 = vpop.xlane.xlu1 %4158 }
0x1e26   :  { %5519 = vrcp.f32 %v4159_v2 }
0x1e2e   :  { %v5518_v4 = vpop.eup %5517 }
0x1e2f   :  { %v4162_v8 = vmul.f32 %v5518_v4, %v5514_v56 }
0x1e30   :  { %v5520_v41 = vpop.eup %5519 }
0x1e31   :  { %v4164_v14 = vpack.c.bf16 %v4162_v8, %v4162_v8  ;;  %v4163_v10 = vmul.f32 %v5520_v41, %v5516_v62 }
0x1e33   :  { %v4165_v16 = vpack.c.bf16 %v4163_v10, %v4163_v10  ;;  %5291 = vmatmul.mubr.msk.bf16.vlgmr.msra.gmra.mrb[116].mxu1 %vm371_vm4, %v4164_v14 }
0x1e34   :  { %5301 = vmatpush3.bf16.msra.mxu1 %v4265_v49  ;;  %5302 = vmatprep.mubr.msk.bf16.mxu1 %vm6009_vm0, %v6008_v0 }
0x1e35   :  { %5297 = vmatmul.mubr.msk.bf16.vlgmr.msra.gmra.mrb[120].mxu0 %vm371_vm4, %v4165_v16  ;;  %5314 = vmatprep.subr.bf16.mxu1 %v6008_v0 }
0x1e36   :  { %5310 = vmatprep.mubr.msk.bf16.mxu0 %vm6009_vm0, %v6008_v0  ;;  %5307 = vmatpush3.bf16.msra.mxu0 %v5439_v12 }
0x1e37   :  { %5308 = vmatprep.subr.bf16.mxu0 %v6008_v0 }
0x1e3a   :  { %5309 = vmatpush3.bf16.msra.mxu0 %v5440_v22 }
0x1f06   :  { %v4203_v11 = vpop.f32.mrb[116].mxu1 }
0x1f07   :  { %v5292_v15 = vpop.f32.mrb[117].mxu1 }
0x1f08   :  { %v4206_v17 = vpop.f32.mrb[118].mxu1  ;;  %v4246_v13 = vpop.f32.mrb[120].mxu0 }
0x1f09   :  { %v4252_v51 = vpack.c.bf16 %v4246_v13, %v4203_v11  ;;  %v5293_v57 = vpop.f32.mrb[119].mxu1  ;;  %v5298_v19 = vpop.f32.mrb[121].mxu0 }
0x1f0a   :  { %v4249_v20 = vpop.f32.mrb[122].mxu0 }
0x1f0b   :  { %v5299_v18 = vpop.f32.mrb[123].mxu0  ;;  %5303 = vmatmul.mubr.msk.bf16.vlgmr.msra.gmra.mrb[120].mxu1 %vm371_vm4, %v4252_v51 }
0x1f0c   :  { %5316 = vmatprep.mubr.msk.bf16.mxu1 %vm6009_vm0, %v6008_v0  ;;  %5315 = vmatpush3.bf16.msra.mxu1 %v4393_v59 }
0x1fde   :  { %v4301_v24 = vpop.f32.mrb[120].mxu1 }
0x1fdf   :  { %v4302_v25 = vadd.f32 %v6808_v44, %v4301_v24  ;;  %v5304_v23 = vpop.f32.mrb[121].mxu1 }
0x1fe0   :  { %v4304_v26 = vpop.f32.mrb[122].mxu1 }
0x1fe1   :  { %v4308_v38 = vadd.f32 %v4302_v25, %v6866_v21  ;;  %v4305_v28 = vadd.f32 %v6808_v44, %v4304_v26  ;;  %v5305_v29 = vpop.f32.mrb[123].mxu1  ;;  %v4688_v44 = vld [vmem:[#allocation32] ss:$0 sm:$0xff] }
0x1fe3   :  { %v4309_v54 = vadd.f32 %v4305_v28, %v6868_v63  ;;  %v4310_v0 = vadd.f32 %v4308_v38, %v6814_v55 }
0x1fe5   :  { %v4311_v30 = vadd.f32 %v4309_v54, %v6820_v60 }
0x1fe7   :  { %v4312_v31 = vpack.c.bf16 %v4311_v30, %v4310_v0 }
0x1fe9   :  { %5311 = vmatmul.mubr.msk.bf16.vlgmr.msra.gmra.mrb[124].mxu0 %vm538_vm12, %v4312_v31 }
0x20bc   :  { %v4373_v27 = vpop.f32.mrb[124].mxu0 }
0x20bd   :  { %v5312_v33 = vpop.f32.mrb[125].mxu0  ;;  %v4374_v34 = vadd.f32 %v4684_v32, %v4373_v27 }
0x20be   :  { %v4376_v9 = vpop.f32.mrb[126].mxu0 }
0x20bf   :  { %v4377_v3 = vadd.f32 %v4684_v32, %v4376_v9  ;;  %v5313_v5 = vpop.f32.mrb[127].mxu0 }
0x20c1   :  { %v4380_v21 = vpack.c.bf16 %v4377_v3, %v4374_v34 }
0x20c3   :  { %5317 = vmatmul.mubr.msk.bf16.vlgmr.msra.gmra.mrb[124].mxu1 %vm371_vm4, %v4380_v21 }
0x2196   :  { %v4429_v7 = vpop.f32.mrb[124].mxu1 }
0x2197   :  { %v4430_v55 = vadd.f32 %v4688_v44, %v4429_v7  ;;  %v5318_v63 = vpop.f32.mrb[125].mxu1 }
0x2198   :  { %v4432_v60 = vpop.f32.mrb[126].mxu1 }
0x2199   :  { %4436 = vst [vmem:[#allocation33] sm:$0xff] %v4430_v55  ;;  %v4433_v40 = vadd.f32 %v4688_v44, %v4432_v60  ;;  %v5319_v35 = vpop.f32.mrb[127].mxu1 }
0x219b   :  { %4437 = vst [vmem:[#allocation33 + $0x8] sm:$0xff] %v4433_v40 }
0x219c   :  { %5950 = shalt.err (!%p5947_p2)
}
0x219d   :  { %s6973_s7 = sld [smem:[#allocation51_spill]] }
0x21a3   :  { %s5951_s3 = scalar_lea.hbm %s6973_s7, 256 }
0x21a4   :  { %p5952_p3 = scmp.ne.s32.totalorder %s6973_s7, %s5951_s3  ;;  %p5955_p4 = scmp.lt.u32.totalorder %s5951_s3, %s6973_s7 }
0x21a6   :  { %p5957_p5 = pnand %p5955_p4, %p5952_p3 }
0x21a8   :  { %5960 = shalt.err (!%p5957_p5)
}
0x21a9   :  { %4449 = dma.vmem_to_hbm [thread:$0]  %s4444_s8, 256, %s6973_s7, [#allocation5], %s5995_s17, %s5995_s17, %s5996_s20  }
0x21aa   :  { %5981 = dma.done.wait [#allocation5], 256  }
0x21ab   :  { %5982 = vsyncadd [#allocation5], 4294967040 }
0x21ac   :  { %4453 = vsyncpa [#allocation4], 1 }
0x21ad   :  { %4454 = vsyncpa [#allocation7], 1 }
0x21ae   :  { %4455 = vsyncpa [#allocation10], 1 }
0x21af   :  { %4456 = vsyncpa [#allocation13], 1 }
0x21b0   :  { %4457 = vsyncpa [#allocation16], 1 }
0x21b1   :  { %4458 = vsyncpa [#allocation19], 1 }
0x21b2   :  { %4459 = vsyncpa [#allocation22], 1 }
0x21b3   :  { %4460 = vsyncpa [#allocation25], 1 }
0x21b4   :  { %4461 = vsyncpa [#allocation28], 1 }
0x21b5   :  { %4462 = vsyncpa [#allocation31], 1 }
0x21b6   :  { %4463 = vsyncpa [#allocation5], 1 }

</bundles_post_ra>
